<compile_context>
chip_gen: v7x
topology: tpu7x:2x2x1
jax: 0.10.0
libtpu: 0.0.40
codegen_flags: <defaults>
</compile_context>

<pallas_src>
import jax
import jax.numpy as jnp
from jax.experimental import pallas as pl
from jax.experimental.pallas import tpu as pltpu


# ---------------------------------------------------------------------------
# im2col glue (XLA): (N,H,W,C) -> (N*H*W, 9*C), tap-major (dy, dx, c) ordering,
# matching w.reshape(9*C, Cout) of a (3,3,C,Cout) weight.
# ---------------------------------------------------------------------------
def im2col_3x3(x_nhwc):
    N, H, W, C = x_nhwc.shape
    xp = jnp.pad(x_nhwc, ((0, 0), (1, 1), (1, 1), (0, 0)))
    cols = [xp[:, dy:dy + H, dx:dx + W, :] for dy in range(3) for dx in range(3)]
    return jnp.concatenate(cols, axis=-1).reshape(N * H * W, 9 * C)


# ---------------------------------------------------------------------------
# Conv1 (2048->512, 3x3, pad=1) + ReLU as a K-tiled im2col matmul.
# Grid = (Cout tiles [parallel], K tiles [arbitrary]); f32 accumulator scratch.
# ---------------------------------------------------------------------------
def _conv_matmul_relu_kernel(x_ref, w_ref, b_ref, o_ref, acc_ref):
    @pl.when(pl.program_id(1) == 0)
    def _():
        acc_ref[...] = jnp.zeros_like(acc_ref)

    acc_ref[...] += jnp.dot(x_ref[...], w_ref[...],
                            preferred_element_type=jnp.float32)

    @pl.when(pl.program_id(1) == pl.num_programs(1) - 1)
    def _():
        y = acc_ref[...] + b_ref[...]
        o_ref[...] = jnp.maximum(y, 0.0).astype(o_ref.dtype)


def conv3x3_relu_matmul(xcol, wcol, b2d, *, cout_tile, k_tile):
    """xcol: (M, K) bf16; wcol: (K, Cout) bf16; b2d: (1, Cout) f32.
    Returns (M, Cout) bf16 = relu(xcol @ wcol + b)."""
    M, K = xcol.shape
    Cout = wcol.shape[-1]
    assert K % k_tile == 0 and Cout % cout_tile == 0
    return pl.pallas_call(
        _conv_matmul_relu_kernel,
        out_shape=jax.ShapeDtypeStruct((M, Cout), jnp.bfloat16),
        grid_spec=pltpu.PrefetchScalarGridSpec(
            num_scalar_prefetch=0,
            grid=(Cout // cout_tile, K // k_tile),
            in_specs=[
                pl.BlockSpec((M, k_tile), lambda j, k: (0, k)),
                pl.BlockSpec((k_tile, cout_tile), lambda j, k: (k, j)),
                pl.BlockSpec((1, cout_tile), lambda j, k: (0, j)),
            ],
            out_specs=pl.BlockSpec((M, cout_tile), lambda j, k: (0, j)),
            scratch_shapes=[pltpu.VMEM((M, cout_tile), jnp.float32)],
        ),
        compiler_params=pltpu.CompilerParams(
            dimension_semantics=("parallel", "arbitrary"),
            vmem_limit_bytes=32 << 20),
    )(xcol, wcol, b2d)


# ---------------------------------------------------------------------------
# Fused conv2 (512->256, 3x3, pad=1) + BatchNorm2d (batch stats) + ReLU +
# AdaptiveAvgPool2d(1) + Flatten + Linear(256,64)+ReLU + Linear(64,38) + Softmax.
# K-tiled matmul for conv2; the whole head runs under pl.when(last K step).
# ---------------------------------------------------------------------------
def _make_conv2_head_kernel(N, H, W, C):
    M = N * H * W
    HW = H * W
    eps = 1e-5

    def kernel(xcol_ref, w_ref, b_ref, gamma_ref, beta_ref,
               w1_ref, b1_ref, w2_ref, b2_ref, o_ref, acc_ref):
        @pl.when(pl.program_id(0) == 0)
        def _():
            acc_ref[...] = jnp.zeros_like(acc_ref)

        acc_ref[...] += jnp.dot(xcol_ref[...], w_ref[...],
                                preferred_element_type=jnp.float32)

        @pl.when(pl.program_id(0) == pl.num_programs(0) - 1)
        def _():
            y = acc_ref[...] + b_ref[...]                          # (M, C) f32
            # BatchNorm2d training-mode batch stats (biased var), one pass.
            mean = jnp.mean(y, axis=0, keepdims=True)              # (1, C)
            var = jnp.mean(y * y, axis=0, keepdims=True) - mean * mean
            z = (y - mean) * jax.lax.rsqrt(var + eps)
            z = z * gamma_ref[...] + beta_ref[...]
            z = jnp.maximum(z, 0.0)                                # relu2
            # AdaptiveAvgPool2d((1,1)) + Flatten -> per-sample mean over H*W.
            g = jnp.mean(z.reshape(N, HW, C), axis=1)              # (N, C)
            # Linear(256,64) + ReLU
            h = jnp.dot(g, w1_ref[...],
                        preferred_element_type=jnp.float32) + b1_ref[...]
            h = jnp.maximum(h, 0.0)
            # Linear(64,38)
            logits = jnp.dot(h, w2_ref[...],
                             preferred_element_type=jnp.float32) + b2_ref[...]
            # Softmax over dim=1 (class axis)
            mmax = jnp.max(logits, axis=-1, keepdims=True)
            e = jnp.exp(logits - mmax)
            o_ref[...] = (e / jnp.sum(e, axis=-1, keepdims=True)).astype(o_ref.dtype)

    return kernel


def conv2_bn_head(xcol, wcol, b2d, gamma, beta, w1, b1, w2, b2,
                  *, spatial, k_tile):
    N, H, W = spatial
    M, K = xcol.shape
    C = wcol.shape[-1]
    D1 = w1.shape[-1]
    NC = w2.shape[-1]
    assert K % k_tile == 0 and M == N * H * W
    return pl.pallas_call(
        _make_conv2_head_kernel(N, H, W, C),
        out_shape=jax.ShapeDtypeStruct((N, NC), jnp.float32),
        grid_spec=pltpu.PrefetchScalarGridSpec(
            num_scalar_prefetch=0,
            grid=(K // k_tile,),
            in_specs=[
                pl.BlockSpec((M, k_tile), lambda k: (0, k)),
                pl.BlockSpec((k_tile, C), lambda k: (k, 0)),
                pl.BlockSpec((1, C), lambda k: (0, 0)),
                pl.BlockSpec((1, C), lambda k: (0, 0)),
                pl.BlockSpec((1, C), lambda k: (0, 0)),
                pl.BlockSpec((C, D1), lambda k: (0, 0)),
                pl.BlockSpec((1, D1), lambda k: (0, 0)),
                pl.BlockSpec((D1, NC), lambda k: (0, 0)),
                pl.BlockSpec((1, NC), lambda k: (0, 0)),
            ],
            out_specs=pl.BlockSpec((N, NC), lambda k: (0, 0)),
            scratch_shapes=[pltpu.VMEM((M, C), jnp.float32)],
        ),
        compiler_params=pltpu.CompilerParams(
            dimension_semantics=("arbitrary",),
            vmem_limit_bytes=32 << 20),
    )(xcol, wcol, b2d, gamma, beta, w1, b1, w2, b2)


# ---------------------------------------------------------------------------
# Full head forward (glue in plain JAX, hot paths in Pallas kernels)
# ---------------------------------------------------------------------------
@jax.jit
def diseased_cnn_head(x_nhwc, kp):
    N, H, W, _ = x_nhwc.shape
    # Conv1 + ReLU: im2col once, K = 9*2048 = 18432, bf16 operands, f32 acc.
    xcol1 = im2col_3x3(x_nhwc.astype(jnp.bfloat16))
    y = conv3x3_relu_matmul(xcol1, kp["wcol1"], kp["b_conv1"],
                            cout_tile=256, k_tile=4608)            # (M, 512) bf16
    y = y.reshape(N, H, W, 512)
    # Fused conv2 + BN + ReLU + pool + MLP + softmax, K = 9*512 = 4608.
    xcol2 = im2col_3x3(y)
    return conv2_bn_head(xcol2, kp["wcol2"], kp["b_conv2"],
                         kp["bn_gamma"], kp["bn_beta"],
                         kp["w_fc1"], kp["b_fc1"], kp["w_fc2"], kp["b_fc2"],
                         spatial=(N, H, W), k_tile=1152)           # (N, 38)


def init_params(key):
    ks = jax.random.split(key, 6)
    s = 0.05
    return {
        # conv weights stored as (kh, kw, Cin, Cout); PyTorch's (Cout,Cin,kh,kw)
        # would be transposed(2,3,1,0) into this layout.
        "w_conv1": s * jax.random.normal(ks[0], (3, 3, 2048, 512), jnp.float32),
        "b_conv1": s * jax.random.normal(ks[1], (512,), jnp.float32),
        "w_conv2": s * jax.random.normal(ks[2], (3, 3, 512, 256), jnp.float32),
        "b_conv2": s * jax.random.normal(ks[3], (256,), jnp.float32),
        "bn_gamma": jnp.ones((256,), jnp.float32),
        "bn_beta": jnp.zeros((256,), jnp.float32),
        # fc weights stored as (in, out); PyTorch's (out,in) would be transposed.
        "w_fc1": s * jax.random.normal(ks[4], (256, 64), jnp.float32),
        "b_fc1": jnp.zeros((64,), jnp.float32),
        "w_fc2": s * jax.random.normal(ks[5], (64, 38), jnp.float32),
        "b_fc2": jnp.zeros((38,), jnp.float32),
    }


def prepare_params(p):
    """One-time host-side prep: K-major contiguous (9*Cin, Cout) conv weight
    slabs in bf16 (halves streamed HBM bytes), biases/affine params as (1, C)."""
    return {
        "wcol1": p["w_conv1"].reshape(9 * 2048, 512).astype(jnp.bfloat16),
        "b_conv1": p["b_conv1"].reshape(1, 512),
        "wcol2": p["w_conv2"].reshape(9 * 512, 256).astype(jnp.bfloat16),
        "b_conv2": p["b_conv2"].reshape(1, 256),
        "bn_gamma": p["bn_gamma"].reshape(1, 256),
        "bn_beta": p["bn_beta"].reshape(1, 256),
        "w_fc1": p["w_fc1"], "b_fc1": p["b_fc1"].reshape(1, 64),
        "w_fc2": p["w_fc2"], "b_fc2": p["b_fc2"].reshape(1, 38),
    }


if __name__ == "__main__":
    key = jax.random.PRNGKey(0)
    k_x, k_p = jax.random.split(key)

    # Backbone feature map as the ResNet50 trunk would emit for small images:
    # NCHW (2, 2048, 4, 4), transposed to NHWC for the kernels.
    x_nchw = jax.random.normal(k_x, (2, 2048, 4, 4), jnp.float32)
    x_nhwc = jnp.transpose(x_nchw, (0, 2, 3, 1))

    params = init_params(k_p)
    kparams = prepare_params(params)   # done once, outside jit

    out = diseased_cnn_head(x_nhwc, kparams)
    out = jax.block_until_ready(out)

    assert out.shape == (2, 38), out.shape
    # softmax rows must sum to 1
    assert jnp.allclose(jnp.sum(out, axis=-1), 1.0, atol=1e-4)
    print("KERNEL_OK")
</pallas_src>

<mosaic_0001>
module attributes {stable_mosaic.version = 11 : i64} {
  func.func @_conv_matmul_relu_kernel(%arg0: i32, %arg1: i32, %arg2: memref<32x4608xbf16, #tpu.memory_space<vmem>>, %arg3: memref<4608x256xbf16, #tpu.memory_space<vmem>>, %arg4: memref<1x256xf32, #tpu.memory_space<vmem>>, %arg5: memref<32x256xbf16, #tpu.memory_space<vmem>>, %arg6: memref<32x256xf32, #tpu.memory_space<vmem>>) attributes {dimension_semantics = [#tpu.dimension_semantics<parallel>, #tpu.dimension_semantics<arbitrary>], iteration_bounds = array<i64: 2, 4>, scalar_prefetch = 0 : i64, scratch_operands = 1 : i64, tpu.core_type = #tpu.core_type<tc>, window_params = [{transform_indices = @transform_0, window_bounds = array<i64: 32, 4608>}, {transform_indices = @transform_1, window_bounds = array<i64: 4608, 256>}, {transform_indices = @transform_2, window_bounds = array<i64: 1, 256>}, {transform_indices = @transform_3, window_bounds = array<i64: 32, 256>}]} {
    %c0_i32 = arith.constant 0 : i32
    %0 = arith.cmpi eq, %arg1, %c0_i32 : i32
    %1 = arith.extui %0 : i1 to i32
    %c0_i32_0 = arith.constant 0 : i32
    %2 = arith.cmpi ne, %1, %c0_i32_0 : i32
    scf.if %2 {
      %cst_9 = arith.constant 0.000000e+00 : f32
      %12 = vector.broadcast %cst_9 : f32 to vector<32x256xf32>
      %c0_10 = arith.constant 0 : index
      %c0_11 = arith.constant 0 : index
      %13 = vector.load %arg6[%c0_10, %c0_11] : memref<32x256xf32, #tpu.memory_space<vmem>>, vector<32x256xf32>
      tpu.vector_store %arg6[%c0_10, %c0_11], %12 {strides = array<i32>} : memref<32x256xf32, #tpu.memory_space<vmem>>, vector<32x256xf32>,
    } else {
    }
    %c0 = arith.constant 0 : index
    %c0_1 = arith.constant 0 : index
    %3 = vector.load %arg6[%c0, %c0_1] : memref<32x256xf32, #tpu.memory_space<vmem>>, vector<32x256xf32>
    %c0_2 = arith.constant 0 : index
    %c0_3 = arith.constant 0 : index
    %4 = vector.load %arg2[%c0_2, %c0_3] : memref<32x4608xbf16, #tpu.memory_space<vmem>>, vector<32x4608xbf16>
    %c0_4 = arith.constant 0 : index
    %c0_5 = arith.constant 0 : index
    %5 = vector.load %arg3[%c0_4, %c0_5] : memref<4608x256xbf16, #tpu.memory_space<vmem>>, vector<4608x256xbf16>
    %cst = arith.constant dense<0.000000e+00> : vector<32x256xf32>
    %6 = tpu.matmul %4, %5, %cst {dimension_numbers = #tpu.dot_dimension_numbers<[1], [0], [0], [1], [0, 0, 1, 1], [], []>} : vector<32x4608xbf16>, vector<4608x256xbf16>, vector<32x256xf32> -> vector<32x256xf32>
    %7 = arith.addf %3, %6 : vector<32x256xf32>
    %c0_6 = arith.constant 0 : index
    %c0_7 = arith.constant 0 : index
    %8 = vector.load %arg6[%c0_6, %c0_7] : memref<32x256xf32, #tpu.memory_space<vmem>>, vector<32x256xf32>
    tpu.vector_store %arg6[%c0_6, %c0_7], %7 {strides = array<i32>} : memref<32x256xf32, #tpu.memory_space<vmem>>, vector<32x256xf32>,
    %c3_i32 = arith.constant 3 : i32
    %9 = arith.cmpi eq, %arg1, %c3_i32 : i32
    %10 = arith.extui %9 : i1 to i32
    %c0_i32_8 = arith.constant 0 : i32
    %11 = arith.cmpi ne, %10, %c0_i32_8 : i32
    scf.if %11 {
      %c0_9 = arith.constant 0 : index
      %c0_10 = arith.constant 0 : index
      %12 = vector.load %arg6[%c0_9, %c0_10] : memref<32x256xf32, #tpu.memory_space<vmem>>, vector<32x256xf32>
      %c0_11 = arith.constant 0 : index
      %c0_12 = arith.constant 0 : index
      %13 = vector.load %arg4[%c0_11, %c0_12] : memref<1x256xf32, #tpu.memory_space<vmem>>, vector<1x256xf32>
      %14 = vector.broadcast %13 : vector<1x256xf32> to vector<32x256xf32>
      %15 = arith.addf %12, %14 : vector<32x256xf32>
      %cst_13 = arith.constant 0.000000e+00 : f32
      %16 = vector.broadcast %cst_13 : f32 to vector<32x256xf32>
      %17 = arith.maximumf %15, %16 : vector<32x256xf32>
      %18 = arith.truncf %17 : vector<32x256xf32> to vector<32x256xbf16>
      %c0_14 = arith.constant 0 : index
      %c0_15 = arith.constant 0 : index
      %19 = vector.load %arg5[%c0_14, %c0_15] : memref<32x256xbf16, #tpu.memory_space<vmem>>, vector<32x256xbf16>
      tpu.vector_store %arg5[%c0_14, %c0_15], %18 {strides = array<i32>} : memref<32x256xbf16, #tpu.memory_space<vmem>>, vector<32x256xbf16>,
    } else {
    }
    return
  }
  func.func @transform_0(%arg0: i32, %arg1: i32) -> (i32, i32) {
    %c0_i32 = arith.constant 0 : i32
    %c0_i32_0 = arith.constant 0 : i32
    return %c0_i32, %arg1 : i32, i32
  }
  func.func @transform_1(%arg0: i32, %arg1: i32) -> (i32, i32) {
    %c0_i32 = arith.constant 0 : i32
    return %arg1, %arg0 : i32, i32
  }
  func.func @transform_2(%arg0: i32, %arg1: i32) -> (i32, i32) {
    %c0_i32 = arith.constant 0 : i32
    %c0_i32_0 = arith.constant 0 : i32
    return %c0_i32, %arg0 : i32, i32
  }
  func.func @transform_3(%arg0: i32, %arg1: i32) -> (i32, i32) {
    %c0_i32 = arith.constant 0 : i32
    %c0_i32_0 = arith.constant 0 : i32
    return %c0_i32, %arg0 : i32, i32
  }
}

module attributes {stable_mosaic.version = 11 : i64} {
  func.func @kernel(%arg0: i32, %arg1: memref<32x1152xbf16, #tpu.memory_space<vmem>>, %arg2: memref<1152x256xbf16, #tpu.memory_space<vmem>>, %arg3: memref<1x256xf32, #tpu.memory_space<vmem>>, %arg4: memref<1x256xf32, #tpu.memory_space<vmem>>, %arg5: memref<1x256xf32, #tpu.memory_space<vmem>>, %arg6: memref<256x64xf32, #tpu.memory_space<vmem>>, %arg7: memref<1x64xf32, #tpu.memory_space<vmem>>, %arg8: memref<64x38xf32, #tpu.memory_space<vmem>>, %arg9: memref<1x38xf32, #tpu.memory_space<vmem>>, %arg10: memref<2x38xf32, #tpu.memory_space<vmem>>, %arg11: memref<32x256xf32, #tpu.memory_space<vmem>>) attributes {dimension_semantics = [#tpu.dimension_semantics<arbitrary>], iteration_bounds = array<i64: 4>, scalar_prefetch = 0 : i64, scratch_operands = 1 : i64, tpu.core_type = #tpu.core_type<tc>, window_params = [{transform_indices = @transform_0, window_bounds = array<i64: 32, 1152>}, {transform_indices = @transform_1, window_bounds = array<i64: 1152, 256>}, {pipeline_mode = #tpu.pipeline_mode<synchronous>, transform_indices = @transform_2, window_bounds = array<i64: 1, 256>}, {pipeline_mode = #tpu.pipeline_mode<synchronous>, transform_indices = @transform_3, window_bounds = array<i64: 1, 256>}, {pipeline_mode = #tpu.pipeline_mode<synchronous>, transform_indices = @transform_4, window_bounds = array<i64: 1, 256>}, {pipeline_mode = #tpu.pipeline_mode<synchronous>, transform_indices = @transform_5, window_bounds = array<i64: 256, 64>}, {pipeline_mode = #tpu.pipeline_mode<synchronous>, transform_indices = @transform_6, window_bounds = array<i64: 1, 64>}, {pipeline_mode = #tpu.pipeline_mode<synchronous>, transform_indices = @transform_7, window_bounds = array<i64: 64, 38>}, {pipeline_mode = #tpu.pipeline_mode<synchronous>, transform_indices = @transform_8, window_bounds = array<i64: 1, 38>}, {pipeline_mode = #tpu.pipeline_mode<synchronous>, transform_indices = @transform_9, window_bounds = array<i64: 2, 38>}]} {
    %c0_i32 = arith.constant 0 : i32
    %0 = arith.cmpi eq, %arg0, %c0_i32 : i32
    %1 = arith.extui %0 : i1 to i32
    %c0_i32_0 = arith.constant 0 : i32
    %2 = arith.cmpi ne, %1, %c0_i32_0 : i32
    scf.if %2 {
      %cst_9 = arith.constant 0.000000e+00 : f32
      %12 = vector.broadcast %cst_9 : f32 to vector<32x256xf32>
      %c0_10 = arith.constant 0 : index
      %c0_11 = arith.constant 0 : index
      %13 = vector.load %arg11[%c0_10, %c0_11] : memref<32x256xf32, #tpu.memory_space<vmem>>, vector<32x256xf32>
      tpu.vector_store %arg11[%c0_10, %c0_11], %12 {strides = array<i32>} : memref<32x256xf32, #tpu.memory_space<vmem>>, vector<32x256xf32>,
    } else {
    }
    %c0 = arith.constant 0 : index
    %c0_1 = arith.constant 0 : index
    %3 = vector.load %arg11[%c0, %c0_1] : memref<32x256xf32, #tpu.memory_space<vmem>>, vector<32x256xf32>
    %c0_2 = arith.constant 0 : index
    %c0_3 = arith.constant 0 : index
    %4 = vector.load %arg1[%c0_2, %c0_3] : memref<32x1152xbf16, #tpu.memory_space<vmem>>, vector<32x1152xbf16>
    %c0_4 = arith.constant 0 : index
    %c0_5 = arith.constant 0 : index
    %5 = vector.load %arg2[%c0_4, %c0_5] : memref<1152x256xbf16, #tpu.memory_space<vmem>>, vector<1152x256xbf16>
    %cst = arith.constant dense<0.000000e+00> : vector<32x256xf32>
    %6 = tpu.matmul %4, %5, %cst {dimension_numbers = #tpu.dot_dimension_numbers<[1], [0], [0], [1], [0, 0, 1, 1], [], []>} : vector<32x1152xbf16>, vector<1152x256xbf16>, vector<32x256xf32> -> vector<32x256xf32>
    %7 = arith.addf %3, %6 : vector<32x256xf32>
    %c0_6 = arith.constant 0 : index
    %c0_7 = arith.constant 0 : index
    %8 = vector.load %arg11[%c0_6, %c0_7] : memref<32x256xf32, #tpu.memory_space<vmem>>, vector<32x256xf32>
    tpu.vector_store %arg11[%c0_6, %c0_7], %7 {strides = array<i32>} : memref<32x256xf32, #tpu.memory_space<vmem>>, vector<32x256xf32>,
    %c3_i32 = arith.constant 3 : i32
    %9 = arith.cmpi eq, %arg0, %c3_i32 : i32
    %10 = arith.extui %9 : i1 to i32
    %c0_i32_8 = arith.constant 0 : i32
    %11 = arith.cmpi ne, %10, %c0_i32_8 : i32
    scf.if %11 {
      %c0_9 = arith.constant 0 : index
      %c0_10 = arith.constant 0 : index
      %12 = vector.load %arg11[%c0_9, %c0_10] : memref<32x256xf32, #tpu.memory_space<vmem>>, vector<32x256xf32>
      %c0_11 = arith.constant 0 : index
      %c0_12 = arith.constant 0 : index
      %13 = vector.load %arg3[%c0_11, %c0_12] : memref<1x256xf32, #tpu.memory_space<vmem>>, vector<1x256xf32>
      %14 = vector.broadcast %13 : vector<1x256xf32> to vector<32x256xf32>
      %15 = arith.addf %12, %14 : vector<32x256xf32>
      %cst_13 = arith.constant dense<0.000000e+00> : vector<256xf32>
      %16 = vector.multi_reduction <add>, %15, %cst_13 [0] : vector<32x256xf32> to vector<256xf32>
      %17 = vector.shape_cast %16 : vector<256xf32> to vector<1x256xf32>
      %cst_14 = arith.constant 3.200000e+01 : f32
      %18 = vector.broadcast %cst_14 : f32 to vector<1x256xf32>
      %19 = arith.divf %17, %18 : vector<1x256xf32>
      %20 = arith.mulf %15, %15 : vector<32x256xf32>
      %cst_15 = arith.constant dense<0.000000e+00> : vector<256xf32>
      %21 = vector.multi_reduction <add>, %20, %cst_15 [0] : vector<32x256xf32> to vector<256xf32>
      %22 = vector.shape_cast %21 : vector<256xf32> to vector<1x256xf32>
      %cst_16 = arith.constant 3.200000e+01 : f32
      %23 = vector.broadcast %cst_16 : f32 to vector<1x256xf32>
      %24 = arith.divf %22, %23 : vector<1x256xf32>
      %25 = arith.mulf %19, %19 : vector<1x256xf32>
      %26 = arith.subf %24, %25 : vector<1x256xf32>
      %27 = vector.broadcast %19 : vector<1x256xf32> to vector<32x256xf32>
      %28 = arith.subf %15, %27 : vector<32x256xf32>
      %cst_17 = arith.constant 9.99999974E-6 : f32
      %29 = vector.broadcast %cst_17 : f32 to vector<1x256xf32>
      %30 = arith.addf %26, %29 : vector<1x256xf32>
      %31 = math.rsqrt %30 : vector<1x256xf32>
      %32 = vector.broadcast %31 : vector<1x256xf32> to vector<32x256xf32>
      %33 = arith.mulf %28, %32 : vector<32x256xf32>
      %c0_18 = arith.constant 0 : index
      %c0_19 = arith.constant 0 : index
      %34 = vector.load %arg4[%c0_18, %c0_19] : memref<1x256xf32, #tpu.memory_space<vmem>>, vector<1x256xf32>
      %35 = vector.broadcast %34 : vector<1x256xf32> to vector<32x256xf32>
      %36 = arith.mulf %33, %35 : vector<32x256xf32>
      %c0_20 = arith.constant 0 : index
      %c0_21 = arith.constant 0 : index
      %37 = vector.load %arg5[%c0_20, %c0_21] : memref<1x256xf32, #tpu.memory_space<vmem>>, vector<1x256xf32>
      %38 = vector.broadcast %37 : vector<1x256xf32> to vector<32x256xf32>
      %39 = arith.addf %36, %38 : vector<32x256xf32>
      %cst_22 = arith.constant 0.000000e+00 : f32
      %40 = vector.broadcast %cst_22 : f32 to vector<32x256xf32>
      %41 = arith.maximumf %39, %40 : vector<32x256xf32>
      %42 = vector.shape_cast %41 : vector<32x256xf32> to vector<2x16x256xf32>
      %cst_23 = arith.constant dense<0.000000e+00> : vector<2x256xf32>
      %43 = vector.multi_reduction <add>, %42, %cst_23 [1] : vector<2x16x256xf32> to vector<2x256xf32>
      %cst_24 = arith.constant 1.600000e+01 : f32
      %44 = vector.broadcast %cst_24 : f32 to vector<2x256xf32>
      %45 = arith.divf %43, %44 : vector<2x256xf32>
      %c0_25 = arith.constant 0 : index
      %c0_26 = arith.constant 0 : index
      %46 = vector.load %arg6[%c0_25, %c0_26] : memref<256x64xf32, #tpu.memory_space<vmem>>, vector<256x64xf32>
      %cst_27 = arith.constant dense<0.000000e+00> : vector<2x64xf32>
      %47 = tpu.matmul %45, %46, %cst_27 {dimension_numbers = #tpu.dot_dimension_numbers<[1], [0], [0], [1], [0, 0, 1, 1], [], []>} : vector<2x256xf32>, vector<256x64xf32>, vector<2x64xf32> -> vector<2x64xf32>
      %c0_28 = arith.constant 0 : index
      %c0_29 = arith.constant 0 : index
      %48 = vector.load %arg7[%c0_28, %c0_29] : memref<1x64xf32, #tpu.memory_space<vmem>>, vector<1x64xf32>
      %49 = vector.broadcast %48 : vector<1x64xf32> to vector<2x64xf32>
      %50 = arith.addf %47, %49 : vector<2x64xf32>
      %cst_30 = arith.constant 0.000000e+00 : f32
      %51 = vector.broadcast %cst_30 : f32 to vector<2x64xf32>
      %52 = arith.maximumf %50, %51 : vector<2x64xf32>
      %c0_31 = arith.constant 0 : index
      %c0_32 = arith.constant 0 : index
      %53 = vector.load %arg8[%c0_31, %c0_32] : memref<64x38xf32, #tpu.memory_space<vmem>>, vector<64x38xf32>
      %cst_33 = arith.constant dense<0.000000e+00> : vector<2x38xf32>
      %54 = tpu.matmul %52, %53, %cst_33 {dimension_numbers = #tpu.dot_dimension_numbers<[1], [0], [0], [1], [0, 0, 1, 1], [], []>} : vector<2x64xf32>, vector<64x38xf32>, vector<2x38xf32> -> vector<2x38xf32>
      %c0_34 = arith.constant 0 : index
      %c0_35 = arith.constant 0 : index
      %55 = vector.load %arg9[%c0_34, %c0_35] : memref<1x38xf32, #tpu.memory_space<vmem>>, vector<1x38xf32>
      %56 = vector.broadcast %55 : vector<1x38xf32> to vector<2x38xf32>
      %57 = arith.addf %54, %56 : vector<2x38xf32>
      %cst_36 = arith.constant dense<0xFF800000> : vector<2xf32>
      %58 = vector.multi_reduction <maximumf>, %57, %cst_36 [1] : vector<2x38xf32> to vector<2xf32>
      %59 = vector.shape_cast %58 : vector<2xf32> to vector<2x1xf32>
      %60 = vector.broadcast %59 : vector<2x1xf32> to vector<2x38xf32>
      %61 = arith.subf %57, %60 : vector<2x38xf32>
      %62 = math.exp %61 : vector<2x38xf32>
      %cst_37 = arith.constant dense<0.000000e+00> : vector<2xf32>
      %63 = vector.multi_reduction <add>, %62, %cst_37 [1] : vector<2x38xf32> to vector<2xf32>
      %64 = vector.shape_cast %63 : vector<2xf32> to vector<2x1xf32>
      %65 = vector.broadcast %64 : vector<2x1xf32> to vector<2x38xf32>
      %66 = arith.divf %62, %65 : vector<2x38xf32>
      %c0_38 = arith.constant 0 : index
      %c0_39 = arith.constant 0 : index
      %67 = vector.load %arg10[%c0_38, %c0_39] : memref<2x38xf32, #tpu.memory_space<vmem>>, vector<2x38xf32>
      tpu.vector_store %arg10[%c0_38, %c0_39], %66 {strides = array<i32>} : memref<2x38xf32, #tpu.memory_space<vmem>>, vector<2x38xf32>,
    } else {
    }
    return
  }
  func.func @transform_0(%arg0: i32) -> (i32, i32) {
    %c0_i32 = arith.constant 0 : i32
    %c0_i32_0 = arith.constant 0 : i32
    return %c0_i32, %arg0 : i32, i32
  }
  func.func @transform_1(%arg0: i32) -> (i32, i32) {
    %c0_i32 = arith.constant 0 : i32
    %c0_i32_0 = arith.constant 0 : i32
    return %arg0, %c0_i32 : i32, i32
  }
  func.func @transform_2(%arg0: i32) -> (i32, i32) {
    %c0_i32 = arith.constant 0 : i32
    %c0_i32_0 = arith.constant 0 : i32
    %c0_i32_1 = arith.constant 0 : i32
    return %c0_i32, %c0_i32_0 : i32, i32
  }
  func.func @transform_3(%arg0: i32) -> (i32, i32) {
    %c0_i32 = arith.constant 0 : i32
    %c0_i32_0 = arith.constant 0 : i32
    %c0_i32_1 = arith.constant 0 : i32
    return %c0_i32, %c0_i32_0 : i32, i32
  }
  func.func @transform_4(%arg0: i32) -> (i32, i32) {
    %c0_i32 = arith.constant 0 : i32
    %c0_i32_0 = arith.constant 0 : i32
    %c0_i32_1 = arith.constant 0 : i32
    return %c0_i32, %c0_i32_0 : i32, i32
  }
  func.func @transform_5(%arg0: i32) -> (i32, i32) {
    %c0_i32 = arith.constant 0 : i32
    %c0_i32_0 = arith.constant 0 : i32
    %c0_i32_1 = arith.constant 0 : i32
    return %c0_i32, %c0_i32_0 : i32, i32
  }
  func.func @transform_6(%arg0: i32) -> (i32, i32) {
    %c0_i32 = arith.constant 0 : i32
    %c0_i32_0 = arith.constant 0 : i32
    %c0_i32_1 = arith.constant 0 : i32
    return %c0_i32, %c0_i32_0 : i32, i32
  }
  func.func @transform_7(%arg0: i32) -> (i32, i32) {
    %c0_i32 = arith.constant 0 : i32
    %c0_i32_0 = arith.constant 0 : i32
    %c0_i32_1 = arith.constant 0 : i32
    return %c0_i32, %c0_i32_0 : i32, i32
  }
  func.func @transform_8(%arg0: i32) -> (i32, i32) {
    %c0_i32 = arith.constant 0 : i32
    %c0_i32_0 = arith.constant 0 : i32
    %c0_i32_1 = arith.constant 0 : i32
    return %c0_i32, %c0_i32_0 : i32, i32
  }
  func.func @transform_9(%arg0: i32) -> (i32, i32) {
    %c0_i32 = arith.constant 0 : i32
    %c0_i32_0 = arith.constant 0 : i32
    %c0_i32_1 = arith.constant 0 : i32
    return %c0_i32, %c0_i32_0 : i32, i32
  }
}

</mosaic_0001>

<bundles_post_ra>
// kernel: diseased_cnn_head.3
= control target key start
LH: loop header
LB: loop body
LE: loop exit
PB: predicated region body
PF: predicated region fallthrough
CT: control target
= control target key end

     0   :  { %14 = vsyncpa [#allocation5], 0  ;;  %s2906_s30 = smov 0   ;;  %s2908_s10 = smov 0   ;;  %s3394_s0 = inlined_call_operand.vmem [shape: bf16[32,4608], index: 0, kind: input, shape index: {}]   ;;  %s3395_s1 = inlined_call_operand.vmem [shape: bf16[4608,256], index: 1, kind: input, shape index: {}]   ;;  %s3396_s2 = inlined_call_operand.vmem [shape: f32[1,256], index: 2, kind: input, shape index: {}]   ;;  %s3397_s3 = inlined_call_operand.vmem [shape: f32[1,256], index: 3, kind: input, shape index: {}]   ;;  %s3398_s4 = inlined_call_operand.vmem [shape: f32[1,256], index: 4, kind: input, shape index: {}]   ;;  %s3399_s5 = inlined_call_operand.vmem [shape: f32[256,64], index: 5, kind: input, shape index: {}]   ;;  %s3400_s6 = inlined_call_operand.vmem [shape: f32[1,64], index: 6, kind: input, shape index: {}]   ;;  %s3401_s7 = inlined_call_operand.vmem [shape: f32[64,38], index: 7, kind: input, shape index: {}]   ;;  %s3402_s8 = inlined_call_operand.vmem [shape: f32[1,38], index: 8, kind: input, shape index: {}]   ;;  %s3403_s9 = inlined_call_operand.hbm [shape: f32[2,38], index: 9, kind: output, shape index: {}]  }
   0x1   :  { %s2910_s11 = smov 0  }
   0x2 LB: > { %s2922_s12 = sadd.s32 4294967295, %s2848_s11   ;;  %s2925_s13 = sadd.s32 1, %s2848_s11   ;;  %s2848_s11 = sphi %s2910_s11, %s3406_s11   ;;  %s2844_s10 = sphi %s2908_s10, %s3405_s10   ;;  %s2840_s30 = sphi %s2906_s30, %s3404_s30  }
   0x3   : > { %s24_s14 = ssub.s32 %s2848_s11, %s2925_s13  ;;  %s27_s15 = sadd.s32 1, %s2844_s10 }
   0x4   : > { %p25_p0 = scmp.eq.s32.totalorder %s24_s14, 0  ;;  %p34_p1 = scmp.ne.s32.totalorder %s2844_s10, %s2840_s30 }
   0x5   : > { %p35_p2 = scmp.eq.s32.totalorder %s2848_s11, 0  ;;  %p2167_p4 = scmp.ge.s32.totalorder %s2848_s11, 4 }
   0x6   : > { %s2934_s16 = scalar_select %p25_p0, %s2844_s10, %s27_s15  }
   0x7   : > { %p36_p3 = por %p35_p2, %p34_p1  ;;  %275 = sbr.rel (%p2167_p4) target bundleno = 29 (0x1d), region = 44 }
   0xe   : > { %278 = sbr.rel (!%p36_p3) target bundleno = 29 (0x1d), region = 48  ;;  %s280_s17 = sand.u32 (%p36_p3), 1, %s2844_s10  }
   0xf   : > { %s2351_s18 = smul.u32 (%p36_p3), 36, %s2848_s11 }
  0x10   : > { %s2508_s19 = smul.u32 (%p36_p3), 144, %s280_s17 }
  0x11   : > { %s2942_s22 = scalar_lea.vmem (%p36_p3), %s3394_s0, %s2351_s18 }
  0x12   : > { %v300_v0 = vld [vmem:[%s2942_s22] sm:$0xff] (%p36_p3)  ;;  %v302_v1 = vld [vmem:[%s2942_s22 + $0x8] sm:$0xff] (%p36_p3)  ;;  %v304_v2 = vld [vmem:[%s2942_s22 + $0x10] sm:$0xff] (%p36_p3)  ;;  %s2947_s23 = scalar_lea.vmem (%p36_p3), [#allocation3], %s2508_s19 }
  0x13   : > { %301 = vst [vmem:[%s2947_s23] sm:$0xff] (%p36_p3), %v300_v0  ;;  %303 = vst [vmem:[%s2947_s23 + $0x8] sm:$0xff] (%p36_p3), %v302_v1  ;;  %v306_v3 = vld [vmem:[%s2942_s22 + $0x18] sm:$0xff] (%p36_p3)  ;;  %v308_v4 = vld [vmem:[%s2942_s22 + $0x90] sm:$0xff] (%p36_p3) }
  0x14   : > { %305 = vst [vmem:[%s2947_s23 + $0x10] sm:$0xff] (%p36_p3), %v304_v2  ;;  %v310_v5 = vld [vmem:[%s2942_s22 + $0x98] sm:$0xff] (%p36_p3)  ;;  %307 = vst [vmem:[%s2947_s23 + $0x18] sm:$0xff] (%p36_p3), %v306_v3  ;;  %v312_v6 = vld [vmem:[%s2942_s22 + $0xa0] sm:$0xff] (%p36_p3) }
  0x15   : > { %309 = vst [vmem:[%s2947_s23 + $0x24] sm:$0xff] %v308_v4  ;;  %311 = vst [vmem:[%s2947_s23 + $0x2c] sm:$0xff] %v310_v5  ;;  %v314_v7 = vld [vmem:[%s2942_s22 + $0xa8] sm:$0xff]  ;;  %v316_v8 = vld [vmem:[%s2942_s22 + $0x120] sm:$0xff] }
  0x16   : > { %313 = vst [vmem:[%s2947_s23 + $0x34] sm:$0xff] %v312_v6  ;;  %315 = vst [vmem:[%s2947_s23 + $0x3c] sm:$0xff] %v314_v7  ;;  %v318_v9 = vld [vmem:[%s2942_s22 + $0x128] sm:$0xff]  ;;  %v320_v10 = vld [vmem:[%s2942_s22 + $0x130] sm:$0xff] }
  0x17   : > { %317 = vst [vmem:[%s2947_s23 + $0x48] sm:$0xff] %v316_v8  ;;  %v322_v11 = vld [vmem:[%s2942_s22 + $0x138] sm:$0xff]  ;;  %319 = vst [vmem:[%s2947_s23 + $0x50] sm:$0xff] %v318_v9  ;;  %v324_v12 = vld [vmem:[%s2942_s22 + $0x1b0] sm:$0xff] }
  0x18   : > { %321 = vst [vmem:[%s2947_s23 + $0x58] sm:$0xff] %v320_v10  ;;  %323 = vst [vmem:[%s2947_s23 + $0x60] sm:$0xff] %v322_v11  ;;  %v326_v13 = vld [vmem:[%s2942_s22 + $0x1b8] sm:$0xff]  ;;  %v328_v14 = vld [vmem:[%s2942_s22 + $0x1c0] sm:$0xff] }
  0x19   : > { %325 = vst [vmem:[%s2947_s23 + $0x6c] sm:$0xff] %v324_v12  ;;  %327 = vst [vmem:[%s2947_s23 + $0x74] sm:$0xff] %v326_v13  ;;  %v330_v15 = vld [vmem:[%s2942_s22 + $0x1c8] sm:$0xff]  ;;  %v2169_v16 = vld [vmem:[%s2942_s22 + $0x20] sm:$0xf] }
  0x1a   : > { %329 = vst [vmem:[%s2947_s23 + $0x7c] sm:$0xff] %v328_v14  ;;  %v2171_v17 = vld [vmem:[%s2942_s22 + $0xb0] sm:$0xf]  ;;  %331 = vst [vmem:[%s2947_s23 + $0x84] sm:$0xff] %v330_v15  ;;  %v2173_v18 = vld [vmem:[%s2942_s22 + $0x140] sm:$0xf] }
  0x1b   : > { %2170 = vst [vmem:[%s2947_s23 + $0x20] sm:$0xf] %v2169_v16  ;;  %2172 = vst [vmem:[%s2947_s23 + $0x44] sm:$0xf] %v2171_v17  ;;  %v2175_v19 = vld [vmem:[%s2942_s22 + $0x1d0] sm:$0xf] }
  0x1c   : > { %2174 = vst [vmem:[%s2947_s23 + $0x68] sm:$0xf] %v2173_v18  ;;  %2176 = vst [vmem:[%s2947_s23 + $0x8c] sm:$0xf] %v2175_v19 }
  0x1d PF: > { %p2177_p5 = scmp.ge.s32.totalorder %s2848_s11, 1  ;;  %p361_p6 = scmp.lt.s32.totalorder %s2848_s11, 5 }
  0x1f   : > { %p362_p7 = pnand %p2177_p5, %p361_p6 }
  0x20   : > { %s368_s24 = sand.u32 (!%p362_p7), 1, %s2840_s30   ;;  %s405_s25 = smul.u32 (!%p362_p7), 144, %s2922_s12 }
  0x21   : > { %365 = sbr.rel (%p362_p7) target bundleno = 1274 (0x4fa), region = 78  ;;  %p2180_p9 = scmp.ne.s32.totalorder (!%p362_p7), %s2922_s12, 0 }
  0x22   : > { %s2509_s26 = smul.u32 (!%p362_p7), 144, %s368_s24  ;;  %p406_p8 = scmp.lt.s32.totalorder (!%p362_p7), %s405_s25, 575 }
  0x24   : > { %s2995_s15 = scalar_lea.vmem (!%p362_p7), [#allocation3], %s2509_s26 }
  0x28   : > { %s3408_s25 = smov (!%p406_p8, %s405_s25), 575  ;;  %416 = sbr.rel (%p2180_p9) target bundleno = 47 (0x2f), region = 86 }
  0x29   : > { %s2352_s27 = sshll.u32 %s3408_s25, 3  ;;  %v2850_v20 = vmov (!%p2180_p9), 0.0  }
  0x2a   : > { %s2993_s14 = scalar_lea.vmem %s3395_s1, %s2352_s27  ;;  %417 = vst [vmem:[#allocation2] sm:$0xff] (!%p2180_p9), %v2850_v20  ;;  %418 = vst [vmem:[#allocation2 + $0x8] sm:$0xff] (!%p2180_p9), %v2850_v20 }
  0x2b   : > { %419 = vst [vmem:[#allocation2 + $0x10] sm:$0xff] (!%p2180_p9), %v2850_v20  ;;  %420 = vst [vmem:[#allocation2 + $0x18] sm:$0xff] (!%p2180_p9), %v2850_v20 }
  0x2c   : > { %421 = vst [vmem:[#allocation2 + $0x20] sm:$0xff] (!%p2180_p9), %v2850_v20  ;;  %422 = vst [vmem:[#allocation2 + $0x28] sm:$0xff] (!%p2180_p9), %v2850_v20 }
  0x2d   : > { %423 = vst [vmem:[#allocation2 + $0x30] sm:$0xff] (!%p2180_p9), %v2850_v20  ;;  %424 = vst [vmem:[#allocation2 + $0x38] sm:$0xff] (!%p2180_p9), %v2850_v20 }
  0x2f PF: > { %v2546_v21 = vld [vmem:[%s2993_s14 + $0x4] ss:$8 sps:$4 sm:$0xff]   ;;  %v2550_v23 = vld [vmem:[%s2993_s14] ss:$8 sps:$4 sm:$0xff]   ;;  %v2552_v25 = vld [vmem:[%s2993_s14 + $0x14] ss:$8 sps:$4 sm:$0xff]  }
  0x30   : > { %v2548_v22 = vld [vmem:[%s2993_s14 + $0x204] ss:$8 sps:$4 sm:$0xff]   ;;  %1409 = vmatprep.subr.bf16.mxu1 %v2546_v21  ;;  %v2551_v24 = vld [vmem:[%s2993_s14 + $0x200] ss:$8 sps:$4 sm:$0xff]   ;;  %v2554_v26 = vld [vmem:[%s2993_s14 + $0x214] ss:$8 sps:$4 sm:$0xff]  }
  0x31   : > { %1515 = vmatprep.subr.bf16.mxu0 %v2548_v22  ;;  %1410 = vmatpush1.bf16.msra.mxu1 %v2550_v23  ;;  %v2556_v27 = vld [vmem:[%s2993_s14 + $0x10] ss:$8 sps:$4 sm:$0xff]   ;;  %v2558_v29 = vld [vmem:[%s2993_s14 + $0x24] ss:$8 sps:$4 sm:$0xff]   ;;  %v2562_v31 = vld [vmem:[%s2993_s14 + $0x20] ss:$8 sps:$4 sm:$0xff]  }
  0x32   : > { %1516 = vmatpush1.bf16.msra.mxu0 %v2551_v24  ;;  %1411 = vmatprep.subr.bf16.mxu1 %v2552_v25  ;;  %v2557_v28 = vld [vmem:[%s2993_s14 + $0x210] ss:$8 sps:$4 sm:$0xff]   ;;  %v2560_v30 = vld [vmem:[%s2993_s14 + $0x224] ss:$8 sps:$4 sm:$0xff]   ;;  %v2563_v32 = vld [vmem:[%s2993_s14 + $0x220] ss:$8 sps:$4 sm:$0xff]  }
  0x33   : > { %1517 = vmatprep.subr.bf16.mxu0 %v2554_v26  ;;  %v2564_v33 = vld [vmem:[%s2993_s14 + $0x34] ss:$8 sps:$4 sm:$0xff]   ;;  %v2568_v35 = vld [vmem:[%s2993_s14 + $0x30] ss:$8 sps:$4 sm:$0xff]   ;;  %v2570_v37 = vld [vmem:[%s2993_s14 + $0x44] ss:$8 sps:$4 sm:$0xff]  }
  0x34   : > { %v2566_v34 = vld [vmem:[%s2993_s14 + $0x234] ss:$8 sps:$4 sm:$0xff]   ;;  %v2569_v36 = vld [vmem:[%s2993_s14 + $0x230] ss:$8 sps:$4 sm:$0xff]   ;;  %v2572_v38 = vld [vmem:[%s2993_s14 + $0x244] ss:$8 sps:$4 sm:$0xff]  }
  0x35   : > { %1412 = vmatpush1.bf16.msra.mxu1 %v2556_v27  ;;  %v2574_v39 = vld [vmem:[%s2993_s14 + $0x40] ss:$8 sps:$4 sm:$0xff]   ;;  %v2576_v41 = vld [vmem:[%s2993_s14 + $0x54] ss:$8 sps:$4 sm:$0xff]   ;;  %v2580_v43 = vld [vmem:[%s2993_s14 + $0x50] ss:$8 sps:$4 sm:$0xff]  }
  0x36   : > { %1518 = vmatpush1.bf16.msra.mxu0 %v2557_v28  ;;  %1413 = vmatprep.subr.bf16.mxu1 %v2558_v29  ;;  %v2575_v40 = vld [vmem:[%s2993_s14 + $0x240] ss:$8 sps:$4 sm:$0xff]   ;;  %v2578_v42 = vld [vmem:[%s2993_s14 + $0x254] ss:$8 sps:$4 sm:$0xff]   ;;  %v2581_v44 = vld [vmem:[%s2993_s14 + $0x250] ss:$8 sps:$4 sm:$0xff]  }
  0x37   : > { %1519 = vmatprep.subr.bf16.mxu0 %v2560_v30  ;;  %v2582_v45 = vld [vmem:[%s2993_s14 + $0x64] ss:$8 sps:$4 sm:$0xff]   ;;  %v2586_v47 = vld [vmem:[%s2993_s14 + $0x60] ss:$8 sps:$4 sm:$0xff]   ;;  %v2588_v49 = vld [vmem:[%s2993_s14 + $0x74] ss:$8 sps:$4 sm:$0xff]  }
  0x38   : > { %v2584_v46 = vld [vmem:[%s2993_s14 + $0x264] ss:$8 sps:$4 sm:$0xff]   ;;  %v2587_v48 = vld [vmem:[%s2993_s14 + $0x260] ss:$8 sps:$4 sm:$0xff]   ;;  %v2590_v50 = vld [vmem:[%s2993_s14 + $0x274] ss:$8 sps:$4 sm:$0xff]  }
  0x39   : > { %1414 = vmatpush1.bf16.msra.mxu1 %v2562_v31  ;;  %v2592_v51 = vld [vmem:[%s2993_s14 + $0x70] ss:$8 sps:$4 sm:$0xff]   ;;  %v2594_v53 = vld [vmem:[%s2993_s14 + $0x84] ss:$8 sps:$4 sm:$0xff]   ;;  %v2598_v55 = vld [vmem:[%s2993_s14 + $0x80] ss:$8 sps:$4 sm:$0xff]  }
  0x3a   : > { %1520 = vmatpush1.bf16.msra.mxu0 %v2563_v32  ;;  %1415 = vmatprep.subr.bf16.mxu1 %v2564_v33  ;;  %v2593_v52 = vld [vmem:[%s2993_s14 + $0x270] ss:$8 sps:$4 sm:$0xff]   ;;  %v2596_v54 = vld [vmem:[%s2993_s14 + $0x284] ss:$8 sps:$4 sm:$0xff]   ;;  %v2599_v56 = vld [vmem:[%s2993_s14 + $0x280] ss:$8 sps:$4 sm:$0xff]  }
  0x3b   : > { %1521 = vmatprep.subr.bf16.mxu0 %v2566_v34  ;;  %v2600_v57 = vld [vmem:[%s2993_s14 + $0x94] ss:$8 sps:$4 sm:$0xff]   ;;  %v2604_v59 = vld [vmem:[%s2993_s14 + $0x90] ss:$8 sps:$4 sm:$0xff]   ;;  %v2606_v61 = vld [vmem:[%s2993_s14 + $0xa4] ss:$8 sps:$4 sm:$0xff]  }
  0x3c   : > { %v2602_v58 = vld [vmem:[%s2993_s14 + $0x294] ss:$8 sps:$4 sm:$0xff]   ;;  %v2605_v60 = vld [vmem:[%s2993_s14 + $0x290] ss:$8 sps:$4 sm:$0xff]   ;;  %v2608_v62 = vld [vmem:[%s2993_s14 + $0x2a4] ss:$8 sps:$4 sm:$0xff]  }
  0x3d   : > { %1416 = vmatpush1.bf16.msra.mxu1 %v2568_v35  ;;  %v2610_v63 = vld [vmem:[%s2993_s14 + $0xa0] ss:$8 sps:$4 sm:$0xff]   ;;  %v2612_v1 = vld [vmem:[%s2993_s14 + $0xb4] ss:$8 sps:$4 sm:$0xff]   ;;  %v2616_v3 = vld [vmem:[%s2993_s14 + $0xb0] ss:$8 sps:$4 sm:$0xff]  }
  0x3e   : > { %1522 = vmatpush1.bf16.msra.mxu0 %v2569_v36  ;;  %1417 = vmatprep.subr.bf16.mxu1 %v2570_v37  ;;  %v2611_v0 = vld [vmem:[%s2993_s14 + $0x2a0] ss:$8 sps:$4 sm:$0xff]   ;;  %v2614_v2 = vld [vmem:[%s2993_s14 + $0x2b4] ss:$8 sps:$4 sm:$0xff]   ;;  %v2617_v4 = vld [vmem:[%s2993_s14 + $0x2b0] ss:$8 sps:$4 sm:$0xff]  }
  0x3f   : > { %1523 = vmatprep.subr.bf16.mxu0 %v2572_v38  ;;  %v2644_v5 = vld [vmem:[%s2995_s15 + $0x4] ss:$36 sps:$4 sm:$0xff]   ;;  %v2650_v8 = vld [vmem:[%s2995_s15 + $0x14] ss:$36 sps:$4 sm:$0xff]   ;;  %p2343_p10 = scmp.ne.s32.totalorder %s2922_s12, 3 }
  0x40   : > { %v2618_v6 = vld [vmem:[%s2993_s14 + $0xc4] ss:$8 sps:$4 sm:$0xff]   ;;  %1441 = vmatprep.mubr.bf16.mxu1 %v2644_v5  ;;  %v2622_v9 = vld [vmem:[%s2993_s14 + $0xc0] ss:$8 sps:$4 sm:$0xff]   ;;  %v2624_v11 = vld [vmem:[%s2993_s14 + $0xd4] ss:$8 sps:$4 sm:$0xff]   ;;  %1547 = vmatprep.mubr.bf16.mxu0 %v2650_v8 }
  0x41   : > { %1418 = vmatpush1.bf16.msra.mxu1 %v2574_v39  ;;  %v2620_v7 = vld [vmem:[%s2993_s14 + $0x2c4] ss:$8 sps:$4 sm:$0xff]   ;;  %v2623_v10 = vld [vmem:[%s2993_s14 + $0x2c0] ss:$8 sps:$4 sm:$0xff]   ;;  %v2626_v12 = vld [vmem:[%s2993_s14 + $0x2d4] ss:$8 sps:$4 sm:$0xff]  }
  0x42   : > { %1524 = vmatpush1.bf16.msra.mxu0 %v2575_v40  ;;  %1419 = vmatprep.subr.bf16.mxu1 %v2576_v41  ;;  %v2628_v13 = vld [vmem:[%s2993_s14 + $0xd0] ss:$8 sps:$4 sm:$0xff]   ;;  %v2630_v15 = vld [vmem:[%s2993_s14 + $0xe4] ss:$8 sps:$4 sm:$0xff]   ;;  %v2634_v17 = vld [vmem:[%s2993_s14 + $0xe0] ss:$8 sps:$4 sm:$0xff]  }
  0x43   : > { %1525 = vmatprep.subr.bf16.mxu0 %v2578_v42  ;;  %v2629_v14 = vld [vmem:[%s2993_s14 + $0x2d0] ss:$8 sps:$4 sm:$0xff]   ;;  %v2632_v16 = vld [vmem:[%s2993_s14 + $0x2e4] ss:$8 sps:$4 sm:$0xff]   ;;  %v2635_v18 = vld [vmem:[%s2993_s14 + $0x2e0] ss:$8 sps:$4 sm:$0xff]  }
  0x44   : > { %v2636_v19 = vld [vmem:[%s2993_s14 + $0xf4] ss:$8 sps:$4 sm:$0xff]   ;;  %v2640_v21 = vld [vmem:[%s2993_s14 + $0xf0] ss:$8 sps:$4 sm:$0xff]   ;;  %v2647_v23 = vld [vmem:[%s2993_s14 + $0x104] ss:$8 sps:$4 sm:$0xff]  }
  0x45   : > { %1420 = vmatpush1.bf16.msra.mxu1 %v2580_v43  ;;  %v2638_v20 = vld [vmem:[%s2993_s14 + $0x2f4] ss:$8 sps:$4 sm:$0xff]   ;;  %v2641_v22 = vld [vmem:[%s2993_s14 + $0x2f0] ss:$8 sps:$4 sm:$0xff]   ;;  %v2653_v24 = vld [vmem:[%s2993_s14 + $0x304] ss:$8 sps:$4 sm:$0xff]  }
  0x46   : > { %1526 = vmatpush1.bf16.msra.mxu0 %v2581_v44  ;;  %1421 = vmatprep.subr.bf16.mxu1 %v2582_v45  ;;  %v2642_v25 = vld [vmem:[%s2995_s15] ss:$36 sps:$4 sm:$0xff]   ;;  %v2648_v27 = vld [vmem:[%s2995_s15 + $0x10] ss:$36 sps:$4 sm:$0xff]   ;;  %vm1919_vm0 = vcmask (!%p2343_p10), 1041409   ;;  %vm2853_vm1 = vmmov (!%p2343_p10), 0  }
  0x47   : > { %1527 = vmatprep.subr.bf16.mxu0 %v2584_v46  ;;  %v2645_v26 = vld [vmem:[%s2993_s14 + $0x100] ss:$8 sps:$4 sm:$0xff]   ;;  %v2656_v29 = vld [vmem:[%s2993_s14 + $0x114] ss:$8 sps:$4 sm:$0xff]   ;;  %v2654_v31 = vld [vmem:[%s2993_s14 + $0x110] ss:$8 sps:$4 sm:$0xff]  }
  0x48   : > { %v2651_v28 = vld [vmem:[%s2993_s14 + $0x300] ss:$8 sps:$4 sm:$0xff]   ;;  %v2659_v30 = vld [vmem:[%s2993_s14 + $0x314] ss:$8 sps:$4 sm:$0xff]   ;;  %v2657_v32 = vld [vmem:[%s2993_s14 + $0x310] ss:$8 sps:$4 sm:$0xff]  }
  0x49   : > { %1422 = vmatpush1.bf16.msra.mxu1 %v2586_v47  ;;  %v2662_v33 = vld [vmem:[%s2993_s14 + $0x124] ss:$8 sps:$4 sm:$0xff]   ;;  %v2660_v35 = vld [vmem:[%s2993_s14 + $0x120] ss:$8 sps:$4 sm:$0xff]   ;;  %v2668_v37 = vld [vmem:[%s2993_s14 + $0x134] ss:$8 sps:$4 sm:$0xff]  }
  0x4a   : > { %1528 = vmatpush1.bf16.msra.mxu0 %v2587_v48  ;;  %1423 = vmatprep.subr.bf16.mxu1 %v2588_v49  ;;  %v2665_v34 = vld [vmem:[%s2993_s14 + $0x324] ss:$8 sps:$4 sm:$0xff]   ;;  %v2663_v36 = vld [vmem:[%s2993_s14 + $0x320] ss:$8 sps:$4 sm:$0xff]   ;;  %v2671_v38 = vld [vmem:[%s2993_s14 + $0x334] ss:$8 sps:$4 sm:$0xff]  }
  0x4b   : > { %1529 = vmatprep.subr.bf16.mxu0 %v2590_v50  ;;  %v2666_v39 = vld [vmem:[%s2993_s14 + $0x130] ss:$8 sps:$4 sm:$0xff]   ;;  %v2674_v41 = vld [vmem:[%s2993_s14 + $0x144] ss:$8 sps:$4 sm:$0xff]   ;;  %v2672_v43 = vld [vmem:[%s2993_s14 + $0x140] ss:$8 sps:$4 sm:$0xff]  }
  0x4c   : > { %v2669_v40 = vld [vmem:[%s2993_s14 + $0x330] ss:$8 sps:$4 sm:$0xff]   ;;  %v2677_v42 = vld [vmem:[%s2993_s14 + $0x344] ss:$8 sps:$4 sm:$0xff]   ;;  %v2675_v44 = vld [vmem:[%s2993_s14 + $0x340] ss:$8 sps:$4 sm:$0xff]  }
  0x4d   : > { %1424 = vmatpush1.bf16.msra.mxu1 %v2592_v51  ;;  %v2680_v45 = vld [vmem:[%s2993_s14 + $0x154] ss:$8 sps:$4 sm:$0xff]   ;;  %v2678_v47 = vld [vmem:[%s2993_s14 + $0x150] ss:$8 sps:$4 sm:$0xff]   ;;  %v2686_v49 = vld [vmem:[%s2993_s14 + $0x164] ss:$8 sps:$4 sm:$0xff]  }
  0x4e   : > { %1530 = vmatpush1.bf16.msra.mxu0 %v2593_v52  ;;  %1425 = vmatprep.subr.bf16.mxu1 %v2594_v53  ;;  %v2683_v46 = vld [vmem:[%s2993_s14 + $0x354] ss:$8 sps:$4 sm:$0xff]   ;;  %v2681_v48 = vld [vmem:[%s2993_s14 + $0x350] ss:$8 sps:$4 sm:$0xff]   ;;  %v2689_v53 = vld [vmem:[%s2993_s14 + $0x364] ss:$8 sps:$4 sm:$0xff]  }
  0x4f   : > { %1531 = vmatprep.subr.bf16.mxu0 %v2596_v54  ;;  %v2732_v50 = vld [vmem:[%s2995_s15 + $0x4c] ss:$36 sps:$4 sm:$0xff]   ;;  %v2734_v51 = vld [vmem:[%s2995_s15 + $0x5c] ss:$36 sps:$4 sm:$0xff]   ;;  %vm2010_vm2 = vcmask (!%p2343_p10), 523264   ;;  %vm2084_vm3 = vcmask (!%p2343_p10), 304128  }
  0x50   : > { %v2736_v52 = vld [vmem:[%s2995_s15 + $0x48] ss:$36 sps:$4 sm:$0xff]   ;;  %v2740_v54 = vld [vmem:[%s2995_s15 + $0x58] ss:$36 sps:$4 sm:$0xff]  }
  0x51   : > { %1426 = vmatpush1.bf16.msra.mxu1 %v2598_v55  ;;  %v2684_v55 = vld [vmem:[%s2993_s14 + $0x160] ss:$8 sps:$4 sm:$0xff]   ;;  %v2702_v5 = vld [vmem:[%s2993_s14 + $0x190] ss:$8 sps:$4 sm:$0xff]   ;;  %v2713_v8 = vld [vmem:[%s2993_s14 + $0x3a4] ss:$8 sps:$4 sm:$0xff]  }
  0x52   : > { %1532 = vmatpush1.bf16.msra.mxu0 %v2599_v56  ;;  %1427 = vmatprep.subr.bf16.mxu1 %v2600_v57  ;;  %v2687_v56 = vld [vmem:[%s2993_s14 + $0x360] ss:$8 sps:$4 sm:$0xff]   ;;  %v2692_v57 = vld [vmem:[%s2993_s14 + $0x174] ss:$8 sps:$4 sm:$0xff]  }
  0x53   : > { %1533 = vmatprep.subr.bf16.mxu0 %v2602_v58  ;;  %v2695_v58 = vld [vmem:[%s2993_s14 + $0x374] ss:$8 sps:$4 sm:$0xff]  }
  0x55   : > { %1428 = vmatpush1.bf16.msra.mxu1 %v2604_v59  ;;  %v2690_v59 = vld [vmem:[%s2993_s14 + $0x170] ss:$8 sps:$4 sm:$0xff]  }
  0x56   : > { %1534 = vmatpush1.bf16.msra.mxu0 %v2605_v60  ;;  %1429 = vmatprep.subr.bf16.mxu1 %v2606_v61  ;;  %v2693_v60 = vld [vmem:[%s2993_s14 + $0x370] ss:$8 sps:$4 sm:$0xff]   ;;  %v2698_v61 = vld [vmem:[%s2993_s14 + $0x184] ss:$8 sps:$4 sm:$0xff]  }
  0x57   : > { %1535 = vmatprep.subr.bf16.mxu0 %v2608_v62  ;;  %v2752_v62 = vld [vmem:[%s2995_s15 + $0xc] ss:$36 sps:$4 sm:$0xff]  }
  0x59   : > { %1430 = vmatpush1.bf16.msra.mxu1 %v2610_v63  ;;  %v2701_v63 = vld [vmem:[%s2993_s14 + $0x384] ss:$8 sps:$4 sm:$0xff]  }
  0x5a   : > { %1536 = vmatpush1.bf16.msra.mxu0 %v2611_v0  ;;  %1431 = vmatprep.subr.bf16.mxu1 %v2612_v1  ;;  %v2755_v0 = vld [vmem:[%s2995_s15 + $0x1c] ss:$36 sps:$4 sm:$0xff]  }
  0x5b   : > { %1537 = vmatprep.subr.bf16.mxu0 %v2614_v2  ;;  %v2696_v1 = vld [vmem:[%s2993_s14 + $0x180] ss:$8 sps:$4 sm:$0xff]  }
  0x5c   : > { %v2699_v2 = vld [vmem:[%s2993_s14 + $0x380] ss:$8 sps:$4 sm:$0xff]  }
  0x5d   : > { %1432 = vmatpush1.bf16.msra.mxu1 %v2616_v3  ;;  %v2704_v3 = vld [vmem:[%s2993_s14 + $0x194] ss:$8 sps:$4 sm:$0xff]  }
  0x5e   : > { %1538 = vmatpush1.bf16.msra.mxu0 %v2617_v4  ;;  %1433 = vmatprep.subr.bf16.mxu1 %v2618_v6  ;;  %v2707_v4 = vld [vmem:[%s2993_s14 + $0x394] ss:$8 sps:$4 sm:$0xff]   ;;  %v2705_v6 = vld [vmem:[%s2993_s14 + $0x390] ss:$8 sps:$4 sm:$0xff]  }
  0x5f   : > { %1539 = vmatprep.subr.bf16.mxu0 %v2620_v7  ;;  %v2710_v7 = vld [vmem:[%s2993_s14 + $0x1a4] ss:$8 sps:$4 sm:$0xff]  }
  0x61   : > { %1434 = vmatpush1.bf16.msra.mxu1 %v2622_v9  ;;  %v2708_v9 = vld [vmem:[%s2993_s14 + $0x1a0] ss:$8 sps:$4 sm:$0xff]  }
  0x62   : > { %1540 = vmatpush1.bf16.msra.mxu0 %v2623_v10  ;;  %1435 = vmatprep.subr.bf16.mxu1 %v2624_v11  ;;  %v2711_v10 = vld [vmem:[%s2993_s14 + $0x3a0] ss:$8 sps:$4 sm:$0xff]   ;;  %v2716_v11 = vld [vmem:[%s2993_s14 + $0x1b4] ss:$8 sps:$4 sm:$0xff]  }
  0x63   : > { %1541 = vmatprep.subr.bf16.mxu0 %v2626_v12  ;;  %v2719_v12 = vld [vmem:[%s2993_s14 + $0x3b4] ss:$8 sps:$4 sm:$0xff]  }
  0x65   : > { %1436 = vmatpush1.bf16.msra.mxu1 %v2628_v13  ;;  %v2714_v13 = vld [vmem:[%s2993_s14 + $0x1b0] ss:$8 sps:$4 sm:$0xff]  }
  0x66   : > { %1542 = vmatpush1.bf16.msra.mxu0 %v2629_v14  ;;  %1437 = vmatprep.subr.bf16.mxu1 %v2630_v15  ;;  %v2717_v14 = vld [vmem:[%s2993_s14 + $0x3b0] ss:$8 sps:$4 sm:$0xff]   ;;  %v2722_v15 = vld [vmem:[%s2993_s14 + $0x1c4] ss:$8 sps:$4 sm:$0xff]  }
  0x67   : > { %1543 = vmatprep.subr.bf16.mxu0 %v2632_v16  ;;  %v2725_v16 = vld [vmem:[%s2993_s14 + $0x3c4] ss:$8 sps:$4 sm:$0xff]  }
  0x69   : > { %1438 = vmatpush1.bf16.msra.mxu1 %v2634_v17  ;;  %v2720_v17 = vld [vmem:[%s2993_s14 + $0x1c0] ss:$8 sps:$4 sm:$0xff]  }
  0x6a   : > { %1544 = vmatpush1.bf16.msra.mxu0 %v2635_v18  ;;  %1439 = vmatprep.subr.bf16.mxu1 %v2636_v19  ;;  %v2723_v18 = vld [vmem:[%s2993_s14 + $0x3c0] ss:$8 sps:$4 sm:$0xff]   ;;  %v2728_v19 = vld [vmem:[%s2993_s14 + $0x1d4] ss:$8 sps:$4 sm:$0xff]  }
  0x6b   : > { %1545 = vmatprep.subr.bf16.mxu0 %v2638_v20  ;;  %v2731_v20 = vld [vmem:[%s2993_s14 + $0x3d4] ss:$8 sps:$4 sm:$0xff]  }
  0x6d   : > { %1440 = vmatpush1.bf16.msra.mxu1 %v2640_v21  ;;  %v2726_v21 = vld [vmem:[%s2993_s14 + $0x1d0] ss:$8 sps:$4 sm:$0xff]  }
  0x6e   : > { %1546 = vmatpush1.bf16.msra.mxu0 %v2641_v22  ;;  %1462 = vmatprep.subr.bf16.mxu1 %v2647_v23  ;;  %v2729_v22 = vld [vmem:[%s2993_s14 + $0x3d0] ss:$8 sps:$4 sm:$0xff]   ;;  %v2739_v23 = vld [vmem:[%s2993_s14 + $0x1e4] ss:$8 sps:$4 sm:$0xff]  }
  0x6f   : > { %1568 = vmatprep.subr.bf16.mxu0 %v2653_v24  ;;  %v2743_v24 = vld [vmem:[%s2993_s14 + $0x3e4] ss:$8 sps:$4 sm:$0xff]  }
  0x70   : > { %1442 = vmatmul.mubr.bf16.vlgmr.msra.gmra.mrb[0].mxu1 %v2642_v25  ;;  %v2737_v25 = vld [vmem:[%s2993_s14 + $0x1e0] ss:$8 sps:$4 sm:$0xff]  }
  0x71   : > { %1548 = vmatmul.mubr.bf16.vlgmr.msra.gmra.mrb[0].mxu0 %v2648_v27  ;;  %1463 = vmatpush1.bf16.msra.mxu1 %v2645_v26  ;;  %v2741_v26 = vld [vmem:[%s2993_s14 + $0x3e0] ss:$8 sps:$4 sm:$0xff]   ;;  %v2746_v27 = vld [vmem:[%s2993_s14 + $0x1f4] ss:$8 sps:$4 sm:$0xff]  }
  0x72   : > { %1569 = vmatpush1.bf16.msra.mxu0 %v2651_v28  ;;  %1464 = vmatprep.subr.bf16.mxu1 %v2656_v29  ;;  %v2749_v28 = vld [vmem:[%s2993_s14 + $0x3f4] ss:$8 sps:$4 sm:$0xff]   ;;  %v2744_v29 = vld [vmem:[%s2993_s14 + $0x1f0] ss:$8 sps:$4 sm:$0xff]  }
  0x73   : > { %1570 = vmatprep.subr.bf16.mxu0 %v2659_v30  ;;  %1451 = vmatprep.mubr.bf16.mxu1 %v2732_v50  ;;  %v2747_v30 = vld [vmem:[%s2993_s14 + $0x3f0] ss:$8 sps:$4 sm:$0xff]   ;;  %v2782_v50 = vld [vmem:[%s2993_s14 + $0x464] ss:$8 sps:$4 sm:$0xff]  }
  0x74   : > { %1557 = vmatprep.mubr.bf16.mxu0 %v2734_v51  ;;  %v2780_v51 = vld [vmem:[%s2993_s14 + $0x460] ss:$8 sps:$4 sm:$0xff]  }
  0x75   : > { %1465 = vmatpush1.bf16.msra.mxu1 %v2654_v31  ;;  %v2758_v31 = vld [vmem:[%s2993_s14 + $0x404] ss:$8 sps:$4 sm:$0xff]  }
  0x76   : > { %1571 = vmatpush1.bf16.msra.mxu0 %v2657_v32  ;;  %1466 = vmatprep.subr.bf16.mxu1 %v2662_v33  ;;  %v2750_v32 = vld [vmem:[%s2995_s15 + $0x8] ss:$36 sps:$4 sm:$0xff]   ;;  %v2753_v33 = vld [vmem:[%s2995_s15 + $0x18] ss:$36 sps:$4 sm:$0xff]  }
  0x77   : > { %1572 = vmatprep.subr.bf16.mxu0 %v2665_v34  ;;  %v2756_v34 = vld [vmem:[%s2993_s14 + $0x400] ss:$8 sps:$4 sm:$0xff]  }
  0x78   : > { %1452 = vmatmul.mubr.bf16.gmra.mrb[4].mxu1 %v2736_v52  ;;  %v2785_v52 = vld [vmem:[%s2993_s14 + $0x474] ss:$8 sps:$4 sm:$0xff]  }
  0x79   : > { %1467 = vmatpush1.bf16.msra.mxu1 %v2660_v35  ;;  %1558 = vmatmul.mubr.bf16.gmra.mrb[4].mxu0 %v2740_v54  ;;  %v2761_v35 = vld [vmem:[%s2993_s14 + $0x414] ss:$8 sps:$4 sm:$0xff]  }
  0x7a   : > { %1573 = vmatpush1.bf16.msra.mxu0 %v2663_v36  ;;  %1468 = vmatprep.subr.bf16.mxu1 %v2668_v37  ;;  %v2762_v36 = vld [vmem:[%s2995_s15 + $0x54] ss:$36 sps:$4 sm:$0xff]   ;;  %v2764_v37 = vld [vmem:[%s2995_s15 + $0x64] ss:$36 sps:$4 sm:$0xff]  }
  0x7b   : > { %1574 = vmatprep.subr.bf16.mxu0 %v2671_v38  ;;  %1494 = vmatprep.mubr.bf16.mxu1 %v2752_v62  ;;  %v2759_v38 = vld [vmem:[%s2993_s14 + $0x410] ss:$8 sps:$4 sm:$0xff]  }
  0x7c   : > { %1600 = vmatprep.mubr.bf16.mxu0 %v2755_v0  ;;  %v2786_v54 = vld [vmem:[%s2995_s15 + $0x20] ss:$36 sps:$4 sm:$0xff]  }
  0x7d   : > { %1469 = vmatpush1.bf16.msra.mxu1 %v2666_v39  ;;  %v2770_v39 = vld [vmem:[%s2993_s14 + $0x424] ss:$8 sps:$4 sm:$0xff]  }
  0x7e   : > { %1575 = vmatpush1.bf16.msra.mxu0 %v2669_v40  ;;  %1470 = vmatprep.subr.bf16.mxu1 %v2674_v41  ;;  %v2766_v40 = vld [vmem:[%s2995_s15 + $0x50] ss:$36 sps:$4 sm:$0xff]   ;;  %v2767_v41 = vld [vmem:[%s2995_s15 + $0x60] ss:$36 sps:$4 sm:$0xff]  }
  0x7f   : > { %1576 = vmatprep.subr.bf16.mxu0 %v2677_v42  ;;  %v2768_v42 = vld [vmem:[%s2993_s14 + $0x420] ss:$8 sps:$4 sm:$0xff]  }
  0x81   : > { %1471 = vmatpush1.bf16.msra.mxu1 %v2672_v43  ;;  %v2773_v43 = vld [vmem:[%s2993_s14 + $0x434] ss:$8 sps:$4 sm:$0xff]  }
  0x82   : > { %1577 = vmatpush1.bf16.msra.mxu0 %v2675_v44  ;;  %1472 = vmatprep.subr.bf16.mxu1 %v2680_v45  ;;  %v2771_v44 = vld [vmem:[%s2993_s14 + $0x430] ss:$8 sps:$4 sm:$0xff]   ;;  %v2776_v45 = vld [vmem:[%s2993_s14 + $0x444] ss:$8 sps:$4 sm:$0xff]  }
  0x83   : > { %1578 = vmatprep.subr.bf16.mxu0 %v2683_v46  ;;  %v2851_v46 = vmov 0  }
  0x85   : > { %1473 = vmatpush1.bf16.msra.mxu1 %v2678_v47  ;;  %v2774_v47 = vld [vmem:[%s2993_s14 + $0x440] ss:$8 sps:$4 sm:$0xff]  }
  0x86   : > { %1579 = vmatpush1.bf16.msra.mxu0 %v2681_v48  ;;  %1474 = vmatprep.subr.bf16.mxu1 %v2686_v49  ;;  %v2779_v48 = vld [vmem:[%s2993_s14 + $0x454] ss:$8 sps:$4 sm:$0xff]   ;;  %v2777_v49 = vld [vmem:[%s2993_s14 + $0x450] ss:$8 sps:$4 sm:$0xff]  }
  0x87   : > { %1580 = vmatprep.subr.bf16.mxu0 %v2689_v53  ;;  %v2783_v53 = vld [vmem:[%s2993_s14 + $0x470] ss:$8 sps:$4 sm:$0xff]  }
  0x89   : > { %1475 = vmatpush1.bf16.msra.mxu1 %v2684_v55  ;;  %v2787_v55 = vld [vmem:[%s2995_s15 + $0x68] ss:$36 sps:$4 sm:$0xff]  }
  0x8a   : > { %1581 = vmatpush1.bf16.msra.mxu0 %v2687_v56  ;;  %1476 = vmatprep.subr.bf16.mxu1 %v2692_v57 }
  0x8b   : > { %1582 = vmatprep.subr.bf16.mxu0 %v2695_v58 }
  0x8d   : > { %1477 = vmatpush1.bf16.msra.mxu1 %v2690_v59 }
  0x8e   : > { %1583 = vmatpush1.bf16.msra.mxu0 %v2693_v60  ;;  %1478 = vmatprep.subr.bf16.mxu1 %v2698_v61 }
  0x8f   : > { %1584 = vmatprep.subr.bf16.mxu0 %v2701_v63 }
  0x91   : > { %1479 = vmatpush1.bf16.msra.mxu1 %v2696_v1 }
  0x92   : > { %1585 = vmatpush1.bf16.msra.mxu0 %v2699_v2  ;;  %1480 = vmatprep.subr.bf16.mxu1 %v2704_v3 }
  0x93   : > { %1586 = vmatprep.subr.bf16.mxu0 %v2707_v4 }
  0x95   : > { %1481 = vmatpush1.bf16.msra.mxu1 %v2702_v5 }
  0x96   : > { %1587 = vmatpush1.bf16.msra.mxu0 %v2705_v6  ;;  %1482 = vmatprep.subr.bf16.mxu1 %v2710_v7 }
  0x97   : > { %1588 = vmatprep.subr.bf16.mxu0 %v2713_v8  ;;  %v425_v8 = vld [vmem:[#allocation2] sm:$0xff] }
  0x99   : > { %1483 = vmatpush1.bf16.msra.mxu1 %v2708_v9 }
  0x9a   : > { %1589 = vmatpush1.bf16.msra.mxu0 %v2711_v10  ;;  %1484 = vmatprep.subr.bf16.mxu1 %v2716_v11  ;;  %v429_v10 = vld [vmem:[#allocation2 + $0x20] sm:$0xff] }
  0x9b   : > { %1590 = vmatprep.subr.bf16.mxu0 %v2719_v12 }
  0x9d   : > { %1485 = vmatpush1.bf16.msra.mxu1 %v2714_v13 }
  0x9e   : > { %1591 = vmatpush1.bf16.msra.mxu0 %v2717_v14  ;;  %1486 = vmatprep.subr.bf16.mxu1 %v2722_v15  ;;  %v426_v14 = vld [vmem:[#allocation2 + $0x8] sm:$0xff] }
  0x9f   : > { %1592 = vmatprep.subr.bf16.mxu0 %v2725_v16  ;;  %v430_v16 = vld [vmem:[#allocation2 + $0x28] sm:$0xff] }
  0xa1   : > { %1487 = vmatpush1.bf16.msra.mxu1 %v2720_v17 }
  0xa2   : > { %1593 = vmatpush1.bf16.msra.mxu0 %v2723_v18  ;;  %1488 = vmatprep.subr.bf16.mxu1 %v2728_v19 }
  0xa3   : > { %1594 = vmatprep.subr.bf16.mxu0 %v2731_v20  ;;  %v427_v20 = vld [vmem:[#allocation2 + $0x10] sm:$0xff] }
  0xa5   : > { %1489 = vmatpush1.bf16.msra.mxu1 %v2726_v21 }
  0xa6   : > { %1595 = vmatpush1.bf16.msra.mxu0 %v2729_v22  ;;  %1490 = vmatprep.subr.bf16.mxu1 %v2739_v23  ;;  %v431_v22 = vld [vmem:[#allocation2 + $0x30] sm:$0xff] }
  0xa7   : > { %1596 = vmatprep.subr.bf16.mxu0 %v2743_v24 }
  0xa9   : > { %1491 = vmatpush1.bf16.msra.mxu1 %v2737_v25 }
  0xaa   : > { %1597 = vmatpush1.bf16.msra.mxu0 %v2741_v26  ;;  %1492 = vmatprep.subr.bf16.mxu1 %v2746_v27 }
  0xab   : > { %1598 = vmatprep.subr.bf16.mxu0 %v2749_v28  ;;  %v428_v28 = vld [vmem:[#allocation2 + $0x18] sm:$0xff] }
  0xad   : > { %1493 = vmatpush1.bf16.msra.mxu1 %v2744_v29 }
  0xae   : > { %1599 = vmatpush1.bf16.msra.mxu0 %v2747_v30  ;;  %2460 = vmatprep.subr.bf16.mxu1 %v2758_v31  ;;  %v432_v30 = vld [vmem:[#allocation2 + $0x38] sm:$0xff] }
  0xaf   : > { %1621 = vmatprep.subr.bf16.mxu0 %v2758_v31 }
  0xb0   : > { %1495 = vmatmul.mubr.bf16.vlgmr.msra.gmra.mrb[0].mxu1 %v2750_v32 }
  0xb1   : > { %1601 = vmatmul.mubr.bf16.vlgmr.msra.gmra.mrb[0].mxu0 %v2753_v33  ;;  %2468 = vmatpush1.bf16.msra.mxu1 %v2756_v34 }
  0xb2   : > { %1622 = vmatpush1.bf16.msra.mxu0 %v2756_v34  ;;  %2461 = vmatprep.subr.bf16.mxu1 %v2761_v35 }
  0xb3   : > { %1623 = vmatprep.subr.bf16.mxu0 %v2761_v35  ;;  %1504 = vmatprep.mubr.bf16.mxu1 %v2762_v36 }
  0xb4   : > { %1610 = vmatprep.mubr.bf16.mxu0 %v2764_v37 }
  0xb5   : > { %2469 = vmatpush1.bf16.msra.mxu1 %v2759_v38 }
  0xb6   : > { %1624 = vmatpush1.bf16.msra.mxu0 %v2759_v38  ;;  %2462 = vmatprep.subr.bf16.mxu1 %v2770_v39 }
  0xb7   : > { %1625 = vmatprep.subr.bf16.mxu0 %v2770_v39 }
  0xb8   : > { %1505 = vmatmul.mubr.bf16.gmra.mrb[4].mxu1 %v2766_v40  ;;  %v1892_v40 = vld [vmem:[%s3399_s5 + $0x80] sm:$0xff] (!%p2343_p10) }
  0xb9   : > { %1611 = vmatmul.mubr.bf16.gmra.mrb[4].mxu0 %v2767_v41  ;;  %2470 = vmatpush1.bf16.msra.mxu1 %v2768_v42  ;;  %v1893_v41 = vld [vmem:[%s3399_s5 + $0x88] sm:$0xff] (!%p2343_p10) }
  0xba   : > { %1626 = vmatpush1.bf16.msra.mxu0 %v2768_v42  ;;  %2463 = vmatprep.subr.bf16.mxu1 %v2773_v43  ;;  %v1876_v42 = vld [vmem:[%s3399_s5] sm:$0xff] (!%p2343_p10) }
  0xbb   : > { %1627 = vmatprep.subr.bf16.mxu0 %v2773_v43  ;;  %1653 = vmatprep.mubr.bf16.mxu0 %v2851_v46  ;;  %v2416_v43 = vpack.c.bf16 (!%p2343_p10), %v1893_v41, %v1892_v40  ;;  %v1996_v40 = vld [vmem:[%s3401_s7 + $0x8] sm:$0xff] (!%p2343_p10) }
  0xbc   : > { %1663 = vmatprep.mubr.bf16.mxu1 %v2851_v46  ;;  %v1895_v46 = vld [vmem:[%s3399_s5 + $0x98] sm:$0xff] (!%p2343_p10) }
  0xbd   : > { %2471 = vmatpush1.bf16.msra.mxu1 %v2771_v44 }
  0xbe   : > { %1628 = vmatpush1.bf16.msra.mxu0 %v2771_v44  ;;  %2464 = vmatprep.subr.bf16.mxu1 %v2776_v45  ;;  %v1877_v44 = vld [vmem:[%s3399_s5 + $0x8] sm:$0xff] (!%p2343_p10) }
  0xbf   : > { %1629 = vmatprep.subr.bf16.mxu0 %v2776_v45  ;;  %v1894_v45 = vld [vmem:[%s3399_s5 + $0x90] sm:$0xff] (!%p2343_p10) }
  0xc1   : > { %2472 = vmatpush1.bf16.msra.mxu1 %v2774_v47 }
  0xc2   : > { %1630 = vmatpush1.bf16.msra.mxu0 %v2774_v47  ;;  %2465 = vmatprep.subr.bf16.mxu1 %v2779_v48  ;;  %v1704_v47 = vlaneseq (!%p2343_p10) }
  0xc3   : > { %1631 = vmatprep.subr.bf16.mxu0 %v2779_v48  ;;  %v2852_v48 = vmov (!%p2343_p10), 0.0|0.0  }
  0xc5   : > { %2473 = vmatpush1.bf16.msra.mxu1 %v2777_v49 }
  0xc6   : > { %1632 = vmatpush1.bf16.msra.mxu0 %v2777_v49  ;;  %2466 = vmatprep.subr.bf16.mxu1 %v2782_v50  ;;  %v2418_v49 = vpack.c.bf16 (!%p2343_p10), %v1877_v44, %v1876_v42  ;;  %v1904_v42 = vld [vmem:[%s3399_s5 + $0xe0] sm:$0xff] (!%p2343_p10) }
  0xc7   : > { %1633 = vmatprep.subr.bf16.mxu0 %v2782_v50  ;;  %v2420_v50 = vpack.c.bf16 (!%p2343_p10), %v1895_v46, %v1894_v45 }
  0xc9   : > { %2474 = vmatpush1.bf16.msra.mxu1 %v2780_v51 }
  0xca   : > { %1634 = vmatpush1.bf16.msra.mxu0 %v2780_v51  ;;  %2467 = vmatprep.subr.bf16.mxu1 %v2785_v52  ;;  %v1878_v51 = vld [vmem:[%s3399_s5 + $0x10] sm:$0xff] (!%p2343_p10) }
  0xcb   : > { %1635 = vmatprep.subr.bf16.mxu0 %v2785_v52  ;;  %v1879_v52 = vld [vmem:[%s3399_s5 + $0x18] sm:$0xff] (!%p2343_p10) }
  0xcd   : > { %2475 = vmatpush1.bf16.msra.mxu1 %v2783_v53 }
  0xce   : > { %1636 = vmatpush1.bf16.msra.mxu0 %v2783_v53  ;;  %2448 = vmatprep.subr.bf16.mxu1 (!%p2343_p10), %v2852_v48  ;;  %v1896_v53 = vld [vmem:[%s3399_s5 + $0xa0] sm:$0xff] (!%p2343_p10) }
  0xcf   : > { %2417 = vmatprep.subr.bf16.mxu0 (!%p2343_p10), %v2416_v43  ;;  %v1905_v43 = vld [vmem:[%s3399_s5 + $0xe8] sm:$0xff] (!%p2343_p10) }
  0xd0   : > { %1664 = vmatmul.mubr.bf16.vlgmr.msra.gmra.mrb[8].mxu1 %v2787_v55  ;;  %v2422_v55 = vpack.c.bf16 (!%p2343_p10), %v1879_v52, %v1878_v51  ;;  %v1997_v52 = vld [vmem:[%s3401_s7 + $0x10] sm:$0xff] (!%p2343_p10) }
  0xd1   : > { %1654 = vmatmul.mubr.bf16.vlgmr.msra.gmra.mrb[0].mxu0 %v2786_v54  ;;  %v1897_v54 = vld [vmem:[%s3399_s5 + $0xa8] sm:$0xff] (!%p2343_p10) }
  0xd2   : > { %2419 = vmatpush3.bf16.msra.mxu0 (!%p2343_p10), %v2418_v49 }
  0xd3   : > { %2421 = vmatprep.subr.bf16.mxu0 (!%p2343_p10), %v2420_v50 }
  0xd6   : > { %2423 = vmatpush3.bf16.msra.mxu0 (!%p2343_p10), %v2422_v55 }
 0x183   : > { %v1496_v56 = vpop.f32.mrb[0].mxu1 }
 0x184   : > { %v1498_v57 = vpop.f32.mrb[1].mxu1 }
 0x185   : > { %v1500_v58 = vpop.f32.mrb[2].mxu1 }
 0x186   : > { %v1502_v59 = vpop.f32.mrb[3].mxu1 }
 0x18b   : > { %v1506_v60 = vpop.f32.mrb[4].mxu1 }
 0x18c   : > { %v1612_v61 = vpop.f32.mrb[4].mxu0  ;;  %v1508_v63 = vpop.f32.mrb[5].mxu1 }
 0x18d   : > { %v2480_v62 = vadd.f32 %v1612_v61, %v1506_v60  ;;  %v1614_v0 = vpop.f32.mrb[5].mxu0  ;;  %v1510_v2 = vpop.f32.mrb[6].mxu1  ;;  %v1898_v60 = vld [vmem:[%s3399_s5 + $0xb0] sm:$0xff] (!%p2343_p10)  ;;  %v1899_v61 = vld [vmem:[%s3399_s5 + $0xb8] sm:$0xff] (!%p2343_p10) }
 0x18e   : > { %v2482_v1 = vadd.f32 %v1614_v0, %v1508_v63  ;;  %v1616_v3 = vpop.f32.mrb[6].mxu0  ;;  %v1512_v5 = vpop.f32.mrb[7].mxu1  ;;  %v1882_v63 = vld [vmem:[%s3399_s5 + $0x30] sm:$0xff] (!%p2343_p10)  ;;  %v2428_v0 = vpack.c.bf16 (!%p2343_p10), %v1899_v61, %v1898_v60  ;;  %v1889_v60 = vld [vmem:[%s3399_s5 + $0x68] sm:$0xff] (!%p2343_p10) }
 0x18f   : > { %v2484_v4 = vadd.f32 %v1616_v3, %v1510_v2  ;;  %v1618_v6 = vpop.f32.mrb[7].mxu0  ;;  %v1900_v2 = vld [vmem:[%s3399_s5 + $0xc0] sm:$0xff] (!%p2343_p10)  ;;  %v1901_v3 = vld [vmem:[%s3399_s5 + $0xc8] sm:$0xff] (!%p2343_p10) }
 0x190   : > { %v2486_v7 = vadd.f32 %v1618_v6, %v1512_v5  ;;  %v1884_v6 = vld [vmem:[%s3399_s5 + $0x40] sm:$0xff] (!%p2343_p10) }
 0x1a3   : > { %v1665_v11 = vpop.f32.mrb[8].mxu1 }
 0x1a4   : > { %v1655_v9 = vpop.f32.mrb[0].mxu0  ;;  %v2481_v13 = vadd.f32 %v2480_v62, %v1665_v11  ;;  %v1667_v17 = vpop.f32.mrb[9].mxu1 }
 0x1a5   : > { %v2476_v12 = vadd.f32 %v1655_v9, %v1496_v56  ;;  %v1657_v15 = vpop.f32.mrb[1].mxu0  ;;  %v2483_v19 = vadd.f32 %v2482_v1, %v1667_v17  ;;  %v1669_v23 = vpop.f32.mrb[10].mxu1  ;;  %v2424_v56 = vpack.c.bf16 (!%p2343_p10), %v1897_v54, %v1896_v53  ;;  %v1883_v1 = vld [vmem:[%s3399_s5 + $0x38] sm:$0xff] (!%p2343_p10) }
 0x1a6   : > { %v2477_v18 = vadd.f32 %v1657_v15, %v1498_v57  ;;  %v1659_v21 = vpop.f32.mrb[2].mxu0  ;;  %v1678_v25 = vadd.f32 %v2481_v13, %v429_v10  ;;  %v2485_v27 = vadd.f32 %v2484_v4, %v1669_v23  ;;  %v1671_v31 = vpop.f32.mrb[11].mxu1  ;;  %1693 = sbr.rel (%p2343_p10) target bundleno = 1249 (0x4e1), region = 90  ;;  %v1880_v57 = vld [vmem:[%s3399_s5 + $0x20] sm:$0xff] (!%p2343_p10)  ;;  %v1903_v9 = vld [vmem:[%s3399_s5 + $0xd8] sm:$0xff] (!%p2343_p10) }
 0x1a7   : > { %v1674_v24 = vadd.f32 %v2476_v12, %v425_v8  ;;  %v2478_v26 = vadd.f32 %v1659_v21, %v1500_v58  ;;  %v1661_v29 = vpop.f32.mrb[3].mxu0  ;;  %v1679_v33 = vadd.f32 %v2483_v19, %v430_v16  ;;  %v2487_v35 = vadd.f32 %v2486_v7, %v1671_v31  ;;  %v1881_v58 = vld [vmem:[%s3399_s5 + $0x28] sm:$0xff] (!%p2343_p10)  ;;  %2425 = vmatprep.subr.bf16.mxu0 (!%p2343_p10), %v2424_v56  ;;  %v1902_v8 = vld [vmem:[%s3399_s5 + $0xd0] sm:$0xff] (!%p2343_p10)  ;;  %v1702_v15 = vld [vmem:[%s3396_s2] sm:$0x3] (!%p2343_p10) }
 0x1a8   : > { %v1675_v32 = vadd.f32 %v2477_v18, %v426_v14  ;;  %v2479_v34 = vadd.f32 %v1661_v29, %v1502_v59  ;;  %1686 = vst [vmem:[#allocation2 + $0x20] sm:$0xff] %v1678_v25  ;;  %v1680_v37 = vadd.f32 %v2485_v27, %v431_v22  ;;  %v1705_v59 = vshrl.u32 (!%p2343_p10), %v1704_v47, 7  ;;  %v1885_v7 = vld [vmem:[%s3399_s5 + $0x48] sm:$0xff] (!%p2343_p10)  ;;  %v1886_v25 = vld [vmem:[%s3399_s5 + $0x50] sm:$0xff] (!%p2343_p10)  ;;  %v1998_v53 = vld [vmem:[%s3401_s7 + $0x18] sm:$0xff] (!%p2343_p10) }
 0x1a9   : > { %1682 = vst [vmem:[#allocation2] sm:$0xff] %v1674_v24  ;;  %v1676_v36 = vadd.f32 %v2478_v26, %v427_v20  ;;  %1687 = vst [vmem:[#allocation2 + $0x28] sm:$0xff] %v1679_v33  ;;  %v1681_v39 = vadd.f32 %v2487_v35, %v432_v30  ;;  %v2426_v62 = vpack.c.bf16 (!%p2343_p10), %v1881_v58, %v1880_v57  ;;  %v1887_v26 = vld [vmem:[%s3399_s5 + $0x58] sm:$0xff] (!%p2343_p10) }
 0x1aa   : > { %1683 = vst [vmem:[#allocation2 + $0x8] sm:$0xff] %v1675_v32  ;;  %v1677_v38 = vadd.f32 %v2479_v34, %v428_v28  ;;  %1688 = vst [vmem:[#allocation2 + $0x30] sm:$0xff] %v1680_v37  ;;  %v3216_v4 = vsub.s32 (!%p2343_p10), 1, %v1705_v59  ;;  %v3218_v5 = vsub.s32 (!%p2343_p10), 0, %v1705_v59  ;;  %v2430_v12 = vpack.c.bf16 (!%p2343_p10), %v1883_v1, %v1882_v63  ;;  %v1888_v59 = vld [vmem:[%s3399_s5 + $0x60] sm:$0xff] (!%p2343_p10)  ;;  %v1906_v63 = vld [vmem:[%s3399_s5 + $0xf0] sm:$0xff] (!%p2343_p10) }
 0x1ab   : > { %1684 = vst [vmem:[#allocation2 + $0x10] sm:$0xff] %v1676_v36  ;;  %1689 = vst [vmem:[#allocation2 + $0x38] sm:$0xff] %v1681_v39  ;;  %2427 = vmatpush3.bf16.msra.mxu0 (!%p2343_p10), %v2426_v62  ;;  %v2432_v16 = vpack.c.bf16 (!%p2343_p10), %v1901_v3, %v1900_v2  ;;  %v2434_v22 = vpack.c.bf16 (!%p2343_p10), %v1885_v7, %v1884_v6  ;;  %v2436_v23 = vpack.c.bf16 (!%p2343_p10), %v1903_v9, %v1902_v8  ;;  %v1995_v39 = vld [vmem:[%s3401_s7] sm:$0xff] (!%p2343_p10) }
 0x1ac   : > { %1685 = vst [vmem:[#allocation2 + $0x18] sm:$0xff] %v1677_v38  ;;  %2429 = vmatprep.subr.bf16.mxu0 (!%p2343_p10), %v2428_v0  ;;  %v1711_v17 = vrot.slane (!%p2343_p10), %v1702_v15, %v3216_v4  ;;  %v1707_v21 = vrot.slane (!%p2343_p10), %v1702_v15, %v3218_v5  ;;  %v2438_v41 = vpack.c.bf16 (!%p2343_p10), %v1887_v26, %v1886_v25  ;;  %v1907_v0 = vld [vmem:[%s3399_s5 + $0xf8] sm:$0xff] (!%p2343_p10) }
 0x1ad   : > { %v2449_v57 = vpack.c.bf16 %v1996_v40, %v1995_v39  ;;  %v2440_v58 = vpack.c.bf16 %v1905_v43, %v1904_v42  ;;  %v2452_v3 = vpack.c.bf16 %v1998_v53, %v1997_v52  ;;  %v2442_v8 = vpack.c.bf16 %v1889_v60, %v1888_v59 }
 0x1af   : > { %v1698_v20 = vld [vmem:[#allocation2 + $0x20] sm:$0xff]  ;;  %2431 = vmatpush3.bf16.msra.mxu0 %v2430_v12  ;;  %2450 = vmatpush3.bf16.msra.mxu1 %v2449_v57  ;;  %v1890_v12 = vld [vmem:[%s3399_s5 + $0x70] sm:$0xff] }
 0x1b0   : > { %v1699_v13 = vld [vmem:[#allocation2 + $0x28] sm:$0xff]  ;;  %v1694_v18 = vld [vmem:[#allocation2] sm:$0xff]  ;;  %v3255_v33 = vadd.f32 %v1707_v21, %v1698_v20  ;;  %2433 = vmatprep.subr.bf16.mxu0 %v2432_v16  ;;  %2451 = vmatprep.subr.bf16.mxu1 %v2852_v48 }
 0x1b1   : > { %v1695_v10 = vld [vmem:[#allocation2 + $0x8] sm:$0xff]  ;;  %v1700_v24 = vld [vmem:[#allocation2 + $0x30] sm:$0xff]  ;;  %v3247_v29 = vadd.f32 %v1711_v17, %v1699_v13  ;;  %v3251_v31 = vadd.f32 %v1707_v21, %v1694_v18  ;;  %v1891_v13 = vld [vmem:[%s3399_s5 + $0x78] sm:$0xff] }
 0x1b2   : > { %v1701_v14 = vld [vmem:[#allocation2 + $0x38] sm:$0xff]  ;;  %v1696_v19 = vld [vmem:[#allocation2 + $0x10] sm:$0xff]  ;;  %v3243_v27 = vadd.f32 %v1711_v17, %v1695_v10  ;;  %v3257_v34 = vadd.f32 %v1707_v21, %v1700_v24  ;;  %v1747_v51 = vmul.f32 %v3255_v33, %v3255_v33  ;;  %v2446_v20 = vpack.c.bf16 %v1891_v13, %v1890_v12 }
 0x1b3   : > { %v1697_v11 = vld [vmem:[#allocation2 + $0x18] sm:$0xff]  ;;  %v3249_v30 = vadd.f32 %v1711_v17, %v1701_v14  ;;  %v3253_v32 = vadd.f32 %v1707_v21, %v1696_v19  ;;  %v1748_v38 = vmul.f32 %v3247_v29, %v3247_v29  ;;  %v1743_v45 = vmul.f32 %v3251_v31, %v3251_v31  ;;  %2435 = vmatpush3.bf16.msra.mxu0 %v2434_v22 }
 0x1b4   : > { %v3245_v28 = vadd.f32 %v1711_v17, %v1697_v11  ;;  %v1744_v36 = vmul.f32 %v3243_v27, %v3243_v27  ;;  %v1749_v55 = vmul.f32 %v3257_v34, %v3257_v34  ;;  %2437 = vmatprep.subr.bf16.mxu0 %v2436_v23  ;;  %v2444_v11 = vpack.c.bf16 %v1907_v0, %v1906_v63 }
 0x1b5   : > { %v1722_v44 = vadd.f32 %v3253_v32, %v3251_v31  ;;  %v1745_v46 = vmul.f32 %v3253_v32, %v3253_v32  ;;  %v1750_v49 = vmul.f32 %v3249_v30, %v3249_v30  ;;  %2453 = vmatpush3.bf16.msra.mxu1 %v2452_v3 }
 0x1b6   : > { %v1731_v35 = vadd.f32 %v3245_v28, %v3243_v27  ;;  %v1746_v37 = vmul.f32 %v3245_v28, %v3245_v28  ;;  %2454 = vmatprep.subr.bf16.mxu1 %v2852_v48 }
 0x1b7   : > { %v1723_v54 = vadd.f32 %v1722_v44, %v3255_v33  ;;  %v1751_v56 = vadd.f32 %v1745_v46, %v1743_v45  ;;  %2439 = vmatpush3.bf16.msra.mxu0 %v2438_v41 }
 0x1b8   : > { %v1732_v47 = vadd.f32 %v1731_v35, %v3247_v29  ;;  %v1760_v50 = vadd.f32 %v1746_v37, %v1744_v36  ;;  %2441 = vmatprep.subr.bf16.mxu0 %v2440_v58 }
 0x1b9   : > { %v1724_v1 = vadd.f32 %v1723_v54, %v3257_v34  ;;  %v1752_v2 = vadd.f32 %v1751_v56, %v1747_v51  ;;  %v1795_v56 = vld [vmem:[%s3397_s3] sm:$0x3] }
 0x1ba   : > { %v1733_v61 = vadd.f32 %v1732_v47, %v3249_v30  ;;  %v1761_v62 = vadd.f32 %v1760_v50, %v1748_v38 }
 0x1bb   : > { %v1725_v9 = vrot.slane %v1724_v1, 4  ;;  %v1753_v10 = vadd.f32 %v1752_v2, %v1749_v55  ;;  %2443 = vmatpush3.bf16.msra.mxu0 %v2442_v8 }
 0x1bc   : > { %v1734_v6 = vrot.slane %v1733_v61, 4  ;;  %v1762_v7 = vadd.f32 %v1761_v62, %v1750_v49  ;;  %2445 = vmatprep.subr.bf16.mxu0 %v2444_v11 }
 0x1bd   : > { %v1726_v16 = vadd.f32 %v1725_v9, %v1724_v1  ;;  %v1754_v17 = vrot.slane %v1753_v10, 4 }
 0x1be   : > { %v1735_v14 = vadd.f32 %v1734_v6, %v1733_v61  ;;  %v1763_v15 = vrot.slane %v1762_v7, 4  ;;  %v1815_v61 = vld [vmem:[%s3398_s4] sm:$0x3] }
 0x1bf   : > { %v1727_v21 = vrot.slane %v1726_v16, 2  ;;  %v1755_v22 = vadd.f32 %v1754_v17, %v1753_v10  ;;  %2447 = vmatpush3.bf16.msra.mxu0 %v2446_v20 }
 0x1c0   : > { %v1736_v18 = vrot.slane %v1735_v14, 2  ;;  %v1764_v19 = vadd.f32 %v1763_v15, %v1762_v7 }
 0x1c1   : > { %v1728_v25 = vadd.f32 %v1727_v21, %v1726_v16  ;;  %v1756_v26 = vrot.slane %v1755_v22, 2 }
 0x1c2   : > { %v1737_v23 = vadd.f32 %v1736_v18, %v1735_v14  ;;  %v1765_v24 = vrot.slane %v1764_v19, 2 }
 0x1c3   : > { %v1729_v37 = vrot.slane %v1728_v25, 1  ;;  %v1757_v38 = vadd.f32 %v1756_v26, %v1755_v22 }
 0x1c4   : > { %v1738_v35 = vrot.slane %v1737_v23, 1  ;;  %v1766_v36 = vadd.f32 %v1765_v24, %v1764_v19 }
 0x1c5   : > { %v1730_v41 = vadd.f32 %v1729_v37, %v1728_v25  ;;  %v1758_v42 = vrot.slane %v1757_v38, 1 }
 0x1c6   : > { %v1739_v39 = vadd.f32 %v1738_v35, %v1737_v23  ;;  %v1767_v40 = vrot.slane %v1766_v36, 1 }
 0x1c7   : > { %v1741_v45 = vmul.f32 0.03125, %v1730_v41  ;;  %v1759_v46 = vadd.f32 %v1758_v42, %v1757_v38 }
 0x1c8   : > { %v1742_v43 = vmul.f32 0.03125, %v1739_v39  ;;  %v1768_v44 = vadd.f32 %v1767_v40, %v1766_v36 }
 0x1c9   : > { %v1769_v50 = vmul.f32 0.03125, %v1759_v46  ;;  %v1771_v51 = vmul.f32 %v1741_v45, %v1741_v45  ;;  %v1775_v62 = vsub.f32 %v3251_v31, %v1741_v45  ;;  %v1777_v63 = vsub.f32 %v3253_v32, %v1741_v45 }
 0x1ca   : > { %v1770_v47 = vmul.f32 0.03125, %v1768_v44  ;;  %v1772_v49 = vmul.f32 %v1742_v43, %v1742_v43  ;;  %v1776_v57 = vsub.f32 %v3243_v27, %v1742_v43  ;;  %v1778_v58 = vsub.f32 %v3245_v28, %v1742_v43 }
 0x1cb   : > { %v1773_v53 = vsub.f32 %v1769_v50, %v1771_v51  ;;  %v1780_v59 = vsub.f32 %v3247_v29, %v1742_v43  ;;  %v1782_v60 = vsub.f32 %v3249_v30, %v1742_v43  ;;  %v1779_v0 = vsub.f32 %v3255_v33, %v1741_v45 }
 0x1cc   : > { %v1774_v52 = vsub.f32 %v1770_v47, %v1772_v49  ;;  %v1781_v1 = vsub.f32 %v3257_v34, %v1741_v45  ;;  %v1804_v27 = vrot.slane %v1795_v56, %v3216_v4  ;;  %v1824_v28 = vrot.slane %v1815_v61, %v3216_v4 }
 0x1cd   : > { %v1783_v55 = vadd.f32 1e-05, %v1773_v53  ;;  %v1800_v29 = vrot.slane %v1795_v56, %v3218_v5  ;;  %v1820_v30 = vrot.slane %v1815_v61, %v3218_v5 }
 0x1ce   : > { %v1784_v54 = vadd.f32 1e-05, %v1774_v52 }
 0x1d0   : > { %2788 = vrsqrt.f32 %v1784_v54 }
 0x1d1   : > { %2790 = vrsqrt.f32 %v1783_v55 }
 0x1da   : > { %v2789_v2 = vpop.eup %2788 }
 0x1db   : > { %v2791_v3 = vpop.eup %2790  ;;  %v1788_v6 = vmul.f32 %v2789_v2, %v1776_v57  ;;  %v1790_v7 = vmul.f32 %v2789_v2, %v1778_v58  ;;  %v1792_v8 = vmul.f32 %v2789_v2, %v1780_v59  ;;  %v1794_v31 = vmul.f32 %v2789_v2, %v1782_v60 }
 0x1dc   : > { %v1787_v9 = vmul.f32 %v2791_v3, %v1775_v62  ;;  %v1789_v32 = vmul.f32 %v2791_v3, %v1777_v63  ;;  %v1791_v10 = vmul.f32 %v2791_v3, %v1779_v0  ;;  %v1793_v33 = vmul.f32 %v2791_v3, %v1781_v1 }
 0x1dd   : > { %v1808_v11 = vmul.f32 %v1804_v27, %v1788_v6  ;;  %v1810_v34 = vmul.f32 %v1804_v27, %v1790_v7  ;;  %v1812_v12 = vmul.f32 %v1804_v27, %v1792_v8  ;;  %v1814_v13 = vmul.f32 %v1804_v27, %v1794_v31  ;;  %v1999_v31 = vld [vmem:[%s3401_s7 + $0x20] sm:$0xff] }
 0x1de   : > { %v1807_v14 = vmul.f32 %v1800_v29, %v1787_v9  ;;  %v1809_v15 = vmul.f32 %v1800_v29, %v1789_v32  ;;  %v1811_v4 = vmul.f32 %v1800_v29, %v1791_v10  ;;  %v1813_v16 = vmul.f32 %v1800_v29, %v1793_v33  ;;  %v2000_v9 = vld [vmem:[%s3401_s7 + $0x28] sm:$0xff]  ;;  %v2001_v10 = vld [vmem:[%s3401_s7 + $0x30] sm:$0xff]  ;;  %v2002_v33 = vld [vmem:[%s3401_s7 + $0x38] sm:$0xff] }
 0x1df   : > { %v1828_v17 = vadd.f32 %v1824_v28, %v1808_v11  ;;  %v1830_v18 = vadd.f32 %v1824_v28, %v1810_v34  ;;  %v1832_v5 = vadd.f32 %v1824_v28, %v1812_v12  ;;  %v1834_v19 = vadd.f32 %v1824_v28, %v1814_v13  ;;  %v2344_v13 = vld [vmem:[%s3400_s6] ss:$0 sm:$0xff] }
 0x1e0   : > { %v1827_v20 = vadd.f32 %v1820_v30, %v1807_v14  ;;  %v1829_v21 = vadd.f32 %v1820_v30, %v1809_v15  ;;  %v1831_v22 = vadd.f32 %v1820_v30, %v1811_v4  ;;  %v1833_v23 = vadd.f32 %v1820_v30, %v1813_v16  ;;  %v2345_v16 = vld [vmem:[%s3402_s8] ss:$0 sm:$0xff] }
 0x1e1   : > { %v1836_v24 = vmax.f32 %v1828_v17, 0.0  ;;  %v1838_v25 = vmax.f32 %v1830_v18, 0.0  ;;  %v1840_v26 = vmax.f32 %v1832_v5, 0.0  ;;  %v1842_v35 = vmax.f32 %v1834_v19, 0.0 }
 0x1e2   : > { %v1835_v36 = vmax.f32 %v1827_v20, 0.0  ;;  %v1837_v37 = vmax.f32 %v1829_v21, 0.0  ;;  %v1839_v38 = vmax.f32 %v1831_v22, 0.0  ;;  %v1841_v39 = vmax.f32 %v1833_v23, 0.0 }
 0x1e3   : > { %v1850_v40 = vadd.f32 %v1838_v25, %v1836_v24  ;;  %v1864_v41 = vadd.f32 %v1842_v35, %v1840_v26  ;;  %v2455_v32 = vpack.c.bf16 %v2000_v9, %v1999_v31  ;;  %v2458_v11 = vpack.c.bf16 %v2002_v33, %v2001_v10 }
 0x1e4   : > { %v1843_v42 = vadd.f32 %v1837_v37, %v1835_v36  ;;  %v1857_v43 = vadd.f32 %v1841_v39, %v1839_v38  ;;  %v2854_v34 = vmov 0.0  }
 0x1e5   : > { %v1851_v44 = vrot.slane %v1850_v40, 4  ;;  %v1865_v45 = vrot.slane %v1864_v41, 4  ;;  %2456 = vmatpush3.bf16.msra.mxu1 %v2455_v32  ;;  %2413 = vmatprep.mubr.msk.f32.mxu1 %vm2853_vm1, %v2854_v34 }
 0x1e6   : > { %v1844_v46 = vrot.slane %v1843_v42, 4  ;;  %v1858_v47 = vrot.slane %v1857_v43, 4  ;;  %2457 = vmatprep.subr.bf16.mxu1 %v2852_v48 }
 0x1e7   : > { %v1852_v49 = vadd.f32 %v1851_v44, %v1850_v40  ;;  %v1866_v50 = vadd.f32 %v1865_v45, %v1864_v41 }
 0x1e8   : > { %v1845_v51 = vadd.f32 %v1844_v46, %v1843_v42  ;;  %v1859_v52 = vadd.f32 %v1858_v47, %v1857_v43 }
 0x1e9   : > { %v1853_v53 = vrot.slane %v1852_v49, 2  ;;  %v1867_v54 = vrot.slane %v1866_v50, 2  ;;  %2459 = vmatpush3.bf16.msra.mxu1 %v2458_v11 }
 0x1ea   : > { %v1846_v55 = vrot.slane %v1845_v51, 2  ;;  %v1860_v56 = vrot.slane %v1859_v52, 2 }
 0x1eb   : > { %v1854_v57 = vadd.f32 %v1853_v53, %v1852_v49  ;;  %v1868_v58 = vadd.f32 %v1867_v54, %v1866_v50 }
 0x1ec   : > { %v1847_v59 = vadd.f32 %v1846_v55, %v1845_v51  ;;  %v1861_v60 = vadd.f32 %v1860_v56, %v1859_v52 }
 0x1ed   : > { %v1855_v61 = vrot.slane %v1854_v57, 1  ;;  %v1869_v62 = vrot.slane %v1868_v58, 1 }
 0x1ee   : > { %v1848_v63 = vrot.slane %v1847_v59, 1  ;;  %v1862_v0 = vrot.slane %v1861_v60, 1 }
 0x1ef   : > { %v1856_v1 = vadd.f32 %v1855_v61, %v1854_v57  ;;  %v1870_v27 = vadd.f32 %v1869_v62, %v1868_v58 }
 0x1f0   : > { %v1849_v2 = vadd.f32 %v1848_v63, %v1847_v59  ;;  %v1863_v28 = vadd.f32 %v1862_v0, %v1861_v60 }
 0x1f1   : > { %v1873_v29 = vmul.f32 0.0625, %v1856_v1  ;;  %v1875_v30 = vmul.f32 0.0625, %v1870_v27 }
 0x1f2   : > { %v1872_v3 = vmul.f32 0.0625, %v1849_v2  ;;  %v1874_v6 = vmul.f32 0.0625, %v1863_v28 }
 0x1f3   : > { %v1921_v7 = vsel %vm1919_vm0, %v1875_v30, %v1873_v29 }
 0x1f4   : > { %1988 = vmatprep.mubr.f32.mxu0 %v1921_v7  ;;  %v1920_v8 = vsel %vm1919_vm0, %v1874_v6, %v1872_v3 }
 0x1f5   : > { %1989 = vmatmul.mubr.f32.vlgmr.msra.gmra.mrb[0].mxu0 %v1920_v8 }
 0x2c8   : > { %v2385_v12 = vpop.f32.mrb[0].mxu0 }
 0x2c9   : > { %v2386_v14 = vpop.f32.mrb[1].mxu0 }
 0x2ca   : > { %v2387_v48 = vadd.f32 %v2386_v14, %v2385_v12 }
 0x2cc   : > { %v1991_v15 = vadd.f32 %v2387_v48, %v2344_v13 }
 0x2ce   : > { %v1994_v4 = vmax.f32 %v1991_v15, 0.0 }
 0x2d0   : > { %2414 = vmatmul.mubr.msk.f32.vlgmr.msra.gmra.mrb[0].mxu1 %vm2010_vm2, %v1994_v4 }
 0x3a3   : > { %v2080_v17 = vpop.f32.mrb[0].mxu1 }
 0x3a4   : > { %v2081_v18 = vadd.f32 %v2345_v16, %v2080_v17  ;;  %v2415_v5 = vpop.f32.mrb[1].mxu1 }
 0x3a6   : > { %v2085_v19 = vsel %vm2084_vm3, %v2081_v18, -inf }
 0x3a7   : > { %2086 = vmax.xlane.f32.xlu0 %v2085_v19 }
 0x434   : > { %v2087_v20 = vpop.xlane.xlu0 %2086 }
 0x435   : > { %v2088_v21 = vsub.f32 %v2081_v18, %v2087_v20 }
 0x437   : > { %v2089_v22 = vmul.f32 1.442695, %v2088_v21 }
 0x439   : > { %2792 = vpow2.f32 %v2089_v22 }
 0x443   : > { %v2793_v23 = vpop.eup %2792 }
 0x444   : > { %v2091_v24 = vsel %vm2084_vm3, %v2793_v23, 0.0 }
 0x445   : > { %2092 = vadd.xlane.f32.xlu0 %v2091_v24 }
 0x4d2   : > { %v2093_v25 = vpop.xlane.xlu0 %2092 }
 0x4d3   : > { %2794 = vrcp.f32 %v2093_v25 }
 0x4dd   : > { %v2795_v26 = vpop.eup %2794 }
 0x4de   : > { %v2095_v35 = vmul.f32 %v2795_v26, %v2793_v23 }
 0x4e0   : > { %2096 = vst.msk [vmem:[#allocation4] sm:$0x3] %vm2084_vm3, %v2095_v35 }
 0x4e1 PF: > { %p2514_p11 = scmp.eq.s32.totalorder %s2922_s12, 3  ;;  %s2855_s20 = smov [#allocation4]  }
 0x4e2   : > { %s2104_s21 = sshll.u32 %s2855_s20, 4  ;;  %s2105_s21 = int_to_ptr.vmem [resolvable:$true] %s2104_s21 }
 0x4e3   : > { %s2796_s22 = scalar_lea.vmem %s2105_s21, 32  ;;  %p2803_p1 = scmp.lt.s32.totalorder %s2105_s21, %s2105_s21 }
 0x4e4   : > { %p2797_p12 = scmp.ne.s32.totalorder %s2105_s21, %s2796_s22  ;;  %p2804_p2 = scmp.lt.s32.totalorder %s2796_s22, %s2796_s22 }
 0x4e6   : > { %p2798_p13 = pnand %p2797_p12, %p2514_p11  ;;  %p2805_p3 = por %p2804_p2, %p2803_p1 }
 0x4e8   : > { %p2799_p0 = pneg %p2798_p13 }
 0x4ea   : > { %p2806_p4 = pnand %p2805_p3, %p2799_p0 }
 0x4ec   : > { %2809 = shalt.err (!%p2806_p4)
}
 0x4ed   : > { %s2810_s25 = scalar_lea.hbm %s3403_s9, 32 }
 0x4ee   : > { %p2811_p5 = scmp.ne.s32.totalorder %s3403_s9, %s2810_s25  ;;  %p2816_p8 = scmp.lt.u32.totalorder %s2810_s25, %s3403_s9 }
 0x4f0   : > { %p2812_p6 = pnand %p2811_p5, %p2514_p11 }
 0x4f2   : > { %p2813_p7 = pneg %p2812_p6 }
 0x4f4   : > { %p2818_p9 = pnand %p2816_p8, %p2813_p7 }
 0x4f6   : > { %2821 = shalt.err (!%p2818_p9)
}
 0x4f7   : > { %2511 = dma.vmem_to_hbm [thread:$0]  (%p2514_p11), %s2105_s21, 32, %s3403_s9, [#allocation5]  }
 0x4f8   : > { %2835 = dma.done.wait (%p2514_p11), [#allocation5], 32  }
 0x4f9   : > { %2837 = vsyncadd (%p2514_p11), [#allocation5], 4294967264 }
 0x4fa PF: > { %p17_p10 = scmp.ge.s32.totalorder %s2925_s13, 6   ;;  %s3404_s30 = smov %s2844_s10 }
 0x4fb   : > { %s3405_s10 = smov %s2934_s16  ;;  %s3406_s11 = smov %s2925_s13 }
 0x4fc   :  { %19 = sbr.rel (!%p17_p10) target bundleno = 2 (0x2), region = 131 }
 0x503   :  { %2117 = vsyncpa [#allocation5], 1 }
 0x504   :  { %2119 = vsyncpa [#allocation5 + $0x1], 1 }

// kernel: diseased_cnn_head.2
= control target key start
LH: loop header
LB: loop body
LE: loop exit
PB: predicated region body
PF: predicated region fallthrough
CT: control target
= control target key end

     0   :  { %s8584_s0 = inlined_call_operand.vmem [shape: bf16[32,18432], index: 0, kind: input, shape index: {}]   ;;  %s8585_s1 = inlined_call_operand.hbm [shape: bf16[18432,512], index: 1, kind: input, shape index: {}]   ;;  %s8586_s2 = inlined_call_operand.vmem [shape: f32[1,512], index: 2, kind: input, shape index: {}]   ;;  %s8587_s3 = inlined_call_operand.vmem [shape: bf16[32,512], index: 3, kind: output, shape index: {}]  }
   0x1   :  { %8591 = sst [smem:[#allocation12_spill]] %s8584_s0 }
   0x2   :  { %8 = vsyncpa [#allocation5], 0 }
   0x3   :  { %10 = vsyncpa [#allocation5 + $0x1], 0  ;;  %s7554_s12 = smov 0   ;;  %s7556_s13 = smov 0  }
   0x4   :  { %s7558_s14 = smov 0   ;;  %s7560_s15 = smov 0  }
   0x5   :  { %s7562_s16 = smov 0   ;;  %s7564_s17 = smov 0  }
   0x6   :  { %s7566_s18 = smov 0   ;;  %s7568_s19 = smov 0  }
   0x7   :  { %s7570_s20 = smov 0   ;;  %s7572_s21 = smov 0  }
   0x8   :  { %s7574_s22 = smov 0   ;;  %s7576_s23 = smov 0  }
   0x9 LB: > { %8592 = sst [smem:[#allocation8_spill]] %s7523_s22  ;;  %s5510_s24 = sadd.s32 4294967295, %s7527_s23   ;;  %s7527_s23 = sphi %s7576_s23, %s16_s23   ;;  %s7523_s22 = sphi %s7574_s22, %s8605_s22   ;;  %s7519_s21 = sphi %s7572_s21, %s8615_s21   ;;  %s7515_s20 = sphi %s7570_s20, %s8614_s20   ;;  %s7511_s19 = sphi %s7568_s19, %s8613_s19   ;;  %s7507_s18 = sphi %s7566_s18, %s8612_s18   ;;  %s7503_s17 = sphi %s7564_s17, %s8611_s17   ;;  %s7499_s16 = sphi %s7562_s16, %s8610_s16   ;;  %s7495_s15 = sphi %s7560_s15, %s8609_s15   ;;  %s7491_s14 = sphi %s7558_s14, %s8608_s14   ;;  %s7487_s13 = sphi %s7556_s13, %s8607_s13   ;;  %s7483_s12 = sphi %s7554_s12, %s8606_s12  }
   0xa   : > { %s25_s25 = sadd.s32 1, %s7519_s21  ;;  %s28_s26 = sadd.s32 1, %s7523_s22 }
   0xb   : > { %p26_p0 = scmp.ge.s32.totalorder %s25_s25, 4  ;;  %s35_s27 = sadd.s32 1, %s7507_s18 }
   0xc   : > { %p42_p1 = scmp.ne.s32.totalorder %s7507_s18, %s7503_s17  ;;  %p43_p2 = scmp.eq.s32.totalorder %s7527_s23, 0 }
   0xd   : > { %s8617_s25 = smov (%p26_p0, %s25_s25), 0  ;;  %s8619_s26 = smov (!%p26_p0, %s28_s26), %s7523_s22 }
   0xe   : > { %8593 = sst [smem:[#allocation9_spill]] %s8617_s25  ;;  %s32_s28 = ssub.s32 %s7519_s21, %s8617_s25 }
   0xf   : > { %p30_p3 = scmp.ge.s32.totalorder %s8619_s26, 2  ;;  %p33_p4 = scmp.eq.s32.totalorder %s32_s28, 0 }
  0x10   : > { %p7626_p5 = por %p43_p2, %p42_p1  ;;  %s63_s30 = sadd.s32 1, %s7499_s16 }
  0x11   : > { %s8621_s26 = smov (%p30_p3, %s8619_s26), 0  ;;  %p70_p6 = scmp.ne.s32.totalorder %s7499_s16, %s7495_s15 }
  0x12   : > { %8595 = sst [smem:[#allocation10_spill]] %s8621_s26  ;;  %s59_s5 = ssub.s32 %s7523_s22, %s8621_s26 }
  0x13   : > { %s7634_s4 = scalar_select %p33_p4, %s7507_s18, %s35_s27  }
  0x14   : > { %s60_s6 = sor.u32 %s59_s5, %s32_s28  ;;  %p76_p7 = scmp.ne.s32.totalorder %s7495_s15, %s7491_s14 }
  0x15   : > { %8596 = sst [smem:[#allocation11_spill]] %s7634_s4  ;;  %p61_p8 = scmp.eq.s32.totalorder %s60_s6, 0 }
  0x16   : > { %p7642_p9 = por %p70_p6, %p43_p2  ;;  %p77_p10 = scmp.eq.s32.totalorder %s5510_s24, 0 }
  0x17   : > { %p113_p11 = scmp.eq.s32.totalorder %s59_s5, 0  ;;  %s115_s10 = sadd.s32 1, %s7487_s13 }
  0x18   : > { %s7649_s8 = scalar_select %p61_p8, %s7499_s16, %s63_s30  }
  0x19   : > { %p7651_p12 = por %p77_p10, %p76_p7  ;;  %p125_p13 = scmp.ne.s32.totalorder %s7487_s13, %s7483_s12 }
  0x1a   : > { %s7657_s11 = scalar_select %p113_p11, %s7487_s13, %s115_s10  }
  0x1b   : > { %p126_p0 = scmp.eq.s32.totalorder %s5510_s24, 7  ;;  %p5513_p2 = scmp.ge.s32.totalorder %s7527_s23, 8 }
  0x1d   : > { %p7663_p1 = por %p126_p0, %p125_p13  ;;  %148 = sbr.rel (%p5513_p2) target bundleno = 111 (0x6f), region = 16 }
  0x1f   : > { %s8599_s14 = scalar_select %p7663_p1, 1, 0 }
  0x24   : > { %151 = sbr.rel (!%p7626_p5) target bundleno = 81 (0x51), region = 20  ;;  %s153_s27 = sand.u32 (%p7626_p5), 1, %s7507_s18  }
  0x25   : > { %s6180_s28 = smul.u32 (%p7626_p5), 144, %s7519_s21  ;;  %s8600_s0 = sld [smem:[#allocation12_spill]] (%p7626_p5) }
  0x26   : > { %s6323_s30 = smul.u32 (%p7626_p5), 576, %s153_s27 }
  0x28   : > { %s7680_s24 = scalar_lea.vmem (%p7626_p5), [#allocation3], %s6323_s30 }
  0x2b   : > { %s7675_s10 = scalar_lea.vmem %s8600_s0, %s6180_s28 }
  0x2c   : > { %v171_v0 = vld [vmem:[%s7675_s10] sm:$0xff]  ;;  %v173_v1 = vld [vmem:[%s7675_s10 + $0x8] sm:$0xff]  ;;  %v175_v2 = vld [vmem:[%s7675_s10 + $0x10] sm:$0xff] }
  0x2d   : > { %172 = vst [vmem:[%s7680_s24] sm:$0xff] %v171_v0  ;;  %174 = vst [vmem:[%s7680_s24 + $0x8] sm:$0xff] %v173_v1  ;;  %v177_v3 = vld [vmem:[%s7675_s10 + $0x18] sm:$0xff]  ;;  %v179_v4 = vld [vmem:[%s7675_s10 + $0x20] sm:$0xff] }
  0x2e   : > { %176 = vst [vmem:[%s7680_s24 + $0x10] sm:$0xff] %v175_v2  ;;  %v181_v5 = vld [vmem:[%s7675_s10 + $0x28] sm:$0xff]  ;;  %178 = vst [vmem:[%s7680_s24 + $0x18] sm:$0xff] %v177_v3  ;;  %v183_v6 = vld [vmem:[%s7675_s10 + $0x30] sm:$0xff] }
  0x2f   : > { %180 = vst [vmem:[%s7680_s24 + $0x20] sm:$0xff] %v179_v4  ;;  %182 = vst [vmem:[%s7680_s24 + $0x28] sm:$0xff] %v181_v5  ;;  %v185_v7 = vld [vmem:[%s7675_s10 + $0x38] sm:$0xff]  ;;  %v187_v8 = vld [vmem:[%s7675_s10 + $0x40] sm:$0xff] }
  0x30   : > { %184 = vst [vmem:[%s7680_s24 + $0x30] sm:$0xff] %v183_v6  ;;  %186 = vst [vmem:[%s7680_s24 + $0x38] sm:$0xff] %v185_v7  ;;  %v189_v9 = vld [vmem:[%s7675_s10 + $0x48] sm:$0xff]  ;;  %v191_v10 = vld [vmem:[%s7675_s10 + $0x50] sm:$0xff] }
  0x31   : > { %188 = vst [vmem:[%s7680_s24 + $0x40] sm:$0xff] %v187_v8  ;;  %v193_v11 = vld [vmem:[%s7675_s10 + $0x58] sm:$0xff]  ;;  %190 = vst [vmem:[%s7680_s24 + $0x48] sm:$0xff] %v189_v9  ;;  %v195_v12 = vld [vmem:[%s7675_s10 + $0x60] sm:$0xff] }
  0x32   : > { %192 = vst [vmem:[%s7680_s24 + $0x50] sm:$0xff] %v191_v10  ;;  %194 = vst [vmem:[%s7680_s24 + $0x58] sm:$0xff] %v193_v11  ;;  %v197_v13 = vld [vmem:[%s7675_s10 + $0x68] sm:$0xff]  ;;  %v199_v14 = vld [vmem:[%s7675_s10 + $0x70] sm:$0xff] }
  0x33   : > { %196 = vst [vmem:[%s7680_s24 + $0x60] sm:$0xff] %v195_v12  ;;  %198 = vst [vmem:[%s7680_s24 + $0x68] sm:$0xff] %v197_v13  ;;  %v201_v15 = vld [vmem:[%s7675_s10 + $0x78] sm:$0xff]  ;;  %v203_v16 = vld [vmem:[%s7675_s10 + $0x80] sm:$0xff] }
  0x34   : > { %200 = vst [vmem:[%s7680_s24 + $0x70] sm:$0xff] %v199_v14  ;;  %v205_v17 = vld [vmem:[%s7675_s10 + $0x88] sm:$0xff]  ;;  %202 = vst [vmem:[%s7680_s24 + $0x78] sm:$0xff] %v201_v15  ;;  %v207_v18 = vld [vmem:[%s7675_s10 + $0x240] sm:$0xff] }
  0x35   : > { %204 = vst [vmem:[%s7680_s24 + $0x80] sm:$0xff] %v203_v16  ;;  %206 = vst [vmem:[%s7680_s24 + $0x88] sm:$0xff] %v205_v17  ;;  %v209_v19 = vld [vmem:[%s7675_s10 + $0x248] sm:$0xff]  ;;  %v211_v20 = vld [vmem:[%s7675_s10 + $0x250] sm:$0xff] }
  0x36   : > { %208 = vst [vmem:[%s7680_s24 + $0x90] sm:$0xff] %v207_v18  ;;  %210 = vst [vmem:[%s7680_s24 + $0x98] sm:$0xff] %v209_v19  ;;  %v213_v21 = vld [vmem:[%s7675_s10 + $0x258] sm:$0xff]  ;;  %v215_v22 = vld [vmem:[%s7675_s10 + $0x260] sm:$0xff] }
  0x37   : > { %212 = vst [vmem:[%s7680_s24 + $0xa0] sm:$0xff] %v211_v20  ;;  %v217_v23 = vld [vmem:[%s7675_s10 + $0x268] sm:$0xff]  ;;  %214 = vst [vmem:[%s7680_s24 + $0xa8] sm:$0xff] %v213_v21  ;;  %v219_v24 = vld [vmem:[%s7675_s10 + $0x270] sm:$0xff] }
  0x38   : > { %216 = vst [vmem:[%s7680_s24 + $0xb0] sm:$0xff] %v215_v22  ;;  %218 = vst [vmem:[%s7680_s24 + $0xb8] sm:$0xff] %v217_v23  ;;  %v221_v25 = vld [vmem:[%s7675_s10 + $0x278] sm:$0xff]  ;;  %v223_v26 = vld [vmem:[%s7675_s10 + $0x280] sm:$0xff] }
  0x39   : > { %220 = vst [vmem:[%s7680_s24 + $0xc0] sm:$0xff] %v219_v24  ;;  %222 = vst [vmem:[%s7680_s24 + $0xc8] sm:$0xff] %v221_v25  ;;  %v225_v27 = vld [vmem:[%s7675_s10 + $0x288] sm:$0xff]  ;;  %v227_v28 = vld [vmem:[%s7675_s10 + $0x290] sm:$0xff] }
  0x3a   : > { %224 = vst [vmem:[%s7680_s24 + $0xd0] sm:$0xff] %v223_v26  ;;  %v229_v29 = vld [vmem:[%s7675_s10 + $0x298] sm:$0xff]  ;;  %226 = vst [vmem:[%s7680_s24 + $0xd8] sm:$0xff] %v225_v27  ;;  %v231_v30 = vld [vmem:[%s7675_s10 + $0x2a0] sm:$0xff] }
  0x3b   : > { %228 = vst [vmem:[%s7680_s24 + $0xe0] sm:$0xff] %v227_v28  ;;  %230 = vst [vmem:[%s7680_s24 + $0xe8] sm:$0xff] %v229_v29  ;;  %v233_v31 = vld [vmem:[%s7675_s10 + $0x2a8] sm:$0xff]  ;;  %v235_v32 = vld [vmem:[%s7675_s10 + $0x2b0] sm:$0xff] }
  0x3c   : > { %232 = vst [vmem:[%s7680_s24 + $0xf0] sm:$0xff] %v231_v30  ;;  %234 = vst [vmem:[%s7680_s24 + $0xf8] sm:$0xff] %v233_v31  ;;  %v237_v33 = vld [vmem:[%s7675_s10 + $0x2b8] sm:$0xff]  ;;  %v239_v34 = vld [vmem:[%s7675_s10 + $0x2c0] sm:$0xff] }
  0x3d   : > { %236 = vst [vmem:[%s7680_s24 + $0x100] sm:$0xff] %v235_v32  ;;  %v241_v35 = vld [vmem:[%s7675_s10 + $0x2c8] sm:$0xff]  ;;  %238 = vst [vmem:[%s7680_s24 + $0x108] sm:$0xff] %v237_v33  ;;  %v243_v36 = vld [vmem:[%s7675_s10 + $0x480] sm:$0xff] }
  0x3e   : > { %240 = vst [vmem:[%s7680_s24 + $0x110] sm:$0xff] %v239_v34  ;;  %242 = vst [vmem:[%s7680_s24 + $0x118] sm:$0xff] %v241_v35  ;;  %v245_v37 = vld [vmem:[%s7675_s10 + $0x488] sm:$0xff]  ;;  %v247_v38 = vld [vmem:[%s7675_s10 + $0x490] sm:$0xff] }
  0x3f   : > { %244 = vst [vmem:[%s7680_s24 + $0x120] sm:$0xff] %v243_v36  ;;  %246 = vst [vmem:[%s7680_s24 + $0x128] sm:$0xff] %v245_v37  ;;  %v249_v39 = vld [vmem:[%s7675_s10 + $0x498] sm:$0xff]  ;;  %v251_v40 = vld [vmem:[%s7675_s10 + $0x4a0] sm:$0xff] }
  0x40   : > { %248 = vst [vmem:[%s7680_s24 + $0x130] sm:$0xff] %v247_v38  ;;  %v253_v41 = vld [vmem:[%s7675_s10 + $0x4a8] sm:$0xff]  ;;  %250 = vst [vmem:[%s7680_s24 + $0x138] sm:$0xff] %v249_v39  ;;  %v255_v42 = vld [vmem:[%s7675_s10 + $0x4b0] sm:$0xff] }
  0x41   : > { %252 = vst [vmem:[%s7680_s24 + $0x140] sm:$0xff] %v251_v40  ;;  %254 = vst [vmem:[%s7680_s24 + $0x148] sm:$0xff] %v253_v41  ;;  %v257_v43 = vld [vmem:[%s7675_s10 + $0x4b8] sm:$0xff]  ;;  %v259_v44 = vld [vmem:[%s7675_s10 + $0x4c0] sm:$0xff] }
  0x42   : > { %256 = vst [vmem:[%s7680_s24 + $0x150] sm:$0xff] %v255_v42  ;;  %258 = vst [vmem:[%s7680_s24 + $0x158] sm:$0xff] %v257_v43  ;;  %v261_v45 = vld [vmem:[%s7675_s10 + $0x4c8] sm:$0xff]  ;;  %v263_v46 = vld [vmem:[%s7675_s10 + $0x4d0] sm:$0xff] }
  0x43   : > { %260 = vst [vmem:[%s7680_s24 + $0x160] sm:$0xff] %v259_v44  ;;  %v265_v47 = vld [vmem:[%s7675_s10 + $0x4d8] sm:$0xff]  ;;  %262 = vst [vmem:[%s7680_s24 + $0x168] sm:$0xff] %v261_v45  ;;  %v267_v48 = vld [vmem:[%s7675_s10 + $0x4e0] sm:$0xff] }
  0x44   : > { %264 = vst [vmem:[%s7680_s24 + $0x170] sm:$0xff] %v263_v46  ;;  %266 = vst [vmem:[%s7680_s24 + $0x178] sm:$0xff] %v265_v47  ;;  %v269_v49 = vld [vmem:[%s7675_s10 + $0x4e8] sm:$0xff]  ;;  %v271_v50 = vld [vmem:[%s7675_s10 + $0x4f0] sm:$0xff] }
  0x45   : > { %268 = vst [vmem:[%s7680_s24 + $0x180] sm:$0xff] %v267_v48  ;;  %270 = vst [vmem:[%s7680_s24 + $0x188] sm:$0xff] %v269_v49  ;;  %v273_v51 = vld [vmem:[%s7675_s10 + $0x4f8] sm:$0xff]  ;;  %v275_v52 = vld [vmem:[%s7675_s10 + $0x500] sm:$0xff] }
  0x46   : > { %272 = vst [vmem:[%s7680_s24 + $0x190] sm:$0xff] %v271_v50  ;;  %v277_v53 = vld [vmem:[%s7675_s10 + $0x508] sm:$0xff]  ;;  %274 = vst [vmem:[%s7680_s24 + $0x198] sm:$0xff] %v273_v51  ;;  %v279_v54 = vld [vmem:[%s7675_s10 + $0x6c0] sm:$0xff] }
  0x47   : > { %276 = vst [vmem:[%s7680_s24 + $0x1a0] sm:$0xff] %v275_v52  ;;  %278 = vst [vmem:[%s7680_s24 + $0x1a8] sm:$0xff] %v277_v53  ;;  %v281_v55 = vld [vmem:[%s7675_s10 + $0x6c8] sm:$0xff]  ;;  %v283_v56 = vld [vmem:[%s7675_s10 + $0x6d0] sm:$0xff] }
  0x48   : > { %280 = vst [vmem:[%s7680_s24 + $0x1b0] sm:$0xff] %v279_v54  ;;  %282 = vst [vmem:[%s7680_s24 + $0x1b8] sm:$0xff] %v281_v55  ;;  %v285_v57 = vld [vmem:[%s7675_s10 + $0x6d8] sm:$0xff]  ;;  %v287_v58 = vld [vmem:[%s7675_s10 + $0x6e0] sm:$0xff] }
  0x49   : > { %284 = vst [vmem:[%s7680_s24 + $0x1c0] sm:$0xff] %v283_v56  ;;  %v289_v59 = vld [vmem:[%s7675_s10 + $0x6e8] sm:$0xff]  ;;  %286 = vst [vmem:[%s7680_s24 + $0x1c8] sm:$0xff] %v285_v57  ;;  %v291_v60 = vld [vmem:[%s7675_s10 + $0x6f0] sm:$0xff] }
  0x4a   : > { %288 = vst [vmem:[%s7680_s24 + $0x1d0] sm:$0xff] %v287_v58  ;;  %290 = vst [vmem:[%s7680_s24 + $0x1d8] sm:$0xff] %v289_v59  ;;  %v293_v61 = vld [vmem:[%s7675_s10 + $0x6f8] sm:$0xff]  ;;  %v295_v62 = vld [vmem:[%s7675_s10 + $0x700] sm:$0xff] }
  0x4b   : > { %292 = vst [vmem:[%s7680_s24 + $0x1e0] sm:$0xff] %v291_v60  ;;  %294 = vst [vmem:[%s7680_s24 + $0x1e8] sm:$0xff] %v293_v61  ;;  %v297_v63 = vld [vmem:[%s7675_s10 + $0x708] sm:$0xff]  ;;  %v299_v0 = vld [vmem:[%s7675_s10 + $0x710] sm:$0xff] }
  0x4c   : > { %296 = vst [vmem:[%s7680_s24 + $0x1f0] sm:$0xff] %v295_v62  ;;  %v301_v1 = vld [vmem:[%s7675_s10 + $0x718] sm:$0xff]  ;;  %298 = vst [vmem:[%s7680_s24 + $0x1f8] sm:$0xff] %v297_v63  ;;  %v303_v2 = vld [vmem:[%s7675_s10 + $0x720] sm:$0xff] }
  0x4d   : > { %300 = vst [vmem:[%s7680_s24 + $0x200] sm:$0xff] %v299_v0  ;;  %302 = vst [vmem:[%s7680_s24 + $0x208] sm:$0xff] %v301_v1  ;;  %v305_v3 = vld [vmem:[%s7675_s10 + $0x728] sm:$0xff]  ;;  %v307_v4 = vld [vmem:[%s7675_s10 + $0x730] sm:$0xff] }
  0x4e   : > { %304 = vst [vmem:[%s7680_s24 + $0x210] sm:$0xff] %v303_v2  ;;  %306 = vst [vmem:[%s7680_s24 + $0x218] sm:$0xff] %v305_v3  ;;  %v309_v5 = vld [vmem:[%s7675_s10 + $0x738] sm:$0xff]  ;;  %v311_v6 = vld [vmem:[%s7675_s10 + $0x740] sm:$0xff] }
  0x4f   : > { %308 = vst [vmem:[%s7680_s24 + $0x220] sm:$0xff] %v307_v4  ;;  %v313_v7 = vld [vmem:[%s7675_s10 + $0x748] sm:$0xff]  ;;  %310 = vst [vmem:[%s7680_s24 + $0x228] sm:$0xff] %v309_v5 }
  0x50   : > { %312 = vst [vmem:[%s7680_s24 + $0x230] sm:$0xff] %v311_v6  ;;  %314 = vst [vmem:[%s7680_s24 + $0x238] sm:$0xff] %v313_v7 }
  0x51 PF: > { %s321_s29 = sand.u32 1, %s7499_s16   ;;  %s5515_s27 = sshll.u32 %s7523_s22, 1 }
  0x52   : > { %s6324_s28 = smul.u32 4608, %s321_s29  ;;  %s7833_s24 = scalar_lea.sflag [#allocation5], %s321_s29 }
  0x53   : > { %s6181_s30 = smul.u32 2304, %s7519_s21 }
  0x54   : > { %s325_s6 = scalar_lea.vmem [#allocation4], %s6324_s28 }
  0x55   : > { %s332_s5 = sadd.s32 %s6181_s30, %s5515_s27  ;;  %s335_s0 = sshll.u32 %s325_s6, 4  ;;  %s7826_s0 = int_to_ptr.vmem [resolvable:$true] %s335_s0 }
  0x56   : > { %s5517_s26 = sshll.u32 %s332_s5, 6  ;;  %s7405_s30 = scalar_lea.hbm %s8585_s1, 589824 }
  0x57   : > { %s7831_s4 = scalar_lea.hbm %s8585_s1, %s5517_s26 }
  0x58   : > { %s7401_s22 = scalar_lea.hbm %s7831_s4, 73728  ;;  %p7406_p6 = scmp.lt.u32.totalorder %s7831_s4, %s8585_s1 }
  0x59   : > { %p7402_p3 = scmp.ne.s32.totalorder %s7831_s4, %s7401_s22  ;;  %p7407_p7 = scmp.lt.u32.totalorder %s7405_s30, %s7401_s22 }
  0x5a   : > { %p7409_p10 = scmp.lt.u32.totalorder %s7401_s22, %s7831_s4 }
  0x5b   : > { %p7403_p4 = pnand %p7402_p3, %p7642_p9  ;;  %p7408_p8 = por %p7407_p7, %p7406_p6 }
  0x5d   : > { %p7404_p5 = pneg %p7403_p4  ;;  %p7410_p11 = por %p7409_p10, %p7408_p8 }
  0x5f   : > { %p7411_p13 = pnand %p7410_p11, %p7404_p5 }
  0x61   : > { %7414 = shalt.err (!%p7411_p13)
}
  0x62   : > { %s7415_s25 = scalar_lea.vmem %s7826_s0, 73728  ;;  %s7529_s26 = smov [#allocation4]  }
  0x63   : > { %p7416_p0 = scmp.ne.s32.totalorder %s7826_s0, %s7415_s25  ;;  %s7419_s29 = sshll.u32 %s7529_s26, 4  ;;  %s7420_s29 = int_to_ptr.vmem [resolvable:$false] %s7419_s29 }
  0x64   : > { %s7421_s10 = scalar_lea.vmem %s7420_s29, 147456  ;;  %p7422_p4 = scmp.lt.s32.totalorder %s7826_s0, %s7420_s29 }
  0x65   : > { %p7417_p2 = pnand %p7416_p0, %p7642_p9  ;;  %p7423_p1 = scmp.lt.s32.totalorder %s7421_s10, %s7415_s25 }
  0x67   : > { %p7418_p3 = pneg %p7417_p2  ;;  %p7424_p6 = por %p7423_p1, %p7422_p4 }
  0x69   : > { %p7425_p7 = pnand %p7424_p6, %p7418_p3 }
  0x6b   : > { %7428 = shalt.err (!%p7425_p7)
}
  0x6c   : > { %s7530_s22 = smov 256   ;;  %s7531_s27 = smov 128  }
  0x6d   : > { %s7532_s28 = smov 8  }
  0x6e   : > { %6327 = dma.hbm_to_vmem [thread:$0]  (%p7642_p9), %s7831_s4, 73728, %s7826_s0, %s7833_s24, %s7530_s22, %s7531_s27, %s7532_s28  }
  0x6f PF: > { %p5518_p5 = scmp.ge.s32.totalorder %s7527_s23, 1  ;;  %p351_p8 = scmp.lt.s32.totalorder %s7527_s23, 9 }
  0x71   : > { %p352_p10 = pnand %p5518_p5, %p351_p8 }
  0x72   : > { %s358_s30 = sand.u32 (!%p352_p10), 1, %s7503_s17   ;;  %s364_s5 = sand.u32 (!%p352_p10), 1, %s7495_s15  }
  0x73   : > { %355 = sbr.rel (%p352_p10) target bundleno = 963 (0x3c3), region = 51  ;;  %s365_s29 = scalar_lea.sflag (!%p352_p10), [#allocation5], %s364_s5 }
  0x74   : > { %s6325_s6 = smul.u32 (!%p352_p10), 576, %s358_s30 }
  0x75   : > { %s6326_s25 = smul.u32 (!%p352_p10), 4608, %s364_s5 }
  0x76   : > { %s7861_s26 = scalar_lea.vmem (!%p352_p10), [#allocation3], %s6325_s6 }
  0x77   : > { %s7863_s10 = scalar_lea.vmem (!%p352_p10), [#allocation4], %s6326_s25 }
  0x7a   : > { %7478 = dma.done.wait (%p7651_p12), %s365_s29, 73728  }
  0x7b   : > { %7480 = vsyncadd (%p7651_p12), %s365_s29, 4294893568  ;;  %s395_s0 = sand.u32 1, %s7483_s12   ;;  %s5520_s4 = sshll.u32 %s7515_s20, 1 }
  0x7c   : > { %s5519_s7 = sshll.u32 %s395_s0, 5  ;;  %p402_p9 = scmp.lt.s32.totalorder %s5520_s4, 3 }
  0x7d   : > { %s7877_s27 = scalar_lea.vmem [#allocation6], %s5519_s7  ;;  %p5521_p1 = scmp.ne.s32.totalorder %s7511_s19, 0 }
  0x7e   : > { %s8623_s4 = smov (!%p402_p9, %s5520_s4), 3  ;;  %v7533_v8 = vmov (!%p5521_p1), 0.0  }
  0x7f   : > { %s404_s22 = scalar_lea.vmem %s8586_s2, %s8623_s4  ;;  %410 = sbr.rel (%p5521_p1) target bundleno = 134 (0x86), region = 63  ;;  %411 = vst [vmem:[#allocation2] sm:$0xff] (!%p5521_p1), %v7533_v8  ;;  %412 = vst [vmem:[#allocation2 + $0x8] sm:$0xff] (!%p5521_p1), %v7533_v8 }
  0x80   : > { %413 = vst [vmem:[#allocation2 + $0x10] sm:$0xff] (!%p5521_p1), %v7533_v8  ;;  %414 = vst [vmem:[#allocation2 + $0x18] sm:$0xff] (!%p5521_p1), %v7533_v8 }
  0x81   : > { %415 = vst [vmem:[#allocation2 + $0x20] sm:$0xff] (!%p5521_p1), %v7533_v8  ;;  %416 = vst [vmem:[#allocation2 + $0x28] sm:$0xff] (!%p5521_p1), %v7533_v8 }
  0x82   : > { %417 = vst [vmem:[#allocation2 + $0x30] sm:$0xff] (!%p5521_p1), %v7533_v8  ;;  %418 = vst [vmem:[#allocation2 + $0x38] sm:$0xff] (!%p5521_p1), %v7533_v8 }
  0x86 PF: > { %v6429_v9 = vld [vmem:[%s7863_s10 + $0x4] ss:$8 sps:$4 sm:$0xff]   ;;  %v6433_v11 = vld [vmem:[%s7863_s10] ss:$8 sps:$4 sm:$0xff]   ;;  %v6435_v13 = vld [vmem:[%s7863_s10 + $0x14] ss:$8 sps:$4 sm:$0xff]  }
  0x87   : > { %v6431_v10 = vld [vmem:[%s7863_s10 + $0x904] ss:$8 sps:$4 sm:$0xff]   ;;  %4315 = vmatprep.subr.bf16.mxu1 %v6429_v9  ;;  %v6434_v12 = vld [vmem:[%s7863_s10 + $0x900] ss:$8 sps:$4 sm:$0xff]   ;;  %v6437_v14 = vld [vmem:[%s7863_s10 + $0x914] ss:$8 sps:$4 sm:$0xff]  }
  0x88   : > { %4792 = vmatprep.subr.bf16.mxu0 %v6431_v10  ;;  %4316 = vmatpush1.bf16.msra.mxu1 %v6433_v11  ;;  %v6439_v15 = vld [vmem:[%s7863_s10 + $0x10] ss:$8 sps:$4 sm:$0xff]   ;;  %v6441_v17 = vld [vmem:[%s7863_s10 + $0x24] ss:$8 sps:$4 sm:$0xff]   ;;  %v6445_v19 = vld [vmem:[%s7863_s10 + $0x20] ss:$8 sps:$4 sm:$0xff]  }
  0x89   : > { %4793 = vmatpush1.bf16.msra.mxu0 %v6434_v12  ;;  %4317 = vmatprep.subr.bf16.mxu1 %v6435_v13  ;;  %v6440_v16 = vld [vmem:[%s7863_s10 + $0x910] ss:$8 sps:$4 sm:$0xff]   ;;  %v6443_v18 = vld [vmem:[%s7863_s10 + $0x924] ss:$8 sps:$4 sm:$0xff]   ;;  %v6446_v20 = vld [vmem:[%s7863_s10 + $0x920] ss:$8 sps:$4 sm:$0xff]  }
  0x8a   : > { %4794 = vmatprep.subr.bf16.mxu0 %v6437_v14  ;;  %v6447_v21 = vld [vmem:[%s7863_s10 + $0x34] ss:$8 sps:$4 sm:$0xff]   ;;  %v6451_v23 = vld [vmem:[%s7863_s10 + $0x30] ss:$8 sps:$4 sm:$0xff]   ;;  %v6453_v25 = vld [vmem:[%s7863_s10 + $0x44] ss:$8 sps:$4 sm:$0xff]  }
  0x8b   : > { %v6449_v22 = vld [vmem:[%s7863_s10 + $0x934] ss:$8 sps:$4 sm:$0xff]   ;;  %v6452_v24 = vld [vmem:[%s7863_s10 + $0x930] ss:$8 sps:$4 sm:$0xff]   ;;  %v6455_v26 = vld [vmem:[%s7863_s10 + $0x944] ss:$8 sps:$4 sm:$0xff]  }
  0x8c   : > { %4318 = vmatpush1.bf16.msra.mxu1 %v6439_v15  ;;  %v6457_v27 = vld [vmem:[%s7863_s10 + $0x40] ss:$8 sps:$4 sm:$0xff]   ;;  %v6459_v29 = vld [vmem:[%s7863_s10 + $0x54] ss:$8 sps:$4 sm:$0xff]   ;;  %v6463_v31 = vld [vmem:[%s7863_s10 + $0x50] ss:$8 sps:$4 sm:$0xff]  }
  0x8d   : > { %4795 = vmatpush1.bf16.msra.mxu0 %v6440_v16  ;;  %4319 = vmatprep.subr.bf16.mxu1 %v6441_v17  ;;  %v6458_v28 = vld [vmem:[%s7863_s10 + $0x940] ss:$8 sps:$4 sm:$0xff]   ;;  %v6461_v30 = vld [vmem:[%s7863_s10 + $0x954] ss:$8 sps:$4 sm:$0xff]   ;;  %v6464_v32 = vld [vmem:[%s7863_s10 + $0x950] ss:$8 sps:$4 sm:$0xff]  }
  0x8e   : > { %4796 = vmatprep.subr.bf16.mxu0 %v6443_v18  ;;  %v6465_v33 = vld [vmem:[%s7863_s10 + $0x64] ss:$8 sps:$4 sm:$0xff]   ;;  %v6469_v35 = vld [vmem:[%s7863_s10 + $0x60] ss:$8 sps:$4 sm:$0xff]   ;;  %v6471_v37 = vld [vmem:[%s7863_s10 + $0x74] ss:$8 sps:$4 sm:$0xff]  }
  0x8f   : > { %v6467_v34 = vld [vmem:[%s7863_s10 + $0x964] ss:$8 sps:$4 sm:$0xff]   ;;  %v6470_v36 = vld [vmem:[%s7863_s10 + $0x960] ss:$8 sps:$4 sm:$0xff]   ;;  %v6473_v38 = vld [vmem:[%s7863_s10 + $0x974] ss:$8 sps:$4 sm:$0xff]  }
  0x90   : > { %4320 = vmatpush1.bf16.msra.mxu1 %v6445_v19  ;;  %v6475_v39 = vld [vmem:[%s7863_s10 + $0x70] ss:$8 sps:$4 sm:$0xff]   ;;  %v6477_v41 = vld [vmem:[%s7863_s10 + $0x84] ss:$8 sps:$4 sm:$0xff]   ;;  %v6481_v43 = vld [vmem:[%s7863_s10 + $0x80] ss:$8 sps:$4 sm:$0xff]  }
  0x91   : > { %4797 = vmatpush1.bf16.msra.mxu0 %v6446_v20  ;;  %4321 = vmatprep.subr.bf16.mxu1 %v6447_v21  ;;  %v6476_v40 = vld [vmem:[%s7863_s10 + $0x970] ss:$8 sps:$4 sm:$0xff]   ;;  %v6479_v42 = vld [vmem:[%s7863_s10 + $0x984] ss:$8 sps:$4 sm:$0xff]   ;;  %v6482_v44 = vld [vmem:[%s7863_s10 + $0x980] ss:$8 sps:$4 sm:$0xff]  }
  0x92   : > { %4798 = vmatprep.subr.bf16.mxu0 %v6449_v22  ;;  %v6483_v45 = vld [vmem:[%s7863_s10 + $0x94] ss:$8 sps:$4 sm:$0xff]   ;;  %v6487_v47 = vld [vmem:[%s7863_s10 + $0x90] ss:$8 sps:$4 sm:$0xff]   ;;  %v6489_v49 = vld [vmem:[%s7863_s10 + $0xa4] ss:$8 sps:$4 sm:$0xff]  }
  0x93   : > { %v6485_v46 = vld [vmem:[%s7863_s10 + $0x994] ss:$8 sps:$4 sm:$0xff]   ;;  %v6488_v48 = vld [vmem:[%s7863_s10 + $0x990] ss:$8 sps:$4 sm:$0xff]   ;;  %v6491_v50 = vld [vmem:[%s7863_s10 + $0x9a4] ss:$8 sps:$4 sm:$0xff]  }
  0x94   : > { %4322 = vmatpush1.bf16.msra.mxu1 %v6451_v23  ;;  %v6493_v51 = vld [vmem:[%s7863_s10 + $0xa0] ss:$8 sps:$4 sm:$0xff]   ;;  %v6495_v53 = vld [vmem:[%s7863_s10 + $0xb4] ss:$8 sps:$4 sm:$0xff]   ;;  %v6499_v55 = vld [vmem:[%s7863_s10 + $0xb0] ss:$8 sps:$4 sm:$0xff]  }
  0x95   : > { %4799 = vmatpush1.bf16.msra.mxu0 %v6452_v24  ;;  %4323 = vmatprep.subr.bf16.mxu1 %v6453_v25  ;;  %v6494_v52 = vld [vmem:[%s7863_s10 + $0x9a0] ss:$8 sps:$4 sm:$0xff]   ;;  %v6497_v54 = vld [vmem:[%s7863_s10 + $0x9b4] ss:$8 sps:$4 sm:$0xff]   ;;  %v6500_v56 = vld [vmem:[%s7863_s10 + $0x9b0] ss:$8 sps:$4 sm:$0xff]  }
  0x96   : > { %4800 = vmatprep.subr.bf16.mxu0 %v6455_v26  ;;  %v6527_v57 = vld [vmem:[%s7861_s26 + $0x4] ss:$144 sps:$4 sm:$0xff]   ;;  %v6533_v60 = vld [vmem:[%s7861_s26 + $0x4c] ss:$144 sps:$4 sm:$0xff]   ;;  %v6505_v61 = vld [vmem:[%s7863_s10 + $0xc0] ss:$8 sps:$4 sm:$0xff]  }
  0x97   : > { %v6501_v58 = vld [vmem:[%s7863_s10 + $0xc4] ss:$8 sps:$4 sm:$0xff]   ;;  %4347 = vmatprep.mubr.bf16.mxu1 %v6527_v57  ;;  %v6506_v62 = vld [vmem:[%s7863_s10 + $0x9c0] ss:$8 sps:$4 sm:$0xff]   ;;  %v6507_v63 = vld [vmem:[%s7863_s10 + $0xd4] ss:$8 sps:$4 sm:$0xff]   ;;  %4824 = vmatprep.mubr.bf16.mxu0 %v6533_v60 }
  0x98   : > { %4324 = vmatpush1.bf16.msra.mxu1 %v6457_v27  ;;  %v6503_v59 = vld [vmem:[%s7863_s10 + $0x9c4] ss:$8 sps:$4 sm:$0xff]   ;;  %v6509_v0 = vld [vmem:[%s7863_s10 + $0x9d4] ss:$8 sps:$4 sm:$0xff]   ;;  %v6511_v1 = vld [vmem:[%s7863_s10 + $0xd0] ss:$8 sps:$4 sm:$0xff]  }
  0x99   : > { %4801 = vmatpush1.bf16.msra.mxu0 %v6458_v28  ;;  %4325 = vmatprep.subr.bf16.mxu1 %v6459_v29  ;;  %v6512_v2 = vld [vmem:[%s7863_s10 + $0x9d0] ss:$8 sps:$4 sm:$0xff]   ;;  %v6513_v3 = vld [vmem:[%s7863_s10 + $0xe4] ss:$8 sps:$4 sm:$0xff]   ;;  %v6517_v5 = vld [vmem:[%s7863_s10 + $0xe0] ss:$8 sps:$4 sm:$0xff]  }
  0x9a   : > { %4802 = vmatprep.subr.bf16.mxu0 %v6461_v30  ;;  %v6515_v4 = vld [vmem:[%s7863_s10 + $0x9e4] ss:$8 sps:$4 sm:$0xff]   ;;  %v6518_v6 = vld [vmem:[%s7863_s10 + $0x9e0] ss:$8 sps:$4 sm:$0xff]   ;;  %v6519_v7 = vld [vmem:[%s7863_s10 + $0xf4] ss:$8 sps:$4 sm:$0xff]  }
  0x9b   : > { %v6521_v8 = vld [vmem:[%s7863_s10 + $0x9f4] ss:$8 sps:$4 sm:$0xff]   ;;  %v6523_v9 = vld [vmem:[%s7863_s10 + $0xf0] ss:$8 sps:$4 sm:$0xff]   ;;  %v6530_v11 = vld [vmem:[%s7863_s10 + $0x104] ss:$8 sps:$4 sm:$0xff]  }
  0x9c   : > { %4326 = vmatpush1.bf16.msra.mxu1 %v6463_v31  ;;  %v6524_v10 = vld [vmem:[%s7863_s10 + $0x9f0] ss:$8 sps:$4 sm:$0xff]   ;;  %v6536_v12 = vld [vmem:[%s7863_s10 + $0xa04] ss:$8 sps:$4 sm:$0xff]   ;;  %v6528_v14 = vld [vmem:[%s7863_s10 + $0x100] ss:$8 sps:$4 sm:$0xff]  }
  0x9d   : > { %4803 = vmatpush1.bf16.msra.mxu0 %v6464_v32  ;;  %4327 = vmatprep.subr.bf16.mxu1 %v6465_v33  ;;  %v6525_v13 = vld [vmem:[%s7861_s26] ss:$144 sps:$4 sm:$0xff]   ;;  %v6531_v15 = vld [vmem:[%s7861_s26 + $0x48] ss:$144 sps:$4 sm:$0xff]   ;;  %v6539_v17 = vld [vmem:[%s7863_s10 + $0x114] ss:$8 sps:$4 sm:$0xff]  }
  0x9e   : > { %4804 = vmatprep.subr.bf16.mxu0 %v6467_v34  ;;  %v6534_v16 = vld [vmem:[%s7863_s10 + $0xa00] ss:$8 sps:$4 sm:$0xff]   ;;  %v6542_v18 = vld [vmem:[%s7863_s10 + $0xa14] ss:$8 sps:$4 sm:$0xff]   ;;  %v6537_v19 = vld [vmem:[%s7863_s10 + $0x110] ss:$8 sps:$4 sm:$0xff]  }
  0x9f   : > { %v6540_v20 = vld [vmem:[%s7863_s10 + $0xa10] ss:$8 sps:$4 sm:$0xff]   ;;  %v6545_v21 = vld [vmem:[%s7863_s10 + $0x124] ss:$8 sps:$4 sm:$0xff]   ;;  %v6543_v23 = vld [vmem:[%s7863_s10 + $0x120] ss:$8 sps:$4 sm:$0xff]  }
  0xa0   : > { %4328 = vmatpush1.bf16.msra.mxu1 %v6469_v35  ;;  %v6548_v22 = vld [vmem:[%s7863_s10 + $0xa24] ss:$8 sps:$4 sm:$0xff]   ;;  %v6546_v24 = vld [vmem:[%s7863_s10 + $0xa20] ss:$8 sps:$4 sm:$0xff]   ;;  %v6551_v25 = vld [vmem:[%s7863_s10 + $0x134] ss:$8 sps:$4 sm:$0xff]  }
  0xa1   : > { %4805 = vmatpush1.bf16.msra.mxu0 %v6470_v36  ;;  %4329 = vmatprep.subr.bf16.mxu1 %v6471_v37  ;;  %v6554_v26 = vld [vmem:[%s7863_s10 + $0xa34] ss:$8 sps:$4 sm:$0xff]   ;;  %v6549_v27 = vld [vmem:[%s7863_s10 + $0x130] ss:$8 sps:$4 sm:$0xff]   ;;  %v6557_v29 = vld [vmem:[%s7863_s10 + $0x144] ss:$8 sps:$4 sm:$0xff]  }
  0xa2   : > { %4806 = vmatprep.subr.bf16.mxu0 %v6473_v38  ;;  %v6552_v28 = vld [vmem:[%s7863_s10 + $0xa30] ss:$8 sps:$4 sm:$0xff]   ;;  %v6560_v30 = vld [vmem:[%s7863_s10 + $0xa44] ss:$8 sps:$4 sm:$0xff]   ;;  %v6555_v31 = vld [vmem:[%s7863_s10 + $0x140] ss:$8 sps:$4 sm:$0xff]  }
  0xa3   : > { %v6558_v32 = vld [vmem:[%s7863_s10 + $0xa40] ss:$8 sps:$4 sm:$0xff]   ;;  %v6563_v33 = vld [vmem:[%s7863_s10 + $0x154] ss:$8 sps:$4 sm:$0xff]   ;;  %v6561_v35 = vld [vmem:[%s7863_s10 + $0x150] ss:$8 sps:$4 sm:$0xff]  }
  0xa4   : > { %4330 = vmatpush1.bf16.msra.mxu1 %v6475_v39  ;;  %v6566_v34 = vld [vmem:[%s7863_s10 + $0xa54] ss:$8 sps:$4 sm:$0xff]   ;;  %v6564_v36 = vld [vmem:[%s7863_s10 + $0xa50] ss:$8 sps:$4 sm:$0xff]   ;;  %v6569_v38 = vld [vmem:[%s7863_s10 + $0x164] ss:$8 sps:$4 sm:$0xff]  }
  0xa5   : > { %4807 = vmatpush1.bf16.msra.mxu0 %v6476_v40  ;;  %4331 = vmatprep.subr.bf16.mxu1 %v6477_v41  ;;  %v6615_v37 = vld [vmem:[%s7861_s26 + $0x124] ss:$144 sps:$4 sm:$0xff]   ;;  %v6620_v40 = vld [vmem:[%s7861_s26 + $0x16c] ss:$144 sps:$4 sm:$0xff]   ;;  %v6567_v41 = vld [vmem:[%s7863_s10 + $0x160] ss:$8 sps:$4 sm:$0xff]  }
  0xa6   : > { %4808 = vmatprep.subr.bf16.mxu0 %v6479_v42  ;;  %v6572_v39 = vld [vmem:[%s7863_s10 + $0xa64] ss:$8 sps:$4 sm:$0xff]   ;;  %v6570_v42 = vld [vmem:[%s7863_s10 + $0xa60] ss:$8 sps:$4 sm:$0xff]   ;;  %v6585_v57 = vld [vmem:[%s7863_s10 + $0x190] ss:$8 sps:$4 sm:$0xff]  }
  0xa7   : > { %v6596_v60 = vld [vmem:[%s7863_s10 + $0xaa4] ss:$8 sps:$4 sm:$0xff]   ;;  %p6170_p12 = scmp.ne.s32.totalorder %s7511_s19, 3 }
  0xa8   : > { %4332 = vmatpush1.bf16.msra.mxu1 %v6481_v43  ;;  %v6625_v43 = vld [vmem:[%s7861_s26 + $0x120] ss:$144 sps:$4 sm:$0xff]  }
  0xa9   : > { %4809 = vmatpush1.bf16.msra.mxu0 %v6482_v44  ;;  %4333 = vmatprep.subr.bf16.mxu1 %v6483_v45  ;;  %v6626_v44 = vld [vmem:[%s7861_s26 + $0x168] ss:$144 sps:$4 sm:$0xff]   ;;  %v6575_v45 = vld [vmem:[%s7863_s10 + $0x174] ss:$8 sps:$4 sm:$0xff]  }
  0xaa   : > { %4810 = vmatprep.subr.bf16.mxu0 %v6485_v46  ;;  %v6578_v46 = vld [vmem:[%s7863_s10 + $0xa74] ss:$8 sps:$4 sm:$0xff]  }
  0xac   : > { %4334 = vmatpush1.bf16.msra.mxu1 %v6487_v47  ;;  %v6573_v47 = vld [vmem:[%s7863_s10 + $0x170] ss:$8 sps:$4 sm:$0xff]  }
  0xad   : > { %4811 = vmatpush1.bf16.msra.mxu0 %v6488_v48  ;;  %4335 = vmatprep.subr.bf16.mxu1 %v6489_v49  ;;  %v6576_v48 = vld [vmem:[%s7863_s10 + $0xa70] ss:$8 sps:$4 sm:$0xff]   ;;  %v6635_v49 = vld [vmem:[%s7861_s26 + $0xc] ss:$144 sps:$4 sm:$0xff]  }
  0xae   : > { %4812 = vmatprep.subr.bf16.mxu0 %v6491_v50  ;;  %v6581_v50 = vld [vmem:[%s7863_s10 + $0x184] ss:$8 sps:$4 sm:$0xff]  }
  0xb0   : > { %4336 = vmatpush1.bf16.msra.mxu1 %v6493_v51  ;;  %v6584_v51 = vld [vmem:[%s7863_s10 + $0xa84] ss:$8 sps:$4 sm:$0xff]  }
  0xb1   : > { %4813 = vmatpush1.bf16.msra.mxu0 %v6494_v52  ;;  %4337 = vmatprep.subr.bf16.mxu1 %v6495_v53  ;;  %v6641_v52 = vld [vmem:[%s7861_s26 + $0x54] ss:$144 sps:$4 sm:$0xff]   ;;  %v6579_v53 = vld [vmem:[%s7863_s10 + $0x180] ss:$8 sps:$4 sm:$0xff]  }
  0xb2   : > { %4814 = vmatprep.subr.bf16.mxu0 %v6497_v54  ;;  %v6582_v54 = vld [vmem:[%s7863_s10 + $0xa80] ss:$8 sps:$4 sm:$0xff]  }
  0xb4   : > { %4338 = vmatpush1.bf16.msra.mxu1 %v6499_v55  ;;  %v6587_v55 = vld [vmem:[%s7863_s10 + $0x194] ss:$8 sps:$4 sm:$0xff]  }
  0xb5   : > { %4815 = vmatpush1.bf16.msra.mxu0 %v6500_v56  ;;  %4339 = vmatprep.subr.bf16.mxu1 %v6501_v58  ;;  %v6590_v56 = vld [vmem:[%s7863_s10 + $0xa94] ss:$8 sps:$4 sm:$0xff]   ;;  %v6588_v58 = vld [vmem:[%s7863_s10 + $0xa90] ss:$8 sps:$4 sm:$0xff]  }
  0xb6   : > { %4816 = vmatprep.subr.bf16.mxu0 %v6503_v59  ;;  %v6593_v59 = vld [vmem:[%s7863_s10 + $0x1a4] ss:$8 sps:$4 sm:$0xff]  }
  0xb8   : > { %4340 = vmatpush1.bf16.msra.mxu1 %v6505_v61  ;;  %v6591_v61 = vld [vmem:[%s7863_s10 + $0x1a0] ss:$8 sps:$4 sm:$0xff]  }
  0xb9   : > { %4817 = vmatpush1.bf16.msra.mxu0 %v6506_v62  ;;  %4341 = vmatprep.subr.bf16.mxu1 %v6507_v63  ;;  %v6594_v62 = vld [vmem:[%s7863_s10 + $0xaa0] ss:$8 sps:$4 sm:$0xff]   ;;  %v6599_v63 = vld [vmem:[%s7863_s10 + $0x1b4] ss:$8 sps:$4 sm:$0xff]  }
  0xba   : > { %4818 = vmatprep.subr.bf16.mxu0 %v6509_v0  ;;  %v6602_v0 = vld [vmem:[%s7863_s10 + $0xab4] ss:$8 sps:$4 sm:$0xff]  }
  0xbc   : > { %4342 = vmatpush1.bf16.msra.mxu1 %v6511_v1  ;;  %v6597_v1 = vld [vmem:[%s7863_s10 + $0x1b0] ss:$8 sps:$4 sm:$0xff]  }
  0xbd   : > { %4819 = vmatpush1.bf16.msra.mxu0 %v6512_v2  ;;  %4343 = vmatprep.subr.bf16.mxu1 %v6513_v3  ;;  %v6600_v2 = vld [vmem:[%s7863_s10 + $0xab0] ss:$8 sps:$4 sm:$0xff]   ;;  %v6605_v3 = vld [vmem:[%s7863_s10 + $0x1c4] ss:$8 sps:$4 sm:$0xff]  }
  0xbe   : > { %4820 = vmatprep.subr.bf16.mxu0 %v6515_v4  ;;  %v6608_v4 = vld [vmem:[%s7863_s10 + $0xac4] ss:$8 sps:$4 sm:$0xff]  }
  0xc0   : > { %4344 = vmatpush1.bf16.msra.mxu1 %v6517_v5  ;;  %v6603_v5 = vld [vmem:[%s7863_s10 + $0x1c0] ss:$8 sps:$4 sm:$0xff]  }
  0xc1   : > { %4821 = vmatpush1.bf16.msra.mxu0 %v6518_v6  ;;  %4345 = vmatprep.subr.bf16.mxu1 %v6519_v7  ;;  %v6606_v6 = vld [vmem:[%s7863_s10 + $0xac0] ss:$8 sps:$4 sm:$0xff]   ;;  %v6611_v7 = vld [vmem:[%s7863_s10 + $0x1d4] ss:$8 sps:$4 sm:$0xff]  }
  0xc2   : > { %4822 = vmatprep.subr.bf16.mxu0 %v6521_v8  ;;  %v6614_v8 = vld [vmem:[%s7863_s10 + $0xad4] ss:$8 sps:$4 sm:$0xff]  }
  0xc4   : > { %4346 = vmatpush1.bf16.msra.mxu1 %v6523_v9  ;;  %v6609_v9 = vld [vmem:[%s7863_s10 + $0x1d0] ss:$8 sps:$4 sm:$0xff]  }
  0xc5   : > { %4823 = vmatpush1.bf16.msra.mxu0 %v6524_v10  ;;  %4368 = vmatprep.subr.bf16.mxu1 %v6530_v11  ;;  %v6612_v10 = vld [vmem:[%s7863_s10 + $0xad0] ss:$8 sps:$4 sm:$0xff]   ;;  %v6619_v11 = vld [vmem:[%s7863_s10 + $0x1e4] ss:$8 sps:$4 sm:$0xff]  }
  0xc6   : > { %4845 = vmatprep.subr.bf16.mxu0 %v6536_v12  ;;  %v6624_v12 = vld [vmem:[%s7863_s10 + $0xae4] ss:$8 sps:$4 sm:$0xff]  }
  0xc7   : > { %4348 = vmatmul.mubr.bf16.vlgmr.msra.gmra.mrb[0].mxu1 %v6525_v13  ;;  %v6617_v13 = vld [vmem:[%s7863_s10 + $0x1e0] ss:$8 sps:$4 sm:$0xff]  }
  0xc8   : > { %4825 = vmatmul.mubr.bf16.vlgmr.msra.gmra.mrb[0].mxu0 %v6531_v15  ;;  %4369 = vmatpush1.bf16.msra.mxu1 %v6528_v14  ;;  %v6622_v14 = vld [vmem:[%s7863_s10 + $0xae0] ss:$8 sps:$4 sm:$0xff]   ;;  %v6629_v15 = vld [vmem:[%s7863_s10 + $0x1f4] ss:$8 sps:$4 sm:$0xff]  }
  0xc9   : > { %4846 = vmatpush1.bf16.msra.mxu0 %v6534_v16  ;;  %4370 = vmatprep.subr.bf16.mxu1 %v6539_v17  ;;  %v6632_v16 = vld [vmem:[%s7863_s10 + $0xaf4] ss:$8 sps:$4 sm:$0xff]   ;;  %v6627_v17 = vld [vmem:[%s7863_s10 + $0x1f0] ss:$8 sps:$4 sm:$0xff]  }
  0xca   : > { %4847 = vmatprep.subr.bf16.mxu0 %v6542_v18  ;;  %4357 = vmatprep.mubr.bf16.mxu1 %v6615_v37  ;;  %v6630_v18 = vld [vmem:[%s7863_s10 + $0xaf0] ss:$8 sps:$4 sm:$0xff]   ;;  %v6659_v37 = vld [vmem:[%s7863_s10 + $0x234] ss:$8 sps:$4 sm:$0xff]  }
  0xcb   : > { %4834 = vmatprep.mubr.bf16.mxu0 %v6620_v40  ;;  %v6660_v40 = vld [vmem:[%s7863_s10 + $0xb30] ss:$8 sps:$4 sm:$0xff]  }
  0xcc   : > { %4371 = vmatpush1.bf16.msra.mxu1 %v6537_v19  ;;  %v6638_v19 = vld [vmem:[%s7863_s10 + $0x204] ss:$8 sps:$4 sm:$0xff]  }
  0xcd   : > { %4848 = vmatpush1.bf16.msra.mxu0 %v6540_v20  ;;  %4372 = vmatprep.subr.bf16.mxu1 %v6545_v21  ;;  %v6644_v20 = vld [vmem:[%s7863_s10 + $0xb04] ss:$8 sps:$4 sm:$0xff]   ;;  %v6633_v21 = vld [vmem:[%s7861_s26 + $0x8] ss:$144 sps:$4 sm:$0xff]  }
  0xce   : > { %4849 = vmatprep.subr.bf16.mxu0 %v6548_v22  ;;  %v6636_v22 = vld [vmem:[%s7863_s10 + $0x200] ss:$8 sps:$4 sm:$0xff]  }
  0xcf   : > { %4358 = vmatmul.mubr.bf16.gmra.mrb[4].mxu1 %v6625_v43  ;;  %v6668_v43 = vld [vmem:[%s7863_s10 + $0xb44] ss:$8 sps:$4 sm:$0xff]  }
  0xd0   : > { %4373 = vmatpush1.bf16.msra.mxu1 %v6543_v23  ;;  %4835 = vmatmul.mubr.bf16.gmra.mrb[4].mxu0 %v6626_v44  ;;  %v6639_v23 = vld [vmem:[%s7861_s26 + $0x50] ss:$144 sps:$4 sm:$0xff]   ;;  %v6749_v44 = vld [vmem:[%s7861_s26 + $0x5c] ss:$144 sps:$4 sm:$0xff]  }
  0xd1   : > { %4850 = vmatpush1.bf16.msra.mxu0 %v6546_v24  ;;  %4374 = vmatprep.subr.bf16.mxu1 %v6551_v25  ;;  %v6642_v24 = vld [vmem:[%s7863_s10 + $0xb00] ss:$8 sps:$4 sm:$0xff]   ;;  %v6647_v25 = vld [vmem:[%s7863_s10 + $0x214] ss:$8 sps:$4 sm:$0xff]  }
  0xd2   : > { %4851 = vmatprep.subr.bf16.mxu0 %v6554_v26  ;;  %4400 = vmatprep.mubr.bf16.mxu1 %v6635_v49  ;;  %v6650_v26 = vld [vmem:[%s7863_s10 + $0xb14] ss:$8 sps:$4 sm:$0xff]   ;;  %v6669_v49 = vld [vmem:[%s7863_s10 + $0x250] ss:$8 sps:$4 sm:$0xff]  }
  0xd3   : > { %4877 = vmatprep.mubr.bf16.mxu0 %v6641_v52  ;;  %v6680_v52 = vld [vmem:[%s7863_s10 + $0xb64] ss:$8 sps:$4 sm:$0xff]  }
  0xd4   : > { %4375 = vmatpush1.bf16.msra.mxu1 %v6549_v27  ;;  %v6645_v27 = vld [vmem:[%s7863_s10 + $0x210] ss:$8 sps:$4 sm:$0xff]  }
  0xd5   : > { %4852 = vmatpush1.bf16.msra.mxu0 %v6552_v28  ;;  %4376 = vmatprep.subr.bf16.mxu1 %v6557_v29  ;;  %v6648_v28 = vld [vmem:[%s7863_s10 + $0xb10] ss:$8 sps:$4 sm:$0xff]   ;;  %v6723_v29 = vld [vmem:[%s7861_s26 + $0x12c] ss:$144 sps:$4 sm:$0xff]  }
  0xd6   : > { %4853 = vmatprep.subr.bf16.mxu0 %v6560_v30  ;;  %v6653_v30 = vld [vmem:[%s7863_s10 + $0x224] ss:$8 sps:$4 sm:$0xff]  }
  0xd8   : > { %4377 = vmatpush1.bf16.msra.mxu1 %v6555_v31  ;;  %v6656_v31 = vld [vmem:[%s7863_s10 + $0xb24] ss:$8 sps:$4 sm:$0xff]  }
  0xd9   : > { %4854 = vmatpush1.bf16.msra.mxu0 %v6558_v32  ;;  %4378 = vmatprep.subr.bf16.mxu1 %v6563_v33  ;;  %v6728_v32 = vld [vmem:[%s7861_s26 + $0x174] ss:$144 sps:$4 sm:$0xff]   ;;  %v6651_v33 = vld [vmem:[%s7863_s10 + $0x220] ss:$8 sps:$4 sm:$0xff]  }
  0xda   : > { %4855 = vmatprep.subr.bf16.mxu0 %v6566_v34  ;;  %v6654_v34 = vld [vmem:[%s7863_s10 + $0xb20] ss:$8 sps:$4 sm:$0xff]  }
  0xdc   : > { %4379 = vmatpush1.bf16.msra.mxu1 %v6561_v35  ;;  %v6733_v35 = vld [vmem:[%s7861_s26 + $0x128] ss:$144 sps:$4 sm:$0xff]  }
  0xdd   : > { %4856 = vmatpush1.bf16.msra.mxu0 %v6564_v36  ;;  %4380 = vmatprep.subr.bf16.mxu1 %v6569_v38  ;;  %v6734_v36 = vld [vmem:[%s7861_s26 + $0x170] ss:$144 sps:$4 sm:$0xff]   ;;  %v6662_v38 = vld [vmem:[%s7863_s10 + $0xb34] ss:$8 sps:$4 sm:$0xff]  }
  0xde   : > { %4857 = vmatprep.subr.bf16.mxu0 %v6572_v39  ;;  %v6657_v39 = vld [vmem:[%s7863_s10 + $0x230] ss:$8 sps:$4 sm:$0xff]  }
  0xe0   : > { %4381 = vmatpush1.bf16.msra.mxu1 %v6567_v41  ;;  %v6743_v41 = vld [vmem:[%s7861_s26 + $0x14] ss:$144 sps:$4 sm:$0xff]  }
  0xe1   : > { %4858 = vmatpush1.bf16.msra.mxu0 %v6570_v42  ;;  %4382 = vmatprep.subr.bf16.mxu1 %v6575_v45  ;;  %v6665_v42 = vld [vmem:[%s7863_s10 + $0x244] ss:$8 sps:$4 sm:$0xff]   ;;  %v6663_v45 = vld [vmem:[%s7863_s10 + $0x240] ss:$8 sps:$4 sm:$0xff]  }
  0xe2   : > { %4859 = vmatprep.subr.bf16.mxu0 %v6578_v46  ;;  %v6666_v46 = vld [vmem:[%s7863_s10 + $0xb40] ss:$8 sps:$4 sm:$0xff]  }
  0xe4   : > { %4383 = vmatpush1.bf16.msra.mxu1 %v6573_v47  ;;  %v6671_v47 = vld [vmem:[%s7863_s10 + $0x254] ss:$8 sps:$4 sm:$0xff]  }
  0xe5   : > { %4860 = vmatpush1.bf16.msra.mxu0 %v6576_v48  ;;  %4384 = vmatprep.subr.bf16.mxu1 %v6581_v50  ;;  %v6674_v48 = vld [vmem:[%s7863_s10 + $0xb54] ss:$8 sps:$4 sm:$0xff]   ;;  %v6672_v50 = vld [vmem:[%s7863_s10 + $0xb50] ss:$8 sps:$4 sm:$0xff]  }
  0xe6   : > { %4861 = vmatprep.subr.bf16.mxu0 %v6584_v51  ;;  %v6677_v51 = vld [vmem:[%s7863_s10 + $0x264] ss:$8 sps:$4 sm:$0xff]  }
  0xe8   : > { %4385 = vmatpush1.bf16.msra.mxu1 %v6579_v53  ;;  %v6675_v53 = vld [vmem:[%s7863_s10 + $0x260] ss:$8 sps:$4 sm:$0xff]  }
  0xe9   : > { %4862 = vmatpush1.bf16.msra.mxu0 %v6582_v54  ;;  %4386 = vmatprep.subr.bf16.mxu1 %v6587_v55  ;;  %v6678_v54 = vld [vmem:[%s7863_s10 + $0xb60] ss:$8 sps:$4 sm:$0xff]   ;;  %v6683_v55 = vld [vmem:[%s7863_s10 + $0x274] ss:$8 sps:$4 sm:$0xff]  }
  0xea   : > { %4863 = vmatprep.subr.bf16.mxu0 %v6590_v56  ;;  %v6686_v56 = vld [vmem:[%s7863_s10 + $0xb74] ss:$8 sps:$4 sm:$0xff]  }
  0xec   : > { %4387 = vmatpush1.bf16.msra.mxu1 %v6585_v57  ;;  %v6681_v57 = vld [vmem:[%s7863_s10 + $0x270] ss:$8 sps:$4 sm:$0xff]  }
  0xed   : > { %4864 = vmatpush1.bf16.msra.mxu0 %v6588_v58  ;;  %4388 = vmatprep.subr.bf16.mxu1 %v6593_v59  ;;  %v6684_v58 = vld [vmem:[%s7863_s10 + $0xb70] ss:$8 sps:$4 sm:$0xff]   ;;  %v6689_v59 = vld [vmem:[%s7863_s10 + $0x284] ss:$8 sps:$4 sm:$0xff]  }
  0xee   : > { %4865 = vmatprep.subr.bf16.mxu0 %v6596_v60  ;;  %v6692_v60 = vld [vmem:[%s7863_s10 + $0xb84] ss:$8 sps:$4 sm:$0xff]  }
  0xf0   : > { %4389 = vmatpush1.bf16.msra.mxu1 %v6591_v61  ;;  %v6687_v61 = vld [vmem:[%s7863_s10 + $0x280] ss:$8 sps:$4 sm:$0xff]  }
  0xf1   : > { %4866 = vmatpush1.bf16.msra.mxu0 %v6594_v62  ;;  %4390 = vmatprep.subr.bf16.mxu1 %v6599_v63  ;;  %v6690_v62 = vld [vmem:[%s7863_s10 + $0xb80] ss:$8 sps:$4 sm:$0xff]   ;;  %v6695_v63 = vld [vmem:[%s7863_s10 + $0x294] ss:$8 sps:$4 sm:$0xff]  }
  0xf2   : > { %4867 = vmatprep.subr.bf16.mxu0 %v6602_v0  ;;  %v6698_v0 = vld [vmem:[%s7863_s10 + $0xb94] ss:$8 sps:$4 sm:$0xff]  }
  0xf4   : > { %4391 = vmatpush1.bf16.msra.mxu1 %v6597_v1  ;;  %v6693_v1 = vld [vmem:[%s7863_s10 + $0x290] ss:$8 sps:$4 sm:$0xff]  }
  0xf5   : > { %4868 = vmatpush1.bf16.msra.mxu0 %v6600_v2  ;;  %4392 = vmatprep.subr.bf16.mxu1 %v6605_v3  ;;  %v6696_v2 = vld [vmem:[%s7863_s10 + $0xb90] ss:$8 sps:$4 sm:$0xff]   ;;  %v6701_v3 = vld [vmem:[%s7863_s10 + $0x2a4] ss:$8 sps:$4 sm:$0xff]  }
  0xf6   : > { %4869 = vmatprep.subr.bf16.mxu0 %v6608_v4  ;;  %v6704_v4 = vld [vmem:[%s7863_s10 + $0xba4] ss:$8 sps:$4 sm:$0xff]  }
  0xf8   : > { %4393 = vmatpush1.bf16.msra.mxu1 %v6603_v5  ;;  %v6699_v5 = vld [vmem:[%s7863_s10 + $0x2a0] ss:$8 sps:$4 sm:$0xff]  }
  0xf9   : > { %4870 = vmatpush1.bf16.msra.mxu0 %v6606_v6  ;;  %4394 = vmatprep.subr.bf16.mxu1 %v6611_v7  ;;  %v6702_v6 = vld [vmem:[%s7863_s10 + $0xba0] ss:$8 sps:$4 sm:$0xff]   ;;  %v6707_v7 = vld [vmem:[%s7863_s10 + $0x2b4] ss:$8 sps:$4 sm:$0xff]  }
  0xfa   : > { %4871 = vmatprep.subr.bf16.mxu0 %v6614_v8  ;;  %v6710_v8 = vld [vmem:[%s7863_s10 + $0xbb4] ss:$8 sps:$4 sm:$0xff]  }
  0xfc   : > { %4395 = vmatpush1.bf16.msra.mxu1 %v6609_v9  ;;  %v6705_v9 = vld [vmem:[%s7863_s10 + $0x2b0] ss:$8 sps:$4 sm:$0xff]  }
  0xfd   : > { %4872 = vmatpush1.bf16.msra.mxu0 %v6612_v10  ;;  %4396 = vmatprep.subr.bf16.mxu1 %v6619_v11  ;;  %v6708_v10 = vld [vmem:[%s7863_s10 + $0xbb0] ss:$8 sps:$4 sm:$0xff]   ;;  %v6713_v11 = vld [vmem:[%s7863_s10 + $0x2c4] ss:$8 sps:$4 sm:$0xff]  }
  0xfe   : > { %4873 = vmatprep.subr.bf16.mxu0 %v6624_v12  ;;  %v6716_v12 = vld [vmem:[%s7863_s10 + $0xbc4] ss:$8 sps:$4 sm:$0xff]  }
 0x100   : > { %4397 = vmatpush1.bf16.msra.mxu1 %v6617_v13  ;;  %v6711_v13 = vld [vmem:[%s7863_s10 + $0x2c0] ss:$8 sps:$4 sm:$0xff]  }
 0x101   : > { %4874 = vmatpush1.bf16.msra.mxu0 %v6622_v14  ;;  %4398 = vmatprep.subr.bf16.mxu1 %v6629_v15  ;;  %v6714_v14 = vld [vmem:[%s7863_s10 + $0xbc0] ss:$8 sps:$4 sm:$0xff]   ;;  %v6719_v15 = vld [vmem:[%s7863_s10 + $0x2d4] ss:$8 sps:$4 sm:$0xff]  }
 0x102   : > { %4875 = vmatprep.subr.bf16.mxu0 %v6632_v16  ;;  %v6722_v16 = vld [vmem:[%s7863_s10 + $0xbd4] ss:$8 sps:$4 sm:$0xff]  }
 0x104   : > { %4399 = vmatpush1.bf16.msra.mxu1 %v6627_v17  ;;  %v6717_v17 = vld [vmem:[%s7863_s10 + $0x2d0] ss:$8 sps:$4 sm:$0xff]  }
 0x105   : > { %4876 = vmatpush1.bf16.msra.mxu0 %v6630_v18  ;;  %4421 = vmatprep.subr.bf16.mxu1 %v6638_v19  ;;  %v6720_v18 = vld [vmem:[%s7863_s10 + $0xbd0] ss:$8 sps:$4 sm:$0xff]   ;;  %v6727_v19 = vld [vmem:[%s7863_s10 + $0x2e4] ss:$8 sps:$4 sm:$0xff]  }
 0x106   : > { %4898 = vmatprep.subr.bf16.mxu0 %v6644_v20  ;;  %v6732_v20 = vld [vmem:[%s7863_s10 + $0xbe4] ss:$8 sps:$4 sm:$0xff]  }
 0x107   : > { %4401 = vmatmul.mubr.bf16.vlgmr.msra.gmra.mrb[0].mxu1 %v6633_v21  ;;  %v6725_v21 = vld [vmem:[%s7863_s10 + $0x2e0] ss:$8 sps:$4 sm:$0xff]  }
 0x108   : > { %4878 = vmatmul.mubr.bf16.vlgmr.msra.gmra.mrb[0].mxu0 %v6639_v23  ;;  %4422 = vmatpush1.bf16.msra.mxu1 %v6636_v22  ;;  %v6730_v22 = vld [vmem:[%s7863_s10 + $0xbe0] ss:$8 sps:$4 sm:$0xff]   ;;  %v6737_v23 = vld [vmem:[%s7863_s10 + $0x2f4] ss:$8 sps:$4 sm:$0xff]  }
 0x109   : > { %4899 = vmatpush1.bf16.msra.mxu0 %v6642_v24  ;;  %4423 = vmatprep.subr.bf16.mxu1 %v6647_v25  ;;  %v6740_v24 = vld [vmem:[%s7863_s10 + $0xbf4] ss:$8 sps:$4 sm:$0xff]   ;;  %v6735_v25 = vld [vmem:[%s7863_s10 + $0x2f0] ss:$8 sps:$4 sm:$0xff]  }
 0x10a   : > { %4900 = vmatprep.subr.bf16.mxu0 %v6650_v26  ;;  %4410 = vmatprep.mubr.bf16.mxu1 %v6723_v29  ;;  %v6738_v26 = vld [vmem:[%s7863_s10 + $0xbf0] ss:$8 sps:$4 sm:$0xff]  }
 0x10b   : > { %4887 = vmatprep.mubr.bf16.mxu0 %v6728_v32  ;;  %v6741_v29 = vld [vmem:[%s7861_s26 + $0x10] ss:$144 sps:$4 sm:$0xff]  }
 0x10c   : > { %4424 = vmatpush1.bf16.msra.mxu1 %v6645_v27  ;;  %v6746_v27 = vld [vmem:[%s7863_s10 + $0x304] ss:$8 sps:$4 sm:$0xff]   ;;  %v6750_v32 = vld [vmem:[%s7863_s10 + $0xc00] ss:$8 sps:$4 sm:$0xff]  }
 0x10d   : > { %4901 = vmatpush1.bf16.msra.mxu0 %v6648_v28  ;;  %4425 = vmatprep.subr.bf16.mxu1 %v6653_v30  ;;  %v6752_v28 = vld [vmem:[%s7863_s10 + $0xc04] ss:$8 sps:$4 sm:$0xff]   ;;  %v6744_v30 = vld [vmem:[%s7863_s10 + $0x300] ss:$8 sps:$4 sm:$0xff]  }
 0x10e   : > { %4902 = vmatprep.subr.bf16.mxu0 %v6656_v31  ;;  %v6747_v31 = vld [vmem:[%s7861_s26 + $0x58] ss:$144 sps:$4 sm:$0xff]  }
 0x10f   : > { %4411 = vmatmul.mubr.bf16.gmra.mrb[4].mxu1 %v6733_v35  ;;  %v6831_v35 = vld [vmem:[%s7861_s26 + $0x134] ss:$144 sps:$4 sm:$0xff]  }
 0x110   : > { %4888 = vmatmul.mubr.bf16.gmra.mrb[4].mxu0 %v6734_v36  ;;  %4426 = vmatpush1.bf16.msra.mxu1 %v6651_v33  ;;  %v6755_v33 = vld [vmem:[%s7863_s10 + $0x314] ss:$8 sps:$4 sm:$0xff]  }
 0x111   : > { %4903 = vmatpush1.bf16.msra.mxu0 %v6654_v34  ;;  %4427 = vmatprep.subr.bf16.mxu1 %v6659_v37  ;;  %v6758_v34 = vld [vmem:[%s7863_s10 + $0xc14] ss:$8 sps:$4 sm:$0xff]   ;;  %v6753_v37 = vld [vmem:[%s7863_s10 + $0x310] ss:$8 sps:$4 sm:$0xff]  }
 0x112   : > { %4904 = vmatprep.subr.bf16.mxu0 %v6662_v38  ;;  %4453 = vmatprep.mubr.bf16.mxu1 %v6743_v41  ;;  %v6836_v36 = vld [vmem:[%s7861_s26 + $0x17c] ss:$144 sps:$4 sm:$0xff]   ;;  %v6756_v38 = vld [vmem:[%s7863_s10 + $0xc10] ss:$8 sps:$4 sm:$0xff]   ;;  %v6759_v41 = vld [vmem:[%s7863_s10 + $0x320] ss:$8 sps:$4 sm:$0xff]  }
 0x113   : > { %4930 = vmatprep.mubr.bf16.mxu0 %v6749_v44  ;;  %v6842_v44 = vld [vmem:[%s7861_s26 + $0x178] ss:$144 sps:$4 sm:$0xff]  }
 0x114   : > { %4428 = vmatpush1.bf16.msra.mxu1 %v6657_v39  ;;  %v6761_v39 = vld [vmem:[%s7863_s10 + $0x324] ss:$8 sps:$4 sm:$0xff]  }
 0x115   : > { %4905 = vmatpush1.bf16.msra.mxu0 %v6660_v40  ;;  %4429 = vmatprep.subr.bf16.mxu1 %v6665_v42  ;;  %v6764_v40 = vld [vmem:[%s7863_s10 + $0xc24] ss:$8 sps:$4 sm:$0xff]   ;;  %v6762_v42 = vld [vmem:[%s7863_s10 + $0xc20] ss:$8 sps:$4 sm:$0xff]  }
 0x116   : > { %4906 = vmatprep.subr.bf16.mxu0 %v6668_v43  ;;  %v6841_v43 = vld [vmem:[%s7861_s26 + $0x130] ss:$144 sps:$4 sm:$0xff]  }
 0x118   : > { %4430 = vmatpush1.bf16.msra.mxu1 %v6663_v45  ;;  %v6767_v45 = vld [vmem:[%s7863_s10 + $0x334] ss:$8 sps:$4 sm:$0xff]  }
 0x119   : > { %4907 = vmatpush1.bf16.msra.mxu0 %v6666_v46  ;;  %4431 = vmatprep.subr.bf16.mxu1 %v6671_v47  ;;  %v6770_v46 = vld [vmem:[%s7863_s10 + $0xc34] ss:$8 sps:$4 sm:$0xff]  }
 0x11a   : > { %4908 = vmatprep.subr.bf16.mxu0 %v6674_v48  ;;  %v6851_v47 = vld [vmem:[%s7861_s26 + $0x1c] ss:$144 sps:$4 sm:$0xff]   ;;  %v6857_v48 = vld [vmem:[%s7861_s26 + $0x64] ss:$144 sps:$4 sm:$0xff]  }
 0x11c   : > { %4432 = vmatpush1.bf16.msra.mxu1 %v6669_v49  ;;  %v6765_v49 = vld [vmem:[%s7863_s10 + $0x330] ss:$8 sps:$4 sm:$0xff]  }
 0x11d   : > { %4909 = vmatpush1.bf16.msra.mxu0 %v6672_v50  ;;  %4433 = vmatprep.subr.bf16.mxu1 %v6677_v51  ;;  %v6768_v50 = vld [vmem:[%s7863_s10 + $0xc30] ss:$8 sps:$4 sm:$0xff]   ;;  %v6773_v51 = vld [vmem:[%s7863_s10 + $0x344] ss:$8 sps:$4 sm:$0xff]  }
 0x11e   : > { %4910 = vmatprep.subr.bf16.mxu0 %v6680_v52  ;;  %v6776_v52 = vld [vmem:[%s7863_s10 + $0xc44] ss:$8 sps:$4 sm:$0xff]  }
 0x120   : > { %4434 = vmatpush1.bf16.msra.mxu1 %v6675_v53  ;;  %v6771_v53 = vld [vmem:[%s7863_s10 + $0x340] ss:$8 sps:$4 sm:$0xff]  }
 0x121   : > { %4911 = vmatpush1.bf16.msra.mxu0 %v6678_v54  ;;  %4435 = vmatprep.subr.bf16.mxu1 %v6683_v55  ;;  %v6774_v54 = vld [vmem:[%s7863_s10 + $0xc40] ss:$8 sps:$4 sm:$0xff]   ;;  %v6779_v55 = vld [vmem:[%s7863_s10 + $0x354] ss:$8 sps:$4 sm:$0xff]  }
 0x122   : > { %4912 = vmatprep.subr.bf16.mxu0 %v6686_v56  ;;  %v6782_v56 = vld [vmem:[%s7863_s10 + $0xc54] ss:$8 sps:$4 sm:$0xff]  }
 0x124   : > { %4436 = vmatpush1.bf16.msra.mxu1 %v6681_v57  ;;  %v6777_v57 = vld [vmem:[%s7863_s10 + $0x350] ss:$8 sps:$4 sm:$0xff]  }
 0x125   : > { %4913 = vmatpush1.bf16.msra.mxu0 %v6684_v58  ;;  %4437 = vmatprep.subr.bf16.mxu1 %v6689_v59  ;;  %v6780_v58 = vld [vmem:[%s7863_s10 + $0xc50] ss:$8 sps:$4 sm:$0xff]   ;;  %v6785_v59 = vld [vmem:[%s7863_s10 + $0x364] ss:$8 sps:$4 sm:$0xff]  }
 0x126   : > { %4914 = vmatprep.subr.bf16.mxu0 %v6692_v60  ;;  %v6788_v60 = vld [vmem:[%s7863_s10 + $0xc64] ss:$8 sps:$4 sm:$0xff]  }
 0x128   : > { %4438 = vmatpush1.bf16.msra.mxu1 %v6687_v61  ;;  %v6783_v61 = vld [vmem:[%s7863_s10 + $0x360] ss:$8 sps:$4 sm:$0xff]  }
 0x129   : > { %4915 = vmatpush1.bf16.msra.mxu0 %v6690_v62  ;;  %4439 = vmatprep.subr.bf16.mxu1 %v6695_v63  ;;  %v6786_v62 = vld [vmem:[%s7863_s10 + $0xc60] ss:$8 sps:$4 sm:$0xff]   ;;  %v6791_v63 = vld [vmem:[%s7863_s10 + $0x374] ss:$8 sps:$4 sm:$0xff]  }
 0x12a   : > { %4916 = vmatprep.subr.bf16.mxu0 %v6698_v0  ;;  %v6794_v0 = vld [vmem:[%s7863_s10 + $0xc74] ss:$8 sps:$4 sm:$0xff]  }
 0x12c   : > { %4440 = vmatpush1.bf16.msra.mxu1 %v6693_v1  ;;  %v6789_v1 = vld [vmem:[%s7863_s10 + $0x370] ss:$8 sps:$4 sm:$0xff]  }
 0x12d   : > { %4917 = vmatpush1.bf16.msra.mxu0 %v6696_v2  ;;  %4441 = vmatprep.subr.bf16.mxu1 %v6701_v3  ;;  %v6792_v2 = vld [vmem:[%s7863_s10 + $0xc70] ss:$8 sps:$4 sm:$0xff]   ;;  %v6797_v3 = vld [vmem:[%s7863_s10 + $0x384] ss:$8 sps:$4 sm:$0xff]  }
 0x12e   : > { %4918 = vmatprep.subr.bf16.mxu0 %v6704_v4  ;;  %v6800_v4 = vld [vmem:[%s7863_s10 + $0xc84] ss:$8 sps:$4 sm:$0xff]  }
 0x130   : > { %4442 = vmatpush1.bf16.msra.mxu1 %v6699_v5  ;;  %v6795_v5 = vld [vmem:[%s7863_s10 + $0x380] ss:$8 sps:$4 sm:$0xff]  }
 0x131   : > { %4919 = vmatpush1.bf16.msra.mxu0 %v6702_v6  ;;  %4443 = vmatprep.subr.bf16.mxu1 %v6707_v7  ;;  %v6798_v6 = vld [vmem:[%s7863_s10 + $0xc80] ss:$8 sps:$4 sm:$0xff]   ;;  %v6803_v7 = vld [vmem:[%s7863_s10 + $0x394] ss:$8 sps:$4 sm:$0xff]  }
 0x132   : > { %4920 = vmatprep.subr.bf16.mxu0 %v6710_v8  ;;  %v6806_v8 = vld [vmem:[%s7863_s10 + $0xc94] ss:$8 sps:$4 sm:$0xff]  }
 0x134   : > { %4444 = vmatpush1.bf16.msra.mxu1 %v6705_v9  ;;  %v6801_v9 = vld [vmem:[%s7863_s10 + $0x390] ss:$8 sps:$4 sm:$0xff]  }
 0x135   : > { %4921 = vmatpush1.bf16.msra.mxu0 %v6708_v10  ;;  %4445 = vmatprep.subr.bf16.mxu1 %v6713_v11  ;;  %v6804_v10 = vld [vmem:[%s7863_s10 + $0xc90] ss:$8 sps:$4 sm:$0xff]   ;;  %v6809_v11 = vld [vmem:[%s7863_s10 + $0x3a4] ss:$8 sps:$4 sm:$0xff]  }
 0x136   : > { %4922 = vmatprep.subr.bf16.mxu0 %v6716_v12  ;;  %v6812_v12 = vld [vmem:[%s7863_s10 + $0xca4] ss:$8 sps:$4 sm:$0xff]  }
 0x138   : > { %4446 = vmatpush1.bf16.msra.mxu1 %v6711_v13  ;;  %v6807_v13 = vld [vmem:[%s7863_s10 + $0x3a0] ss:$8 sps:$4 sm:$0xff]  }
 0x139   : > { %4923 = vmatpush1.bf16.msra.mxu0 %v6714_v14  ;;  %4447 = vmatprep.subr.bf16.mxu1 %v6719_v15  ;;  %v6810_v14 = vld [vmem:[%s7863_s10 + $0xca0] ss:$8 sps:$4 sm:$0xff]   ;;  %v6815_v15 = vld [vmem:[%s7863_s10 + $0x3b4] ss:$8 sps:$4 sm:$0xff]  }
 0x13a   : > { %4924 = vmatprep.subr.bf16.mxu0 %v6722_v16  ;;  %v6818_v16 = vld [vmem:[%s7863_s10 + $0xcb4] ss:$8 sps:$4 sm:$0xff]  }
 0x13c   : > { %4448 = vmatpush1.bf16.msra.mxu1 %v6717_v17  ;;  %v6813_v17 = vld [vmem:[%s7863_s10 + $0x3b0] ss:$8 sps:$4 sm:$0xff]  }
 0x13d   : > { %4925 = vmatpush1.bf16.msra.mxu0 %v6720_v18  ;;  %4449 = vmatprep.subr.bf16.mxu1 %v6727_v19  ;;  %v6816_v18 = vld [vmem:[%s7863_s10 + $0xcb0] ss:$8 sps:$4 sm:$0xff]   ;;  %v6821_v19 = vld [vmem:[%s7863_s10 + $0x3c4] ss:$8 sps:$4 sm:$0xff]  }
 0x13e   : > { %4926 = vmatprep.subr.bf16.mxu0 %v6732_v20  ;;  %v6824_v20 = vld [vmem:[%s7863_s10 + $0xcc4] ss:$8 sps:$4 sm:$0xff]  }
 0x140   : > { %4450 = vmatpush1.bf16.msra.mxu1 %v6725_v21  ;;  %v6819_v21 = vld [vmem:[%s7863_s10 + $0x3c0] ss:$8 sps:$4 sm:$0xff]  }
 0x141   : > { %4927 = vmatpush1.bf16.msra.mxu0 %v6730_v22  ;;  %4451 = vmatprep.subr.bf16.mxu1 %v6737_v23  ;;  %v6822_v22 = vld [vmem:[%s7863_s10 + $0xcc0] ss:$8 sps:$4 sm:$0xff]   ;;  %v6827_v23 = vld [vmem:[%s7863_s10 + $0x3d4] ss:$8 sps:$4 sm:$0xff]  }
 0x142   : > { %4928 = vmatprep.subr.bf16.mxu0 %v6740_v24  ;;  %v6830_v24 = vld [vmem:[%s7863_s10 + $0xcd4] ss:$8 sps:$4 sm:$0xff]  }
 0x144   : > { %4452 = vmatpush1.bf16.msra.mxu1 %v6735_v25  ;;  %v6825_v25 = vld [vmem:[%s7863_s10 + $0x3d0] ss:$8 sps:$4 sm:$0xff]  }
 0x145   : > { %4929 = vmatpush1.bf16.msra.mxu0 %v6738_v26  ;;  %4474 = vmatprep.subr.bf16.mxu1 %v6746_v27  ;;  %v6828_v26 = vld [vmem:[%s7863_s10 + $0xcd0] ss:$8 sps:$4 sm:$0xff]   ;;  %v6835_v27 = vld [vmem:[%s7863_s10 + $0x3e4] ss:$8 sps:$4 sm:$0xff]  }
 0x146   : > { %4951 = vmatprep.subr.bf16.mxu0 %v6752_v28  ;;  %v6840_v28 = vld [vmem:[%s7863_s10 + $0xce4] ss:$8 sps:$4 sm:$0xff]  }
 0x147   : > { %4454 = vmatmul.mubr.bf16.vlgmr.msra.gmra.mrb[0].mxu1 %v6741_v29  ;;  %v6833_v29 = vld [vmem:[%s7863_s10 + $0x3e0] ss:$8 sps:$4 sm:$0xff]  }
 0x148   : > { %4931 = vmatmul.mubr.bf16.vlgmr.msra.gmra.mrb[0].mxu0 %v6747_v31  ;;  %4475 = vmatpush1.bf16.msra.mxu1 %v6744_v30  ;;  %v6838_v30 = vld [vmem:[%s7863_s10 + $0xce0] ss:$8 sps:$4 sm:$0xff]   ;;  %v6845_v31 = vld [vmem:[%s7863_s10 + $0x3f4] ss:$8 sps:$4 sm:$0xff]  }
 0x149   : > { %4952 = vmatpush1.bf16.msra.mxu0 %v6750_v32  ;;  %4476 = vmatprep.subr.bf16.mxu1 %v6755_v33  ;;  %v6848_v32 = vld [vmem:[%s7863_s10 + $0xcf4] ss:$8 sps:$4 sm:$0xff]   ;;  %v6843_v33 = vld [vmem:[%s7863_s10 + $0x3f0] ss:$8 sps:$4 sm:$0xff]  }
 0x14a   : > { %4953 = vmatprep.subr.bf16.mxu0 %v6758_v34  ;;  %4463 = vmatprep.mubr.bf16.mxu1 %v6831_v35  ;;  %v6846_v34 = vld [vmem:[%s7863_s10 + $0xcf0] ss:$8 sps:$4 sm:$0xff]   ;;  %v6854_v35 = vld [vmem:[%s7863_s10 + $0x404] ss:$8 sps:$4 sm:$0xff]  }
 0x14b   : > { %4940 = vmatprep.mubr.bf16.mxu0 %v6836_v36  ;;  %v6860_v36 = vld [vmem:[%s7863_s10 + $0xd04] ss:$8 sps:$4 sm:$0xff]  }
 0x14c   : > { %4477 = vmatpush1.bf16.msra.mxu1 %v6753_v37  ;;  %v6849_v37 = vld [vmem:[%s7861_s26 + $0x18] ss:$144 sps:$4 sm:$0xff]  }
 0x14d   : > { %4954 = vmatpush1.bf16.msra.mxu0 %v6756_v38  ;;  %4478 = vmatprep.subr.bf16.mxu1 %v6761_v39  ;;  %v6852_v38 = vld [vmem:[%s7863_s10 + $0x400] ss:$8 sps:$4 sm:$0xff]  }
 0x14e   : > { %4955 = vmatprep.subr.bf16.mxu0 %v6764_v40  ;;  %v6855_v39 = vld [vmem:[%s7861_s26 + $0x60] ss:$144 sps:$4 sm:$0xff]  }
 0x14f   : > { %4464 = vmatmul.mubr.bf16.gmra.mrb[4].mxu1 %v6841_v43  ;;  %v6858_v40 = vld [vmem:[%s7863_s10 + $0xd00] ss:$8 sps:$4 sm:$0xff]   ;;  %v6939_v43 = vld [vmem:[%s7861_s26 + $0x13c] ss:$144 sps:$4 sm:$0xff]  }
 0x150   : > { %4941 = vmatmul.mubr.bf16.gmra.mrb[4].mxu0 %v6842_v44  ;;  %4479 = vmatpush1.bf16.msra.mxu1 %v6759_v41  ;;  %v6863_v41 = vld [vmem:[%s7863_s10 + $0x414] ss:$8 sps:$4 sm:$0xff]  }
 0x151   : > { %4956 = vmatpush1.bf16.msra.mxu0 %v6762_v42  ;;  %4480 = vmatprep.subr.bf16.mxu1 %v6767_v45  ;;  %v6866_v42 = vld [vmem:[%s7863_s10 + $0xd14] ss:$8 sps:$4 sm:$0xff]   ;;  %v6861_v45 = vld [vmem:[%s7863_s10 + $0x410] ss:$8 sps:$4 sm:$0xff]  }
 0x152   : > { %4957 = vmatprep.subr.bf16.mxu0 %v6770_v46  ;;  %4506 = vmatprep.mubr.bf16.mxu1 %v6851_v47  ;;  %v6944_v44 = vld [vmem:[%s7861_s26 + $0x184] ss:$144 sps:$4 sm:$0xff]   ;;  %v6864_v46 = vld [vmem:[%s7863_s10 + $0xd10] ss:$8 sps:$4 sm:$0xff]  }
 0x153   : > { %4983 = vmatprep.mubr.bf16.mxu0 %v6857_v48  ;;  %v6869_v47 = vld [vmem:[%s7863_s10 + $0x424] ss:$8 sps:$4 sm:$0xff]  }
 0x154   : > { %4481 = vmatpush1.bf16.msra.mxu1 %v6765_v49  ;;  %v6872_v48 = vld [vmem:[%s7863_s10 + $0xd24] ss:$8 sps:$4 sm:$0xff]   ;;  %v6867_v49 = vld [vmem:[%s7863_s10 + $0x420] ss:$8 sps:$4 sm:$0xff]  }
 0x155   : > { %4958 = vmatpush1.bf16.msra.mxu0 %v6768_v50  ;;  %4482 = vmatprep.subr.bf16.mxu1 %v6773_v51  ;;  %v6870_v50 = vld [vmem:[%s7863_s10 + $0xd20] ss:$8 sps:$4 sm:$0xff]  }
 0x156   : > { %4959 = vmatprep.subr.bf16.mxu0 %v6776_v52  ;;  %v6949_v51 = vld [vmem:[%s7861_s26 + $0x138] ss:$144 sps:$4 sm:$0xff]   ;;  %v6950_v52 = vld [vmem:[%s7861_s26 + $0x180] ss:$144 sps:$4 sm:$0xff]  }
 0x158   : > { %4483 = vmatpush1.bf16.msra.mxu1 %v6771_v53  ;;  %v6875_v53 = vld [vmem:[%s7863_s10 + $0x434] ss:$8 sps:$4 sm:$0xff]  }
 0x159   : > { %4960 = vmatpush1.bf16.msra.mxu0 %v6774_v54  ;;  %4484 = vmatprep.subr.bf16.mxu1 %v6779_v55  ;;  %v6878_v54 = vld [vmem:[%s7863_s10 + $0xd34] ss:$8 sps:$4 sm:$0xff]  }
 0x15a   : > { %4961 = vmatprep.subr.bf16.mxu0 %v6782_v56  ;;  %v6959_v55 = vld [vmem:[%s7861_s26 + $0x24] ss:$144 sps:$4 sm:$0xff]   ;;  %v6965_v56 = vld [vmem:[%s7861_s26 + $0x6c] ss:$144 sps:$4 sm:$0xff]  }
 0x15c   : > { %4485 = vmatpush1.bf16.msra.mxu1 %v6777_v57  ;;  %v6873_v57 = vld [vmem:[%s7863_s10 + $0x430] ss:$8 sps:$4 sm:$0xff]  }
 0x15d   : > { %4962 = vmatpush1.bf16.msra.mxu0 %v6780_v58  ;;  %4486 = vmatprep.subr.bf16.mxu1 %v6785_v59  ;;  %v6876_v58 = vld [vmem:[%s7863_s10 + $0xd30] ss:$8 sps:$4 sm:$0xff]   ;;  %v6881_v59 = vld [vmem:[%s7863_s10 + $0x444] ss:$8 sps:$4 sm:$0xff]  }
 0x15e   : > { %4963 = vmatprep.subr.bf16.mxu0 %v6788_v60  ;;  %v6884_v60 = vld [vmem:[%s7863_s10 + $0xd44] ss:$8 sps:$4 sm:$0xff]  }
 0x160   : > { %4487 = vmatpush1.bf16.msra.mxu1 %v6783_v61  ;;  %v6879_v61 = vld [vmem:[%s7863_s10 + $0x440] ss:$8 sps:$4 sm:$0xff]  }
 0x161   : > { %4964 = vmatpush1.bf16.msra.mxu0 %v6786_v62  ;;  %4488 = vmatprep.subr.bf16.mxu1 %v6791_v63  ;;  %v6882_v62 = vld [vmem:[%s7863_s10 + $0xd40] ss:$8 sps:$4 sm:$0xff]   ;;  %v6887_v63 = vld [vmem:[%s7863_s10 + $0x454] ss:$8 sps:$4 sm:$0xff]  }
 0x162   : > { %4965 = vmatprep.subr.bf16.mxu0 %v6794_v0  ;;  %v6890_v0 = vld [vmem:[%s7863_s10 + $0xd54] ss:$8 sps:$4 sm:$0xff]  }
 0x164   : > { %4489 = vmatpush1.bf16.msra.mxu1 %v6789_v1  ;;  %v6885_v1 = vld [vmem:[%s7863_s10 + $0x450] ss:$8 sps:$4 sm:$0xff]  }
 0x165   : > { %4966 = vmatpush1.bf16.msra.mxu0 %v6792_v2  ;;  %4490 = vmatprep.subr.bf16.mxu1 %v6797_v3  ;;  %v6888_v2 = vld [vmem:[%s7863_s10 + $0xd50] ss:$8 sps:$4 sm:$0xff]   ;;  %v6893_v3 = vld [vmem:[%s7863_s10 + $0x464] ss:$8 sps:$4 sm:$0xff]  }
 0x166   : > { %4967 = vmatprep.subr.bf16.mxu0 %v6800_v4  ;;  %v6896_v4 = vld [vmem:[%s7863_s10 + $0xd64] ss:$8 sps:$4 sm:$0xff]  }
 0x168   : > { %4491 = vmatpush1.bf16.msra.mxu1 %v6795_v5  ;;  %v6891_v5 = vld [vmem:[%s7863_s10 + $0x460] ss:$8 sps:$4 sm:$0xff]  }
 0x169   : > { %4968 = vmatpush1.bf16.msra.mxu0 %v6798_v6  ;;  %4492 = vmatprep.subr.bf16.mxu1 %v6803_v7  ;;  %v6894_v6 = vld [vmem:[%s7863_s10 + $0xd60] ss:$8 sps:$4 sm:$0xff]   ;;  %v6899_v7 = vld [vmem:[%s7863_s10 + $0x474] ss:$8 sps:$4 sm:$0xff]  }
 0x16a   : > { %4969 = vmatprep.subr.bf16.mxu0 %v6806_v8  ;;  %v6902_v8 = vld [vmem:[%s7863_s10 + $0xd74] ss:$8 sps:$4 sm:$0xff]  }
 0x16c   : > { %4493 = vmatpush1.bf16.msra.mxu1 %v6801_v9  ;;  %v6897_v9 = vld [vmem:[%s7863_s10 + $0x470] ss:$8 sps:$4 sm:$0xff]  }
 0x16d   : > { %4970 = vmatpush1.bf16.msra.mxu0 %v6804_v10  ;;  %4494 = vmatprep.subr.bf16.mxu1 %v6809_v11  ;;  %v6900_v10 = vld [vmem:[%s7863_s10 + $0xd70] ss:$8 sps:$4 sm:$0xff]   ;;  %v6905_v11 = vld [vmem:[%s7863_s10 + $0x484] ss:$8 sps:$4 sm:$0xff]  }
 0x16e   : > { %4971 = vmatprep.subr.bf16.mxu0 %v6812_v12  ;;  %v6908_v12 = vld [vmem:[%s7863_s10 + $0xd84] ss:$8 sps:$4 sm:$0xff]  }
 0x170   : > { %4495 = vmatpush1.bf16.msra.mxu1 %v6807_v13  ;;  %v6903_v13 = vld [vmem:[%s7863_s10 + $0x480] ss:$8 sps:$4 sm:$0xff]  }
 0x171   : > { %4972 = vmatpush1.bf16.msra.mxu0 %v6810_v14  ;;  %4496 = vmatprep.subr.bf16.mxu1 %v6815_v15  ;;  %v6906_v14 = vld [vmem:[%s7863_s10 + $0xd80] ss:$8 sps:$4 sm:$0xff]   ;;  %v6911_v15 = vld [vmem:[%s7863_s10 + $0x494] ss:$8 sps:$4 sm:$0xff]  }
 0x172   : > { %4973 = vmatprep.subr.bf16.mxu0 %v6818_v16  ;;  %v6914_v16 = vld [vmem:[%s7863_s10 + $0xd94] ss:$8 sps:$4 sm:$0xff]  }
 0x174   : > { %4497 = vmatpush1.bf16.msra.mxu1 %v6813_v17  ;;  %v6909_v17 = vld [vmem:[%s7863_s10 + $0x490] ss:$8 sps:$4 sm:$0xff]  }
 0x175   : > { %4974 = vmatpush1.bf16.msra.mxu0 %v6816_v18  ;;  %4498 = vmatprep.subr.bf16.mxu1 %v6821_v19  ;;  %v6912_v18 = vld [vmem:[%s7863_s10 + $0xd90] ss:$8 sps:$4 sm:$0xff]   ;;  %v6917_v19 = vld [vmem:[%s7863_s10 + $0x4a4] ss:$8 sps:$4 sm:$0xff]  }
 0x176   : > { %4975 = vmatprep.subr.bf16.mxu0 %v6824_v20  ;;  %v6920_v20 = vld [vmem:[%s7863_s10 + $0xda4] ss:$8 sps:$4 sm:$0xff]  }
 0x178   : > { %4499 = vmatpush1.bf16.msra.mxu1 %v6819_v21  ;;  %v6915_v21 = vld [vmem:[%s7863_s10 + $0x4a0] ss:$8 sps:$4 sm:$0xff]  }
 0x179   : > { %4976 = vmatpush1.bf16.msra.mxu0 %v6822_v22  ;;  %4500 = vmatprep.subr.bf16.mxu1 %v6827_v23  ;;  %v6918_v22 = vld [vmem:[%s7863_s10 + $0xda0] ss:$8 sps:$4 sm:$0xff]   ;;  %v6923_v23 = vld [vmem:[%s7863_s10 + $0x4b4] ss:$8 sps:$4 sm:$0xff]  }
 0x17a   : > { %4977 = vmatprep.subr.bf16.mxu0 %v6830_v24  ;;  %v6926_v24 = vld [vmem:[%s7863_s10 + $0xdb4] ss:$8 sps:$4 sm:$0xff]  }
 0x17c   : > { %4501 = vmatpush1.bf16.msra.mxu1 %v6825_v25  ;;  %v6921_v25 = vld [vmem:[%s7863_s10 + $0x4b0] ss:$8 sps:$4 sm:$0xff]  }
 0x17d   : > { %4978 = vmatpush1.bf16.msra.mxu0 %v6828_v26  ;;  %4502 = vmatprep.subr.bf16.mxu1 %v6835_v27  ;;  %v6924_v26 = vld [vmem:[%s7863_s10 + $0xdb0] ss:$8 sps:$4 sm:$0xff]   ;;  %v6929_v27 = vld [vmem:[%s7863_s10 + $0x4c4] ss:$8 sps:$4 sm:$0xff]  }
 0x17e   : > { %4979 = vmatprep.subr.bf16.mxu0 %v6840_v28  ;;  %v6932_v28 = vld [vmem:[%s7863_s10 + $0xdc4] ss:$8 sps:$4 sm:$0xff]  }
 0x180   : > { %4503 = vmatpush1.bf16.msra.mxu1 %v6833_v29  ;;  %v6927_v29 = vld [vmem:[%s7863_s10 + $0x4c0] ss:$8 sps:$4 sm:$0xff]  }
 0x181   : > { %4980 = vmatpush1.bf16.msra.mxu0 %v6838_v30  ;;  %4504 = vmatprep.subr.bf16.mxu1 %v6845_v31  ;;  %v6930_v30 = vld [vmem:[%s7863_s10 + $0xdc0] ss:$8 sps:$4 sm:$0xff]   ;;  %v6935_v31 = vld [vmem:[%s7863_s10 + $0x4d4] ss:$8 sps:$4 sm:$0xff]  }
 0x182   : > { %4981 = vmatprep.subr.bf16.mxu0 %v6848_v32  ;;  %v6938_v32 = vld [vmem:[%s7863_s10 + $0xdd4] ss:$8 sps:$4 sm:$0xff]  }
 0x184   : > { %4505 = vmatpush1.bf16.msra.mxu1 %v6843_v33  ;;  %v6933_v33 = vld [vmem:[%s7863_s10 + $0x4d0] ss:$8 sps:$4 sm:$0xff]  }
 0x185   : > { %4982 = vmatpush1.bf16.msra.mxu0 %v6846_v34  ;;  %4527 = vmatprep.subr.bf16.mxu1 %v6854_v35  ;;  %v6936_v34 = vld [vmem:[%s7863_s10 + $0xdd0] ss:$8 sps:$4 sm:$0xff]   ;;  %v6943_v35 = vld [vmem:[%s7863_s10 + $0x4e4] ss:$8 sps:$4 sm:$0xff]  }
 0x186   : > { %5004 = vmatprep.subr.bf16.mxu0 %v6860_v36  ;;  %v6948_v36 = vld [vmem:[%s7863_s10 + $0xde4] ss:$8 sps:$4 sm:$0xff]  }
 0x187   : > { %4507 = vmatmul.mubr.bf16.vlgmr.msra.gmra.mrb[0].mxu1 %v6849_v37  ;;  %v6941_v37 = vld [vmem:[%s7863_s10 + $0x4e0] ss:$8 sps:$4 sm:$0xff]  }
 0x188   : > { %4984 = vmatmul.mubr.bf16.vlgmr.msra.gmra.mrb[0].mxu0 %v6855_v39  ;;  %4528 = vmatpush1.bf16.msra.mxu1 %v6852_v38  ;;  %v6946_v38 = vld [vmem:[%s7863_s10 + $0xde0] ss:$8 sps:$4 sm:$0xff]   ;;  %v6953_v39 = vld [vmem:[%s7863_s10 + $0x4f4] ss:$8 sps:$4 sm:$0xff]  }
 0x189   : > { %5005 = vmatpush1.bf16.msra.mxu0 %v6858_v40  ;;  %4529 = vmatprep.subr.bf16.mxu1 %v6863_v41  ;;  %v6956_v40 = vld [vmem:[%s7863_s10 + $0xdf4] ss:$8 sps:$4 sm:$0xff]   ;;  %v6951_v41 = vld [vmem:[%s7863_s10 + $0x4f0] ss:$8 sps:$4 sm:$0xff]  }
 0x18a   : > { %5006 = vmatprep.subr.bf16.mxu0 %v6866_v42  ;;  %4516 = vmatprep.mubr.bf16.mxu1 %v6939_v43  ;;  %v6954_v42 = vld [vmem:[%s7863_s10 + $0xdf0] ss:$8 sps:$4 sm:$0xff]   ;;  %v6962_v43 = vld [vmem:[%s7863_s10 + $0x504] ss:$8 sps:$4 sm:$0xff]  }
 0x18b   : > { %4993 = vmatprep.mubr.bf16.mxu0 %v6944_v44  ;;  %v6968_v44 = vld [vmem:[%s7863_s10 + $0xe04] ss:$8 sps:$4 sm:$0xff]  }
 0x18c   : > { %4530 = vmatpush1.bf16.msra.mxu1 %v6861_v45  ;;  %v6957_v45 = vld [vmem:[%s7861_s26 + $0x20] ss:$144 sps:$4 sm:$0xff]  }
 0x18d   : > { %5007 = vmatpush1.bf16.msra.mxu0 %v6864_v46  ;;  %4531 = vmatprep.subr.bf16.mxu1 %v6869_v47  ;;  %v6960_v46 = vld [vmem:[%s7863_s10 + $0x500] ss:$8 sps:$4 sm:$0xff]  }
 0x18e   : > { %5008 = vmatprep.subr.bf16.mxu0 %v6872_v48  ;;  %v6963_v47 = vld [vmem:[%s7861_s26 + $0x68] ss:$144 sps:$4 sm:$0xff]  }
 0x18f   : > { %4517 = vmatmul.mubr.bf16.gmra.mrb[4].mxu1 %v6949_v51  ;;  %v6966_v48 = vld [vmem:[%s7863_s10 + $0xe00] ss:$8 sps:$4 sm:$0xff]   ;;  %v7047_v51 = vld [vmem:[%s7861_s26 + $0x144] ss:$144 sps:$4 sm:$0xff]  }
 0x190   : > { %4994 = vmatmul.mubr.bf16.gmra.mrb[4].mxu0 %v6950_v52  ;;  %4532 = vmatpush1.bf16.msra.mxu1 %v6867_v49  ;;  %v6971_v49 = vld [vmem:[%s7863_s10 + $0x514] ss:$8 sps:$4 sm:$0xff]  }
 0x191   : > { %5009 = vmatpush1.bf16.msra.mxu0 %v6870_v50  ;;  %4533 = vmatprep.subr.bf16.mxu1 %v6875_v53  ;;  %v6974_v50 = vld [vmem:[%s7863_s10 + $0xe14] ss:$8 sps:$4 sm:$0xff]   ;;  %v6969_v53 = vld [vmem:[%s7863_s10 + $0x510] ss:$8 sps:$4 sm:$0xff]  }
 0x192   : > { %5010 = vmatprep.subr.bf16.mxu0 %v6878_v54  ;;  %4559 = vmatprep.mubr.bf16.mxu1 %v6959_v55  ;;  %v7052_v52 = vld [vmem:[%s7861_s26 + $0x18c] ss:$144 sps:$4 sm:$0xff]   ;;  %v6972_v54 = vld [vmem:[%s7863_s10 + $0xe10] ss:$8 sps:$4 sm:$0xff]  }
 0x193   : > { %5036 = vmatprep.mubr.bf16.mxu0 %v6965_v56  ;;  %v6977_v55 = vld [vmem:[%s7863_s10 + $0x524] ss:$8 sps:$4 sm:$0xff]  }
 0x194   : > { %4534 = vmatpush1.bf16.msra.mxu1 %v6873_v57  ;;  %v6980_v56 = vld [vmem:[%s7863_s10 + $0xe24] ss:$8 sps:$4 sm:$0xff]   ;;  %v6975_v57 = vld [vmem:[%s7863_s10 + $0x520] ss:$8 sps:$4 sm:$0xff]  }
 0x195   : > { %5011 = vmatpush1.bf16.msra.mxu0 %v6876_v58  ;;  %4535 = vmatprep.subr.bf16.mxu1 %v6881_v59  ;;  %v6978_v58 = vld [vmem:[%s7863_s10 + $0xe20] ss:$8 sps:$4 sm:$0xff]  }
 0x196   : > { %5012 = vmatprep.subr.bf16.mxu0 %v6884_v60  ;;  %v7057_v59 = vld [vmem:[%s7861_s26 + $0x140] ss:$144 sps:$4 sm:$0xff]   ;;  %v7058_v60 = vld [vmem:[%s7861_s26 + $0x188] ss:$144 sps:$4 sm:$0xff]  }
 0x198   : > { %4536 = vmatpush1.bf16.msra.mxu1 %v6879_v61  ;;  %v6983_v61 = vld [vmem:[%s7863_s10 + $0x534] ss:$8 sps:$4 sm:$0xff]  }
 0x199   : > { %5013 = vmatpush1.bf16.msra.mxu0 %v6882_v62  ;;  %4537 = vmatprep.subr.bf16.mxu1 %v6887_v63  ;;  %v6986_v62 = vld [vmem:[%s7863_s10 + $0xe34] ss:$8 sps:$4 sm:$0xff]  }
 0x19a   : > { %5014 = vmatprep.subr.bf16.mxu0 %v6890_v0  ;;  %v7067_v63 = vld [vmem:[%s7861_s26 + $0x2c] ss:$144 sps:$4 sm:$0xff]   ;;  %v7073_v0 = vld [vmem:[%s7861_s26 + $0x74] ss:$144 sps:$4 sm:$0xff]  }
 0x19c   : > { %4538 = vmatpush1.bf16.msra.mxu1 %v6885_v1  ;;  %v6981_v1 = vld [vmem:[%s7863_s10 + $0x530] ss:$8 sps:$4 sm:$0xff]  }
 0x19d   : > { %5015 = vmatpush1.bf16.msra.mxu0 %v6888_v2  ;;  %4539 = vmatprep.subr.bf16.mxu1 %v6893_v3  ;;  %v6984_v2 = vld [vmem:[%s7863_s10 + $0xe30] ss:$8 sps:$4 sm:$0xff]   ;;  %v6989_v3 = vld [vmem:[%s7863_s10 + $0x544] ss:$8 sps:$4 sm:$0xff]  }
 0x19e   : > { %5016 = vmatprep.subr.bf16.mxu0 %v6896_v4  ;;  %v6992_v4 = vld [vmem:[%s7863_s10 + $0xe44] ss:$8 sps:$4 sm:$0xff]  }
 0x1a0   : > { %4540 = vmatpush1.bf16.msra.mxu1 %v6891_v5  ;;  %v6987_v5 = vld [vmem:[%s7863_s10 + $0x540] ss:$8 sps:$4 sm:$0xff]  }
 0x1a1   : > { %5017 = vmatpush1.bf16.msra.mxu0 %v6894_v6  ;;  %4541 = vmatprep.subr.bf16.mxu1 %v6899_v7  ;;  %v6990_v6 = vld [vmem:[%s7863_s10 + $0xe40] ss:$8 sps:$4 sm:$0xff]   ;;  %v6995_v7 = vld [vmem:[%s7863_s10 + $0x554] ss:$8 sps:$4 sm:$0xff]  }
 0x1a2   : > { %5018 = vmatprep.subr.bf16.mxu0 %v6902_v8  ;;  %v6998_v8 = vld [vmem:[%s7863_s10 + $0xe54] ss:$8 sps:$4 sm:$0xff]  }
 0x1a4   : > { %4542 = vmatpush1.bf16.msra.mxu1 %v6897_v9  ;;  %v6993_v9 = vld [vmem:[%s7863_s10 + $0x550] ss:$8 sps:$4 sm:$0xff]  }
 0x1a5   : > { %5019 = vmatpush1.bf16.msra.mxu0 %v6900_v10  ;;  %4543 = vmatprep.subr.bf16.mxu1 %v6905_v11  ;;  %v6996_v10 = vld [vmem:[%s7863_s10 + $0xe50] ss:$8 sps:$4 sm:$0xff]   ;;  %v7001_v11 = vld [vmem:[%s7863_s10 + $0x564] ss:$8 sps:$4 sm:$0xff]  }
 0x1a6   : > { %5020 = vmatprep.subr.bf16.mxu0 %v6908_v12  ;;  %v7004_v12 = vld [vmem:[%s7863_s10 + $0xe64] ss:$8 sps:$4 sm:$0xff]  }
 0x1a8   : > { %4544 = vmatpush1.bf16.msra.mxu1 %v6903_v13  ;;  %v6999_v13 = vld [vmem:[%s7863_s10 + $0x560] ss:$8 sps:$4 sm:$0xff]  }
 0x1a9   : > { %5021 = vmatpush1.bf16.msra.mxu0 %v6906_v14  ;;  %4545 = vmatprep.subr.bf16.mxu1 %v6911_v15  ;;  %v7002_v14 = vld [vmem:[%s7863_s10 + $0xe60] ss:$8 sps:$4 sm:$0xff]   ;;  %v7007_v15 = vld [vmem:[%s7863_s10 + $0x574] ss:$8 sps:$4 sm:$0xff]  }
 0x1aa   : > { %5022 = vmatprep.subr.bf16.mxu0 %v6914_v16  ;;  %v7010_v16 = vld [vmem:[%s7863_s10 + $0xe74] ss:$8 sps:$4 sm:$0xff]  }
 0x1ac   : > { %4546 = vmatpush1.bf16.msra.mxu1 %v6909_v17  ;;  %v7005_v17 = vld [vmem:[%s7863_s10 + $0x570] ss:$8 sps:$4 sm:$0xff]  }
 0x1ad   : > { %5023 = vmatpush1.bf16.msra.mxu0 %v6912_v18  ;;  %4547 = vmatprep.subr.bf16.mxu1 %v6917_v19  ;;  %v7008_v18 = vld [vmem:[%s7863_s10 + $0xe70] ss:$8 sps:$4 sm:$0xff]   ;;  %v7013_v19 = vld [vmem:[%s7863_s10 + $0x584] ss:$8 sps:$4 sm:$0xff]  }
 0x1ae   : > { %5024 = vmatprep.subr.bf16.mxu0 %v6920_v20  ;;  %v7016_v20 = vld [vmem:[%s7863_s10 + $0xe84] ss:$8 sps:$4 sm:$0xff]  }
 0x1b0   : > { %4548 = vmatpush1.bf16.msra.mxu1 %v6915_v21  ;;  %v7011_v21 = vld [vmem:[%s7863_s10 + $0x580] ss:$8 sps:$4 sm:$0xff]  }
 0x1b1   : > { %5025 = vmatpush1.bf16.msra.mxu0 %v6918_v22  ;;  %4549 = vmatprep.subr.bf16.mxu1 %v6923_v23  ;;  %v7014_v22 = vld [vmem:[%s7863_s10 + $0xe80] ss:$8 sps:$4 sm:$0xff]   ;;  %v7019_v23 = vld [vmem:[%s7863_s10 + $0x594] ss:$8 sps:$4 sm:$0xff]  }
 0x1b2   : > { %5026 = vmatprep.subr.bf16.mxu0 %v6926_v24  ;;  %v7022_v24 = vld [vmem:[%s7863_s10 + $0xe94] ss:$8 sps:$4 sm:$0xff]  }
 0x1b4   : > { %4550 = vmatpush1.bf16.msra.mxu1 %v6921_v25  ;;  %v7017_v25 = vld [vmem:[%s7863_s10 + $0x590] ss:$8 sps:$4 sm:$0xff]  }
 0x1b5   : > { %5027 = vmatpush1.bf16.msra.mxu0 %v6924_v26  ;;  %4551 = vmatprep.subr.bf16.mxu1 %v6929_v27  ;;  %v7020_v26 = vld [vmem:[%s7863_s10 + $0xe90] ss:$8 sps:$4 sm:$0xff]   ;;  %v7025_v27 = vld [vmem:[%s7863_s10 + $0x5a4] ss:$8 sps:$4 sm:$0xff]  }
 0x1b6   : > { %5028 = vmatprep.subr.bf16.mxu0 %v6932_v28  ;;  %v7028_v28 = vld [vmem:[%s7863_s10 + $0xea4] ss:$8 sps:$4 sm:$0xff]  }
 0x1b8   : > { %4552 = vmatpush1.bf16.msra.mxu1 %v6927_v29  ;;  %v7023_v29 = vld [vmem:[%s7863_s10 + $0x5a0] ss:$8 sps:$4 sm:$0xff]  }
 0x1b9   : > { %5029 = vmatpush1.bf16.msra.mxu0 %v6930_v30  ;;  %4553 = vmatprep.subr.bf16.mxu1 %v6935_v31  ;;  %v7026_v30 = vld [vmem:[%s7863_s10 + $0xea0] ss:$8 sps:$4 sm:$0xff]   ;;  %v7031_v31 = vld [vmem:[%s7863_s10 + $0x5b4] ss:$8 sps:$4 sm:$0xff]  }
 0x1ba   : > { %5030 = vmatprep.subr.bf16.mxu0 %v6938_v32  ;;  %v7034_v32 = vld [vmem:[%s7863_s10 + $0xeb4] ss:$8 sps:$4 sm:$0xff]  }
 0x1bc   : > { %4554 = vmatpush1.bf16.msra.mxu1 %v6933_v33  ;;  %v7029_v33 = vld [vmem:[%s7863_s10 + $0x5b0] ss:$8 sps:$4 sm:$0xff]  }
 0x1bd   : > { %5031 = vmatpush1.bf16.msra.mxu0 %v6936_v34  ;;  %4555 = vmatprep.subr.bf16.mxu1 %v6943_v35  ;;  %v7032_v34 = vld [vmem:[%s7863_s10 + $0xeb0] ss:$8 sps:$4 sm:$0xff]   ;;  %v7037_v35 = vld [vmem:[%s7863_s10 + $0x5c4] ss:$8 sps:$4 sm:$0xff]  }
 0x1be   : > { %5032 = vmatprep.subr.bf16.mxu0 %v6948_v36  ;;  %v7040_v36 = vld [vmem:[%s7863_s10 + $0xec4] ss:$8 sps:$4 sm:$0xff]  }
 0x1c0   : > { %4556 = vmatpush1.bf16.msra.mxu1 %v6941_v37  ;;  %v7035_v37 = vld [vmem:[%s7863_s10 + $0x5c0] ss:$8 sps:$4 sm:$0xff]  }
 0x1c1   : > { %5033 = vmatpush1.bf16.msra.mxu0 %v6946_v38  ;;  %4557 = vmatprep.subr.bf16.mxu1 %v6953_v39  ;;  %v7038_v38 = vld [vmem:[%s7863_s10 + $0xec0] ss:$8 sps:$4 sm:$0xff]   ;;  %v7043_v39 = vld [vmem:[%s7863_s10 + $0x5d4] ss:$8 sps:$4 sm:$0xff]  }
 0x1c2   : > { %5034 = vmatprep.subr.bf16.mxu0 %v6956_v40  ;;  %v7046_v40 = vld [vmem:[%s7863_s10 + $0xed4] ss:$8 sps:$4 sm:$0xff]  }
 0x1c4   : > { %4558 = vmatpush1.bf16.msra.mxu1 %v6951_v41  ;;  %v7041_v41 = vld [vmem:[%s7863_s10 + $0x5d0] ss:$8 sps:$4 sm:$0xff]  }
 0x1c5   : > { %5035 = vmatpush1.bf16.msra.mxu0 %v6954_v42  ;;  %4580 = vmatprep.subr.bf16.mxu1 %v6962_v43  ;;  %v7044_v42 = vld [vmem:[%s7863_s10 + $0xed0] ss:$8 sps:$4 sm:$0xff]   ;;  %v7051_v43 = vld [vmem:[%s7863_s10 + $0x5e4] ss:$8 sps:$4 sm:$0xff]  }
 0x1c6   : > { %5057 = vmatprep.subr.bf16.mxu0 %v6968_v44  ;;  %v7056_v44 = vld [vmem:[%s7863_s10 + $0xee4] ss:$8 sps:$4 sm:$0xff]  }
 0x1c7   : > { %4560 = vmatmul.mubr.bf16.vlgmr.msra.gmra.mrb[0].mxu1 %v6957_v45  ;;  %v7049_v45 = vld [vmem:[%s7863_s10 + $0x5e0] ss:$8 sps:$4 sm:$0xff]  }
 0x1c8   : > { %5037 = vmatmul.mubr.bf16.vlgmr.msra.gmra.mrb[0].mxu0 %v6963_v47  ;;  %4581 = vmatpush1.bf16.msra.mxu1 %v6960_v46  ;;  %v7054_v46 = vld [vmem:[%s7863_s10 + $0xee0] ss:$8 sps:$4 sm:$0xff]   ;;  %v7061_v47 = vld [vmem:[%s7863_s10 + $0x5f4] ss:$8 sps:$4 sm:$0xff]  }
 0x1c9   : > { %5058 = vmatpush1.bf16.msra.mxu0 %v6966_v48  ;;  %4582 = vmatprep.subr.bf16.mxu1 %v6971_v49  ;;  %v7064_v48 = vld [vmem:[%s7863_s10 + $0xef4] ss:$8 sps:$4 sm:$0xff]   ;;  %v7059_v49 = vld [vmem:[%s7863_s10 + $0x5f0] ss:$8 sps:$4 sm:$0xff]  }
 0x1ca   : > { %5059 = vmatprep.subr.bf16.mxu0 %v6974_v50  ;;  %4569 = vmatprep.mubr.bf16.mxu1 %v7047_v51  ;;  %v7062_v50 = vld [vmem:[%s7863_s10 + $0xef0] ss:$8 sps:$4 sm:$0xff]   ;;  %v7070_v51 = vld [vmem:[%s7863_s10 + $0x604] ss:$8 sps:$4 sm:$0xff]  }
 0x1cb   : > { %5046 = vmatprep.mubr.bf16.mxu0 %v7052_v52  ;;  %v7065_v52 = vld [vmem:[%s7861_s26 + $0x28] ss:$144 sps:$4 sm:$0xff]  }
 0x1cc   : > { %4583 = vmatpush1.bf16.msra.mxu1 %v6969_v53  ;;  %v7071_v53 = vld [vmem:[%s7861_s26 + $0x70] ss:$144 sps:$4 sm:$0xff]  }
 0x1cd   : > { %5060 = vmatpush1.bf16.msra.mxu0 %v6972_v54  ;;  %4584 = vmatprep.subr.bf16.mxu1 %v6977_v55  ;;  %v7076_v54 = vld [vmem:[%s7863_s10 + $0xf04] ss:$8 sps:$4 sm:$0xff]   ;;  %v7068_v55 = vld [vmem:[%s7863_s10 + $0x600] ss:$8 sps:$4 sm:$0xff]  }
 0x1ce   : > { %5061 = vmatprep.subr.bf16.mxu0 %v6980_v56  ;;  %v7074_v56 = vld [vmem:[%s7863_s10 + $0xf00] ss:$8 sps:$4 sm:$0xff]  }
 0x1cf   : > { %4570 = vmatmul.mubr.bf16.gmra.mrb[4].mxu1 %v7057_v59  ;;  %v7077_v59 = vld [vmem:[%s7863_s10 + $0x610] ss:$8 sps:$4 sm:$0xff]  }
 0x1d0   : > { %5047 = vmatmul.mubr.bf16.gmra.mrb[4].mxu0 %v7058_v60  ;;  %4585 = vmatpush1.bf16.msra.mxu1 %v6975_v57  ;;  %v7079_v57 = vld [vmem:[%s7863_s10 + $0x614] ss:$8 sps:$4 sm:$0xff]   ;;  %v7080_v60 = vld [vmem:[%s7863_s10 + $0xf10] ss:$8 sps:$4 sm:$0xff]  }
 0x1d1   : > { %5062 = vmatpush1.bf16.msra.mxu0 %v6978_v58  ;;  %4586 = vmatprep.subr.bf16.mxu1 %v6983_v61  ;;  %v7082_v58 = vld [vmem:[%s7863_s10 + $0xf14] ss:$8 sps:$4 sm:$0xff]  }
 0x1d2   : > { %5063 = vmatprep.subr.bf16.mxu0 %v6986_v62  ;;  %4612 = vmatprep.mubr.bf16.mxu1 %v7067_v63  ;;  %v7155_v61 = vld [vmem:[%s7861_s26 + $0x14c] ss:$144 sps:$4 sm:$0xff]   ;;  %v7160_v62 = vld [vmem:[%s7861_s26 + $0x194] ss:$144 sps:$4 sm:$0xff]  }
 0x1d3   : > { %5089 = vmatprep.mubr.bf16.mxu0 %v7073_v0  ;;  %v7085_v63 = vld [vmem:[%s7863_s10 + $0x624] ss:$8 sps:$4 sm:$0xff]  }
 0x1d4   : > { %4587 = vmatpush1.bf16.msra.mxu1 %v6981_v1  ;;  %v7088_v0 = vld [vmem:[%s7863_s10 + $0xf24] ss:$8 sps:$4 sm:$0xff]   ;;  %v7165_v1 = vld [vmem:[%s7861_s26 + $0x148] ss:$144 sps:$4 sm:$0xff]  }
 0x1d5   : > { %5064 = vmatpush1.bf16.msra.mxu0 %v6984_v2  ;;  %4588 = vmatprep.subr.bf16.mxu1 %v6989_v3  ;;  %v7166_v2 = vld [vmem:[%s7861_s26 + $0x190] ss:$144 sps:$4 sm:$0xff]  }
 0x1d6   : > { %5065 = vmatprep.subr.bf16.mxu0 %v6992_v4  ;;  %v7083_v3 = vld [vmem:[%s7863_s10 + $0x620] ss:$8 sps:$4 sm:$0xff]  }
 0x1d7   : > { %v7086_v4 = vld [vmem:[%s7863_s10 + $0xf20] ss:$8 sps:$4 sm:$0xff]  }
 0x1d8   : > { %4589 = vmatpush1.bf16.msra.mxu1 %v6987_v5  ;;  %v7091_v5 = vld [vmem:[%s7863_s10 + $0x634] ss:$8 sps:$4 sm:$0xff]  }
 0x1d9   : > { %5066 = vmatpush1.bf16.msra.mxu0 %v6990_v6  ;;  %4590 = vmatprep.subr.bf16.mxu1 %v6995_v7  ;;  %v7094_v6 = vld [vmem:[%s7863_s10 + $0xf34] ss:$8 sps:$4 sm:$0xff]  }
 0x1da   : > { %5067 = vmatprep.subr.bf16.mxu0 %v6998_v8  ;;  %v7175_v7 = vld [vmem:[%s7861_s26 + $0x34] ss:$144 sps:$4 sm:$0xff]   ;;  %v7181_v8 = vld [vmem:[%s7861_s26 + $0x7c] ss:$144 sps:$4 sm:$0xff]  }
 0x1dc   : > { %4591 = vmatpush1.bf16.msra.mxu1 %v6993_v9  ;;  %v7089_v9 = vld [vmem:[%s7863_s10 + $0x630] ss:$8 sps:$4 sm:$0xff]  }
 0x1dd   : > { %5068 = vmatpush1.bf16.msra.mxu0 %v6996_v10  ;;  %4592 = vmatprep.subr.bf16.mxu1 %v7001_v11  ;;  %v7092_v10 = vld [vmem:[%s7863_s10 + $0xf30] ss:$8 sps:$4 sm:$0xff]   ;;  %v7097_v11 = vld [vmem:[%s7863_s10 + $0x644] ss:$8 sps:$4 sm:$0xff]  }
 0x1de   : > { %5069 = vmatprep.subr.bf16.mxu0 %v7004_v12  ;;  %v7100_v12 = vld [vmem:[%s7863_s10 + $0xf44] ss:$8 sps:$4 sm:$0xff]  }
 0x1e0   : > { %4593 = vmatpush1.bf16.msra.mxu1 %v6999_v13  ;;  %v7095_v13 = vld [vmem:[%s7863_s10 + $0x640] ss:$8 sps:$4 sm:$0xff]  }
 0x1e1   : > { %5070 = vmatpush1.bf16.msra.mxu0 %v7002_v14  ;;  %4594 = vmatprep.subr.bf16.mxu1 %v7007_v15  ;;  %v7098_v14 = vld [vmem:[%s7863_s10 + $0xf40] ss:$8 sps:$4 sm:$0xff]   ;;  %v7103_v15 = vld [vmem:[%s7863_s10 + $0x654] ss:$8 sps:$4 sm:$0xff]  }
 0x1e2   : > { %5071 = vmatprep.subr.bf16.mxu0 %v7010_v16  ;;  %v7106_v16 = vld [vmem:[%s7863_s10 + $0xf54] ss:$8 sps:$4 sm:$0xff]  }
 0x1e4   : > { %4595 = vmatpush1.bf16.msra.mxu1 %v7005_v17  ;;  %v7101_v17 = vld [vmem:[%s7863_s10 + $0x650] ss:$8 sps:$4 sm:$0xff]  }
 0x1e5   : > { %5072 = vmatpush1.bf16.msra.mxu0 %v7008_v18  ;;  %4596 = vmatprep.subr.bf16.mxu1 %v7013_v19  ;;  %v7104_v18 = vld [vmem:[%s7863_s10 + $0xf50] ss:$8 sps:$4 sm:$0xff]   ;;  %v7109_v19 = vld [vmem:[%s7863_s10 + $0x664] ss:$8 sps:$4 sm:$0xff]  }
 0x1e6   : > { %5073 = vmatprep.subr.bf16.mxu0 %v7016_v20  ;;  %v7112_v20 = vld [vmem:[%s7863_s10 + $0xf64] ss:$8 sps:$4 sm:$0xff]  }
 0x1e8   : > { %4597 = vmatpush1.bf16.msra.mxu1 %v7011_v21  ;;  %v7107_v21 = vld [vmem:[%s7863_s10 + $0x660] ss:$8 sps:$4 sm:$0xff]  }
 0x1e9   : > { %5074 = vmatpush1.bf16.msra.mxu0 %v7014_v22  ;;  %4598 = vmatprep.subr.bf16.mxu1 %v7019_v23  ;;  %v7110_v22 = vld [vmem:[%s7863_s10 + $0xf60] ss:$8 sps:$4 sm:$0xff]   ;;  %v7115_v23 = vld [vmem:[%s7863_s10 + $0x674] ss:$8 sps:$4 sm:$0xff]  }
 0x1ea   : > { %5075 = vmatprep.subr.bf16.mxu0 %v7022_v24  ;;  %v7118_v24 = vld [vmem:[%s7863_s10 + $0xf74] ss:$8 sps:$4 sm:$0xff]  }
 0x1ec   : > { %4599 = vmatpush1.bf16.msra.mxu1 %v7017_v25  ;;  %v7113_v25 = vld [vmem:[%s7863_s10 + $0x670] ss:$8 sps:$4 sm:$0xff]  }
 0x1ed   : > { %5076 = vmatpush1.bf16.msra.mxu0 %v7020_v26  ;;  %4600 = vmatprep.subr.bf16.mxu1 %v7025_v27  ;;  %v7116_v26 = vld [vmem:[%s7863_s10 + $0xf70] ss:$8 sps:$4 sm:$0xff]   ;;  %v7121_v27 = vld [vmem:[%s7863_s10 + $0x684] ss:$8 sps:$4 sm:$0xff]  }
 0x1ee   : > { %5077 = vmatprep.subr.bf16.mxu0 %v7028_v28  ;;  %v7124_v28 = vld [vmem:[%s7863_s10 + $0xf84] ss:$8 sps:$4 sm:$0xff]  }
 0x1f0   : > { %4601 = vmatpush1.bf16.msra.mxu1 %v7023_v29  ;;  %v7119_v29 = vld [vmem:[%s7863_s10 + $0x680] ss:$8 sps:$4 sm:$0xff]  }
 0x1f1   : > { %5078 = vmatpush1.bf16.msra.mxu0 %v7026_v30  ;;  %4602 = vmatprep.subr.bf16.mxu1 %v7031_v31  ;;  %v7122_v30 = vld [vmem:[%s7863_s10 + $0xf80] ss:$8 sps:$4 sm:$0xff]   ;;  %v7127_v31 = vld [vmem:[%s7863_s10 + $0x694] ss:$8 sps:$4 sm:$0xff]  }
 0x1f2   : > { %5079 = vmatprep.subr.bf16.mxu0 %v7034_v32  ;;  %v7130_v32 = vld [vmem:[%s7863_s10 + $0xf94] ss:$8 sps:$4 sm:$0xff]  }
 0x1f4   : > { %4603 = vmatpush1.bf16.msra.mxu1 %v7029_v33  ;;  %v7125_v33 = vld [vmem:[%s7863_s10 + $0x690] ss:$8 sps:$4 sm:$0xff]  }
 0x1f5   : > { %5080 = vmatpush1.bf16.msra.mxu0 %v7032_v34  ;;  %4604 = vmatprep.subr.bf16.mxu1 %v7037_v35  ;;  %v7128_v34 = vld [vmem:[%s7863_s10 + $0xf90] ss:$8 sps:$4 sm:$0xff]   ;;  %v7133_v35 = vld [vmem:[%s7863_s10 + $0x6a4] ss:$8 sps:$4 sm:$0xff]  }
 0x1f6   : > { %5081 = vmatprep.subr.bf16.mxu0 %v7040_v36  ;;  %v7136_v36 = vld [vmem:[%s7863_s10 + $0xfa4] ss:$8 sps:$4 sm:$0xff]  }
 0x1f8   : > { %4605 = vmatpush1.bf16.msra.mxu1 %v7035_v37  ;;  %v7131_v37 = vld [vmem:[%s7863_s10 + $0x6a0] ss:$8 sps:$4 sm:$0xff]  }
 0x1f9   : > { %5082 = vmatpush1.bf16.msra.mxu0 %v7038_v38  ;;  %4606 = vmatprep.subr.bf16.mxu1 %v7043_v39  ;;  %v7134_v38 = vld [vmem:[%s7863_s10 + $0xfa0] ss:$8 sps:$4 sm:$0xff]   ;;  %v7139_v39 = vld [vmem:[%s7863_s10 + $0x6b4] ss:$8 sps:$4 sm:$0xff]  }
 0x1fa   : > { %5083 = vmatprep.subr.bf16.mxu0 %v7046_v40  ;;  %v7142_v40 = vld [vmem:[%s7863_s10 + $0xfb4] ss:$8 sps:$4 sm:$0xff]  }
 0x1fc   : > { %4607 = vmatpush1.bf16.msra.mxu1 %v7041_v41  ;;  %v7137_v41 = vld [vmem:[%s7863_s10 + $0x6b0] ss:$8 sps:$4 sm:$0xff]  }
 0x1fd   : > { %5084 = vmatpush1.bf16.msra.mxu0 %v7044_v42  ;;  %4608 = vmatprep.subr.bf16.mxu1 %v7051_v43  ;;  %v7140_v42 = vld [vmem:[%s7863_s10 + $0xfb0] ss:$8 sps:$4 sm:$0xff]   ;;  %v7145_v43 = vld [vmem:[%s7863_s10 + $0x6c4] ss:$8 sps:$4 sm:$0xff]  }
 0x1fe   : > { %5085 = vmatprep.subr.bf16.mxu0 %v7056_v44  ;;  %v7148_v44 = vld [vmem:[%s7863_s10 + $0xfc4] ss:$8 sps:$4 sm:$0xff]  }
 0x200   : > { %4609 = vmatpush1.bf16.msra.mxu1 %v7049_v45  ;;  %v7143_v45 = vld [vmem:[%s7863_s10 + $0x6c0] ss:$8 sps:$4 sm:$0xff]  }
 0x201   : > { %5086 = vmatpush1.bf16.msra.mxu0 %v7054_v46  ;;  %4610 = vmatprep.subr.bf16.mxu1 %v7061_v47  ;;  %v7146_v46 = vld [vmem:[%s7863_s10 + $0xfc0] ss:$8 sps:$4 sm:$0xff]   ;;  %v7151_v47 = vld [vmem:[%s7863_s10 + $0x6d4] ss:$8 sps:$4 sm:$0xff]  }
 0x202   : > { %5087 = vmatprep.subr.bf16.mxu0 %v7064_v48  ;;  %v7154_v48 = vld [vmem:[%s7863_s10 + $0xfd4] ss:$8 sps:$4 sm:$0xff]  }
 0x204   : > { %4611 = vmatpush1.bf16.msra.mxu1 %v7059_v49  ;;  %v7149_v49 = vld [vmem:[%s7863_s10 + $0x6d0] ss:$8 sps:$4 sm:$0xff]  }
 0x205   : > { %5088 = vmatpush1.bf16.msra.mxu0 %v7062_v50  ;;  %4633 = vmatprep.subr.bf16.mxu1 %v7070_v51  ;;  %v7152_v50 = vld [vmem:[%s7863_s10 + $0xfd0] ss:$8 sps:$4 sm:$0xff]   ;;  %v7159_v51 = vld [vmem:[%s7863_s10 + $0x6e4] ss:$8 sps:$4 sm:$0xff]  }
 0x206   : > { %5110 = vmatprep.subr.bf16.mxu0 %v7076_v54  ;;  %v7162_v54 = vld [vmem:[%s7863_s10 + $0xfe0] ss:$8 sps:$4 sm:$0xff]  }
 0x207   : > { %4613 = vmatmul.mubr.bf16.vlgmr.msra.gmra.mrb[0].mxu1 %v7065_v52  ;;  %v7164_v52 = vld [vmem:[%s7863_s10 + $0xfe4] ss:$8 sps:$4 sm:$0xff]  }
 0x208   : > { %5090 = vmatmul.mubr.bf16.vlgmr.msra.gmra.mrb[0].mxu0 %v7071_v53  ;;  %4634 = vmatpush1.bf16.msra.mxu1 %v7068_v55  ;;  %v7157_v53 = vld [vmem:[%s7863_s10 + $0x6e0] ss:$8 sps:$4 sm:$0xff]   ;;  %v7169_v55 = vld [vmem:[%s7863_s10 + $0x6f4] ss:$8 sps:$4 sm:$0xff]  }
 0x209   : > { %5111 = vmatpush1.bf16.msra.mxu0 %v7074_v56  ;;  %4635 = vmatprep.subr.bf16.mxu1 %v7079_v57  ;;  %v7172_v56 = vld [vmem:[%s7863_s10 + $0xff4] ss:$8 sps:$4 sm:$0xff]   ;;  %v7167_v57 = vld [vmem:[%s7863_s10 + $0x6f0] ss:$8 sps:$4 sm:$0xff]  }
 0x20a   : > { %5112 = vmatprep.subr.bf16.mxu0 %v7082_v58  ;;  %4622 = vmatprep.mubr.bf16.mxu1 %v7155_v61  ;;  %v7170_v58 = vld [vmem:[%s7863_s10 + $0xff0] ss:$8 sps:$4 sm:$0xff]  }
 0x20b   : > { %5099 = vmatprep.mubr.bf16.mxu0 %v7160_v62  ;;  %v7173_v61 = vld [vmem:[%s7861_s26 + $0x30] ss:$144 sps:$4 sm:$0xff]   ;;  %v7179_v62 = vld [vmem:[%s7861_s26 + $0x78] ss:$144 sps:$4 sm:$0xff]  }
 0x20c   : > { %4636 = vmatpush1.bf16.msra.mxu1 %v7077_v59  ;;  %v7178_v59 = vld [vmem:[%s7863_s10 + $0x704] ss:$8 sps:$4 sm:$0xff]  }
 0x20d   : > { %5113 = vmatpush1.bf16.msra.mxu0 %v7080_v60  ;;  %4637 = vmatprep.subr.bf16.mxu1 %v7085_v63  ;;  %v7184_v60 = vld [vmem:[%s7863_s10 + $0x1004] ss:$8 sps:$4 sm:$0xff]   ;;  %v7176_v63 = vld [vmem:[%s7863_s10 + $0x700] ss:$8 sps:$4 sm:$0xff]  }
 0x20e   : > { %5114 = vmatprep.subr.bf16.mxu0 %v7088_v0  ;;  %v7182_v0 = vld [vmem:[%s7863_s10 + $0x1000] ss:$8 sps:$4 sm:$0xff]  }
 0x20f   : > { %4623 = vmatmul.mubr.bf16.gmra.mrb[4].mxu1 %v7165_v1  ;;  %v7187_v1 = vld [vmem:[%s7863_s10 + $0x714] ss:$8 sps:$4 sm:$0xff]  }
 0x210   : > { %5100 = vmatmul.mubr.bf16.gmra.mrb[4].mxu0 %v7166_v2  ;;  %4638 = vmatpush1.bf16.msra.mxu1 %v7083_v3  ;;  %v7190_v2 = vld [vmem:[%s7863_s10 + $0x1014] ss:$8 sps:$4 sm:$0xff]  }
 0x211   : > { %5115 = vmatpush1.bf16.msra.mxu0 %v7086_v4  ;;  %4639 = vmatprep.subr.bf16.mxu1 %v7091_v5  ;;  %v7263_v3 = vld [vmem:[%s7861_s26 + $0x154] ss:$144 sps:$4 sm:$0xff]   ;;  %v7268_v4 = vld [vmem:[%s7861_s26 + $0x19c] ss:$144 sps:$4 sm:$0xff]   ;;  %v7185_v5 = vld [vmem:[%s7863_s10 + $0x710] ss:$8 sps:$4 sm:$0xff]  }
 0x212   : > { %5116 = vmatprep.subr.bf16.mxu0 %v7094_v6  ;;  %4665 = vmatprep.mubr.bf16.mxu1 %v7175_v7  ;;  %v7188_v6 = vld [vmem:[%s7863_s10 + $0x1010] ss:$8 sps:$4 sm:$0xff]   ;;  %v7193_v7 = vld [vmem:[%s7863_s10 + $0x724] ss:$8 sps:$4 sm:$0xff]  }
 0x213   : > { %5142 = vmatprep.mubr.bf16.mxu0 %v7181_v8  ;;  %v7196_v8 = vld [vmem:[%s7863_s10 + $0x1024] ss:$8 sps:$4 sm:$0xff]  }
 0x214   : > { %4640 = vmatpush1.bf16.msra.mxu1 %v7089_v9  ;;  %v7273_v9 = vld [vmem:[%s7861_s26 + $0x150] ss:$144 sps:$4 sm:$0xff]  }
 0x215   : > { %5117 = vmatpush1.bf16.msra.mxu0 %v7092_v10  ;;  %4641 = vmatprep.subr.bf16.mxu1 %v7097_v11  ;;  %v7274_v10 = vld [vmem:[%s7861_s26 + $0x198] ss:$144 sps:$4 sm:$0xff]  }
 0x216   : > { %5118 = vmatprep.subr.bf16.mxu0 %v7100_v12  ;;  %v7191_v11 = vld [vmem:[%s7863_s10 + $0x720] ss:$8 sps:$4 sm:$0xff]  }
 0x217   : > { %v7194_v12 = vld [vmem:[%s7863_s10 + $0x1020] ss:$8 sps:$4 sm:$0xff]  }
 0x218   : > { %4642 = vmatpush1.bf16.msra.mxu1 %v7095_v13  ;;  %v7199_v13 = vld [vmem:[%s7863_s10 + $0x734] ss:$8 sps:$4 sm:$0xff]  }
 0x219   : > { %5119 = vmatpush1.bf16.msra.mxu0 %v7098_v14  ;;  %4643 = vmatprep.subr.bf16.mxu1 %v7103_v15  ;;  %v7202_v14 = vld [vmem:[%s7863_s10 + $0x1034] ss:$8 sps:$4 sm:$0xff]  }
 0x21a   : > { %5120 = vmatprep.subr.bf16.mxu0 %v7106_v16  ;;  %v7283_v15 = vld [vmem:[%s7861_s26 + $0x3c] ss:$144 sps:$4 sm:$0xff]   ;;  %v7289_v16 = vld [vmem:[%s7861_s26 + $0x84] ss:$144 sps:$4 sm:$0xff]  }
 0x21c   : > { %4644 = vmatpush1.bf16.msra.mxu1 %v7101_v17  ;;  %v7197_v17 = vld [vmem:[%s7863_s10 + $0x730] ss:$8 sps:$4 sm:$0xff]  }
 0x21d   : > { %5121 = vmatpush1.bf16.msra.mxu0 %v7104_v18  ;;  %4645 = vmatprep.subr.bf16.mxu1 %v7109_v19  ;;  %v7200_v18 = vld [vmem:[%s7863_s10 + $0x1030] ss:$8 sps:$4 sm:$0xff]   ;;  %v7205_v19 = vld [vmem:[%s7863_s10 + $0x744] ss:$8 sps:$4 sm:$0xff]  }
 0x21e   : > { %5122 = vmatprep.subr.bf16.mxu0 %v7112_v20  ;;  %v7208_v20 = vld [vmem:[%s7863_s10 + $0x1044] ss:$8 sps:$4 sm:$0xff]  }
 0x220   : > { %4646 = vmatpush1.bf16.msra.mxu1 %v7107_v21  ;;  %v7203_v21 = vld [vmem:[%s7863_s10 + $0x740] ss:$8 sps:$4 sm:$0xff]  }
 0x221   : > { %5123 = vmatpush1.bf16.msra.mxu0 %v7110_v22  ;;  %4647 = vmatprep.subr.bf16.mxu1 %v7115_v23  ;;  %v7206_v22 = vld [vmem:[%s7863_s10 + $0x1040] ss:$8 sps:$4 sm:$0xff]   ;;  %v7211_v23 = vld [vmem:[%s7863_s10 + $0x754] ss:$8 sps:$4 sm:$0xff]  }
 0x222   : > { %5124 = vmatprep.subr.bf16.mxu0 %v7118_v24  ;;  %v7214_v24 = vld [vmem:[%s7863_s10 + $0x1054] ss:$8 sps:$4 sm:$0xff]  }
 0x224   : > { %4648 = vmatpush1.bf16.msra.mxu1 %v7113_v25  ;;  %v7209_v25 = vld [vmem:[%s7863_s10 + $0x750] ss:$8 sps:$4 sm:$0xff]  }
 0x225   : > { %5125 = vmatpush1.bf16.msra.mxu0 %v7116_v26  ;;  %4649 = vmatprep.subr.bf16.mxu1 %v7121_v27  ;;  %v7212_v26 = vld [vmem:[%s7863_s10 + $0x1050] ss:$8 sps:$4 sm:$0xff]   ;;  %v7217_v27 = vld [vmem:[%s7863_s10 + $0x764] ss:$8 sps:$4 sm:$0xff]  }
 0x226   : > { %5126 = vmatprep.subr.bf16.mxu0 %v7124_v28  ;;  %v7220_v28 = vld [vmem:[%s7863_s10 + $0x1064] ss:$8 sps:$4 sm:$0xff]  }
 0x228   : > { %4650 = vmatpush1.bf16.msra.mxu1 %v7119_v29  ;;  %v7215_v29 = vld [vmem:[%s7863_s10 + $0x760] ss:$8 sps:$4 sm:$0xff]  }
 0x229   : > { %5127 = vmatpush1.bf16.msra.mxu0 %v7122_v30  ;;  %4651 = vmatprep.subr.bf16.mxu1 %v7127_v31  ;;  %v7218_v30 = vld [vmem:[%s7863_s10 + $0x1060] ss:$8 sps:$4 sm:$0xff]   ;;  %v7223_v31 = vld [vmem:[%s7863_s10 + $0x774] ss:$8 sps:$4 sm:$0xff]  }
 0x22a   : > { %5128 = vmatprep.subr.bf16.mxu0 %v7130_v32  ;;  %v7226_v32 = vld [vmem:[%s7863_s10 + $0x1074] ss:$8 sps:$4 sm:$0xff]  }
 0x22c   : > { %4652 = vmatpush1.bf16.msra.mxu1 %v7125_v33  ;;  %v7221_v33 = vld [vmem:[%s7863_s10 + $0x770] ss:$8 sps:$4 sm:$0xff]  }
 0x22d   : > { %5129 = vmatpush1.bf16.msra.mxu0 %v7128_v34  ;;  %4653 = vmatprep.subr.bf16.mxu1 %v7133_v35  ;;  %v7224_v34 = vld [vmem:[%s7863_s10 + $0x1070] ss:$8 sps:$4 sm:$0xff]   ;;  %v7229_v35 = vld [vmem:[%s7863_s10 + $0x784] ss:$8 sps:$4 sm:$0xff]  }
 0x22e   : > { %5130 = vmatprep.subr.bf16.mxu0 %v7136_v36  ;;  %v7232_v36 = vld [vmem:[%s7863_s10 + $0x1084] ss:$8 sps:$4 sm:$0xff]  }
 0x230   : > { %4654 = vmatpush1.bf16.msra.mxu1 %v7131_v37  ;;  %v7227_v37 = vld [vmem:[%s7863_s10 + $0x780] ss:$8 sps:$4 sm:$0xff]  }
 0x231   : > { %5131 = vmatpush1.bf16.msra.mxu0 %v7134_v38  ;;  %4655 = vmatprep.subr.bf16.mxu1 %v7139_v39  ;;  %v7230_v38 = vld [vmem:[%s7863_s10 + $0x1080] ss:$8 sps:$4 sm:$0xff]   ;;  %v7235_v39 = vld [vmem:[%s7863_s10 + $0x794] ss:$8 sps:$4 sm:$0xff]  }
 0x232   : > { %5132 = vmatprep.subr.bf16.mxu0 %v7142_v40  ;;  %v7238_v40 = vld [vmem:[%s7863_s10 + $0x1094] ss:$8 sps:$4 sm:$0xff]  }
 0x234   : > { %4656 = vmatpush1.bf16.msra.mxu1 %v7137_v41  ;;  %v7233_v41 = vld [vmem:[%s7863_s10 + $0x790] ss:$8 sps:$4 sm:$0xff]  }
 0x235   : > { %5133 = vmatpush1.bf16.msra.mxu0 %v7140_v42  ;;  %4657 = vmatprep.subr.bf16.mxu1 %v7145_v43  ;;  %v7236_v42 = vld [vmem:[%s7863_s10 + $0x1090] ss:$8 sps:$4 sm:$0xff]   ;;  %v7241_v43 = vld [vmem:[%s7863_s10 + $0x7a4] ss:$8 sps:$4 sm:$0xff]  }
 0x236   : > { %5134 = vmatprep.subr.bf16.mxu0 %v7148_v44  ;;  %v7244_v44 = vld [vmem:[%s7863_s10 + $0x10a4] ss:$8 sps:$4 sm:$0xff]  }
 0x238   : > { %4658 = vmatpush1.bf16.msra.mxu1 %v7143_v45  ;;  %v7239_v45 = vld [vmem:[%s7863_s10 + $0x7a0] ss:$8 sps:$4 sm:$0xff]  }
 0x239   : > { %5135 = vmatpush1.bf16.msra.mxu0 %v7146_v46  ;;  %4659 = vmatprep.subr.bf16.mxu1 %v7151_v47  ;;  %v7242_v46 = vld [vmem:[%s7863_s10 + $0x10a0] ss:$8 sps:$4 sm:$0xff]   ;;  %v7247_v47 = vld [vmem:[%s7863_s10 + $0x7b4] ss:$8 sps:$4 sm:$0xff]  }
 0x23a   : > { %5136 = vmatprep.subr.bf16.mxu0 %v7154_v48  ;;  %v7250_v48 = vld [vmem:[%s7863_s10 + $0x10b4] ss:$8 sps:$4 sm:$0xff]  }
 0x23c   : > { %4660 = vmatpush1.bf16.msra.mxu1 %v7149_v49  ;;  %v7245_v49 = vld [vmem:[%s7863_s10 + $0x7b0] ss:$8 sps:$4 sm:$0xff]  }
 0x23d   : > { %5137 = vmatpush1.bf16.msra.mxu0 %v7152_v50  ;;  %4661 = vmatprep.subr.bf16.mxu1 %v7159_v51  ;;  %v7248_v50 = vld [vmem:[%s7863_s10 + $0x10b0] ss:$8 sps:$4 sm:$0xff]   ;;  %v7253_v51 = vld [vmem:[%s7863_s10 + $0x7c4] ss:$8 sps:$4 sm:$0xff]  }
 0x23e   : > { %5138 = vmatprep.subr.bf16.mxu0 %v7164_v52  ;;  %v7256_v52 = vld [vmem:[%s7863_s10 + $0x10c4] ss:$8 sps:$4 sm:$0xff]  }
 0x240   : > { %4662 = vmatpush1.bf16.msra.mxu1 %v7157_v53  ;;  %v7251_v53 = vld [vmem:[%s7863_s10 + $0x7c0] ss:$8 sps:$4 sm:$0xff]  }
 0x241   : > { %5139 = vmatpush1.bf16.msra.mxu0 %v7162_v54  ;;  %4663 = vmatprep.subr.bf16.mxu1 %v7169_v55  ;;  %v7254_v54 = vld [vmem:[%s7863_s10 + $0x10c0] ss:$8 sps:$4 sm:$0xff]   ;;  %v7259_v55 = vld [vmem:[%s7863_s10 + $0x7d4] ss:$8 sps:$4 sm:$0xff]  }
 0x242   : > { %5140 = vmatprep.subr.bf16.mxu0 %v7172_v56  ;;  %v7262_v56 = vld [vmem:[%s7863_s10 + $0x10d4] ss:$8 sps:$4 sm:$0xff]  }
 0x244   : > { %4664 = vmatpush1.bf16.msra.mxu1 %v7167_v57  ;;  %v7257_v57 = vld [vmem:[%s7863_s10 + $0x7d0] ss:$8 sps:$4 sm:$0xff]  }
 0x245   : > { %5141 = vmatpush1.bf16.msra.mxu0 %v7170_v58  ;;  %4686 = vmatprep.subr.bf16.mxu1 %v7178_v59  ;;  %v7260_v58 = vld [vmem:[%s7863_s10 + $0x10d0] ss:$8 sps:$4 sm:$0xff]   ;;  %v7267_v59 = vld [vmem:[%s7863_s10 + $0x7e4] ss:$8 sps:$4 sm:$0xff]  }
 0x246   : > { %5163 = vmatprep.subr.bf16.mxu0 %v7184_v60  ;;  %v7272_v60 = vld [vmem:[%s7863_s10 + $0x10e4] ss:$8 sps:$4 sm:$0xff]  }
 0x247   : > { %4666 = vmatmul.mubr.bf16.vlgmr.msra.gmra.mrb[0].mxu1 %v7173_v61  ;;  %v7265_v61 = vld [vmem:[%s7863_s10 + $0x7e0] ss:$8 sps:$4 sm:$0xff]  }
 0x248   : > { %5143 = vmatmul.mubr.bf16.vlgmr.msra.gmra.mrb[0].mxu0 %v7179_v62  ;;  %4687 = vmatpush1.bf16.msra.mxu1 %v7176_v63  ;;  %v7270_v62 = vld [vmem:[%s7863_s10 + $0x10e0] ss:$8 sps:$4 sm:$0xff]   ;;  %v7277_v63 = vld [vmem:[%s7863_s10 + $0x7f4] ss:$8 sps:$4 sm:$0xff]  }
 0x249   : > { %5164 = vmatpush1.bf16.msra.mxu0 %v7182_v0  ;;  %4688 = vmatprep.subr.bf16.mxu1 %v7187_v1  ;;  %v7280_v0 = vld [vmem:[%s7863_s10 + $0x10f4] ss:$8 sps:$4 sm:$0xff]   ;;  %v7275_v1 = vld [vmem:[%s7863_s10 + $0x7f0] ss:$8 sps:$4 sm:$0xff]  }
 0x24a   : > { %5165 = vmatprep.subr.bf16.mxu0 %v7190_v2  ;;  %4675 = vmatprep.mubr.bf16.mxu1 %v7263_v3  ;;  %v7278_v2 = vld [vmem:[%s7863_s10 + $0x10f0] ss:$8 sps:$4 sm:$0xff]   ;;  %v7286_v3 = vld [vmem:[%s7863_s10 + $0x804] ss:$8 sps:$4 sm:$0xff]  }
 0x24b   : > { %5152 = vmatprep.mubr.bf16.mxu0 %v7268_v4  ;;  %v7292_v4 = vld [vmem:[%s7863_s10 + $0x1104] ss:$8 sps:$4 sm:$0xff]  }
 0x24c   : > { %4689 = vmatpush1.bf16.msra.mxu1 %v7185_v5  ;;  %v7281_v5 = vld [vmem:[%s7861_s26 + $0x38] ss:$144 sps:$4 sm:$0xff]  }
 0x24d   : > { %5166 = vmatpush1.bf16.msra.mxu0 %v7188_v6  ;;  %4690 = vmatprep.subr.bf16.mxu1 %v7193_v7  ;;  %v7287_v6 = vld [vmem:[%s7861_s26 + $0x80] ss:$144 sps:$4 sm:$0xff]  }
 0x24e   : > { %5167 = vmatprep.subr.bf16.mxu0 %v7196_v8  ;;  %v7284_v7 = vld [vmem:[%s7863_s10 + $0x800] ss:$8 sps:$4 sm:$0xff]  }
 0x24f   : > { %4676 = vmatmul.mubr.bf16.gmra.mrb[4].mxu1 %v7273_v9  ;;  %v7290_v8 = vld [vmem:[%s7863_s10 + $0x1100] ss:$8 sps:$4 sm:$0xff]   ;;  %v7295_v9 = vld [vmem:[%s7863_s10 + $0x814] ss:$8 sps:$4 sm:$0xff]  }
 0x250   : > { %5153 = vmatmul.mubr.bf16.gmra.mrb[4].mxu0 %v7274_v10  ;;  %4691 = vmatpush1.bf16.msra.mxu1 %v7191_v11  ;;  %v7298_v10 = vld [vmem:[%s7863_s10 + $0x1114] ss:$8 sps:$4 sm:$0xff]  }
 0x251   : > { %5168 = vmatpush1.bf16.msra.mxu0 %v7194_v12  ;;  %4692 = vmatprep.subr.bf16.mxu1 %v7199_v13  ;;  %v7371_v11 = vld [vmem:[%s7861_s26 + $0x15c] ss:$144 sps:$4 sm:$0xff]   ;;  %v7373_v12 = vld [vmem:[%s7861_s26 + $0x1a4] ss:$144 sps:$4 sm:$0xff]   ;;  %v7293_v13 = vld [vmem:[%s7863_s10 + $0x810] ss:$8 sps:$4 sm:$0xff]  }
 0x252   : > { %5169 = vmatprep.subr.bf16.mxu0 %v7202_v14  ;;  %4718 = vmatprep.mubr.bf16.mxu1 %v7283_v15  ;;  %v7296_v14 = vld [vmem:[%s7863_s10 + $0x1110] ss:$8 sps:$4 sm:$0xff]   ;;  %v7301_v15 = vld [vmem:[%s7863_s10 + $0x824] ss:$8 sps:$4 sm:$0xff]  }
 0x253   : > { %5195 = vmatprep.mubr.bf16.mxu0 %v7289_v16  ;;  %v7304_v16 = vld [vmem:[%s7863_s10 + $0x1124] ss:$8 sps:$4 sm:$0xff]  }
 0x254   : > { %4693 = vmatpush1.bf16.msra.mxu1 %v7197_v17  ;;  %v7375_v17 = vld [vmem:[%s7861_s26 + $0x158] ss:$144 sps:$4 sm:$0xff]  }
 0x255   : > { %5170 = vmatpush1.bf16.msra.mxu0 %v7200_v18  ;;  %4694 = vmatprep.subr.bf16.mxu1 %v7205_v19  ;;  %v7379_v18 = vld [vmem:[%s7861_s26 + $0x1a0] ss:$144 sps:$4 sm:$0xff]  }
 0x256   : > { %5171 = vmatprep.subr.bf16.mxu0 %v7208_v20  ;;  %v7299_v19 = vld [vmem:[%s7863_s10 + $0x820] ss:$8 sps:$4 sm:$0xff]  }
 0x257   : > { %v7302_v20 = vld [vmem:[%s7863_s10 + $0x1120] ss:$8 sps:$4 sm:$0xff]  }
 0x258   : > { %4695 = vmatpush1.bf16.msra.mxu1 %v7203_v21  ;;  %v7307_v21 = vld [vmem:[%s7863_s10 + $0x834] ss:$8 sps:$4 sm:$0xff]  }
 0x259   : > { %5172 = vmatpush1.bf16.msra.mxu0 %v7206_v22  ;;  %4696 = vmatprep.subr.bf16.mxu1 %v7211_v23  ;;  %v7310_v22 = vld [vmem:[%s7863_s10 + $0x1134] ss:$8 sps:$4 sm:$0xff]  }
 0x25a   : > { %5173 = vmatprep.subr.bf16.mxu0 %v7214_v24  ;;  %v7391_v23 = vld [vmem:[%s7861_s26 + $0x44] ss:$144 sps:$4 sm:$0xff]   ;;  %v7394_v24 = vld [vmem:[%s7861_s26 + $0x8c] ss:$144 sps:$4 sm:$0xff]  }
 0x25c   : > { %4697 = vmatpush1.bf16.msra.mxu1 %v7209_v25  ;;  %v7305_v25 = vld [vmem:[%s7863_s10 + $0x830] ss:$8 sps:$4 sm:$0xff]  }
 0x25d   : > { %5174 = vmatpush1.bf16.msra.mxu0 %v7212_v26  ;;  %4698 = vmatprep.subr.bf16.mxu1 %v7217_v27  ;;  %v7308_v26 = vld [vmem:[%s7863_s10 + $0x1130] ss:$8 sps:$4 sm:$0xff]   ;;  %v7313_v27 = vld [vmem:[%s7863_s10 + $0x844] ss:$8 sps:$4 sm:$0xff]  }
 0x25e   : > { %5175 = vmatprep.subr.bf16.mxu0 %v7220_v28  ;;  %v7316_v28 = vld [vmem:[%s7863_s10 + $0x1144] ss:$8 sps:$4 sm:$0xff]  }
 0x260   : > { %4699 = vmatpush1.bf16.msra.mxu1 %v7215_v29  ;;  %v7311_v29 = vld [vmem:[%s7863_s10 + $0x840] ss:$8 sps:$4 sm:$0xff]  }
 0x261   : > { %5176 = vmatpush1.bf16.msra.mxu0 %v7218_v30  ;;  %4700 = vmatprep.subr.bf16.mxu1 %v7223_v31  ;;  %v7314_v30 = vld [vmem:[%s7863_s10 + $0x1140] ss:$8 sps:$4 sm:$0xff]   ;;  %v7319_v31 = vld [vmem:[%s7863_s10 + $0x854] ss:$8 sps:$4 sm:$0xff]  }
 0x262   : > { %5177 = vmatprep.subr.bf16.mxu0 %v7226_v32  ;;  %v7322_v32 = vld [vmem:[%s7863_s10 + $0x1154] ss:$8 sps:$4 sm:$0xff]  }
 0x264   : > { %4701 = vmatpush1.bf16.msra.mxu1 %v7221_v33  ;;  %v7317_v33 = vld [vmem:[%s7863_s10 + $0x850] ss:$8 sps:$4 sm:$0xff]  }
 0x265   : > { %5178 = vmatpush1.bf16.msra.mxu0 %v7224_v34  ;;  %4702 = vmatprep.subr.bf16.mxu1 %v7229_v35  ;;  %v7320_v34 = vld [vmem:[%s7863_s10 + $0x1150] ss:$8 sps:$4 sm:$0xff]   ;;  %v7325_v35 = vld [vmem:[%s7863_s10 + $0x864] ss:$8 sps:$4 sm:$0xff]  }
 0x266   : > { %5179 = vmatprep.subr.bf16.mxu0 %v7232_v36  ;;  %v7328_v36 = vld [vmem:[%s7863_s10 + $0x1164] ss:$8 sps:$4 sm:$0xff]  }
 0x268   : > { %4703 = vmatpush1.bf16.msra.mxu1 %v7227_v37  ;;  %v7323_v37 = vld [vmem:[%s7863_s10 + $0x860] ss:$8 sps:$4 sm:$0xff]  }
 0x269   : > { %5180 = vmatpush1.bf16.msra.mxu0 %v7230_v38  ;;  %4704 = vmatprep.subr.bf16.mxu1 %v7235_v39  ;;  %v7326_v38 = vld [vmem:[%s7863_s10 + $0x1160] ss:$8 sps:$4 sm:$0xff]   ;;  %v7331_v39 = vld [vmem:[%s7863_s10 + $0x874] ss:$8 sps:$4 sm:$0xff]  }
 0x26a   : > { %5181 = vmatprep.subr.bf16.mxu0 %v7238_v40  ;;  %v7334_v40 = vld [vmem:[%s7863_s10 + $0x1174] ss:$8 sps:$4 sm:$0xff]  }
 0x26c   : > { %4705 = vmatpush1.bf16.msra.mxu1 %v7233_v41  ;;  %v7329_v41 = vld [vmem:[%s7863_s10 + $0x870] ss:$8 sps:$4 sm:$0xff]  }
 0x26d   : > { %5182 = vmatpush1.bf16.msra.mxu0 %v7236_v42  ;;  %4706 = vmatprep.subr.bf16.mxu1 %v7241_v43  ;;  %v7332_v42 = vld [vmem:[%s7863_s10 + $0x1170] ss:$8 sps:$4 sm:$0xff]   ;;  %v7337_v43 = vld [vmem:[%s7863_s10 + $0x884] ss:$8 sps:$4 sm:$0xff]  }
 0x26e   : > { %5183 = vmatprep.subr.bf16.mxu0 %v7244_v44  ;;  %v7340_v44 = vld [vmem:[%s7863_s10 + $0x1184] ss:$8 sps:$4 sm:$0xff]  }
 0x270   : > { %4707 = vmatpush1.bf16.msra.mxu1 %v7239_v45  ;;  %v7335_v45 = vld [vmem:[%s7863_s10 + $0x880] ss:$8 sps:$4 sm:$0xff]  }
 0x271   : > { %5184 = vmatpush1.bf16.msra.mxu0 %v7242_v46  ;;  %4708 = vmatprep.subr.bf16.mxu1 %v7247_v47  ;;  %v7338_v46 = vld [vmem:[%s7863_s10 + $0x1180] ss:$8 sps:$4 sm:$0xff]   ;;  %v7343_v47 = vld [vmem:[%s7863_s10 + $0x894] ss:$8 sps:$4 sm:$0xff]  }
 0x272   : > { %5185 = vmatprep.subr.bf16.mxu0 %v7250_v48  ;;  %v7346_v48 = vld [vmem:[%s7863_s10 + $0x1194] ss:$8 sps:$4 sm:$0xff]  }
 0x274   : > { %4709 = vmatpush1.bf16.msra.mxu1 %v7245_v49  ;;  %v7341_v49 = vld [vmem:[%s7863_s10 + $0x890] ss:$8 sps:$4 sm:$0xff]  }
 0x275   : > { %5186 = vmatpush1.bf16.msra.mxu0 %v7248_v50  ;;  %4710 = vmatprep.subr.bf16.mxu1 %v7253_v51  ;;  %v7344_v50 = vld [vmem:[%s7863_s10 + $0x1190] ss:$8 sps:$4 sm:$0xff]   ;;  %v7349_v51 = vld [vmem:[%s7863_s10 + $0x8a4] ss:$8 sps:$4 sm:$0xff]  }
 0x276   : > { %5187 = vmatprep.subr.bf16.mxu0 %v7256_v52  ;;  %v7352_v52 = vld [vmem:[%s7863_s10 + $0x11a4] ss:$8 sps:$4 sm:$0xff]  }
 0x278   : > { %4711 = vmatpush1.bf16.msra.mxu1 %v7251_v53  ;;  %v7347_v53 = vld [vmem:[%s7863_s10 + $0x8a0] ss:$8 sps:$4 sm:$0xff]  }
 0x279   : > { %5188 = vmatpush1.bf16.msra.mxu0 %v7254_v54  ;;  %4712 = vmatprep.subr.bf16.mxu1 %v7259_v55  ;;  %v7350_v54 = vld [vmem:[%s7863_s10 + $0x11a0] ss:$8 sps:$4 sm:$0xff]   ;;  %v7355_v55 = vld [vmem:[%s7863_s10 + $0x8b4] ss:$8 sps:$4 sm:$0xff]  }
 0x27a   : > { %5189 = vmatprep.subr.bf16.mxu0 %v7262_v56  ;;  %v7358_v56 = vld [vmem:[%s7863_s10 + $0x11b4] ss:$8 sps:$4 sm:$0xff]  }
 0x27c   : > { %4713 = vmatpush1.bf16.msra.mxu1 %v7257_v57  ;;  %v7353_v57 = vld [vmem:[%s7863_s10 + $0x8b0] ss:$8 sps:$4 sm:$0xff]  }
 0x27d   : > { %5190 = vmatpush1.bf16.msra.mxu0 %v7260_v58  ;;  %4714 = vmatprep.subr.bf16.mxu1 %v7267_v59  ;;  %v7356_v58 = vld [vmem:[%s7863_s10 + $0x11b0] ss:$8 sps:$4 sm:$0xff]   ;;  %v7361_v59 = vld [vmem:[%s7863_s10 + $0x8c4] ss:$8 sps:$4 sm:$0xff]  }
 0x27e   : > { %5191 = vmatprep.subr.bf16.mxu0 %v7272_v60  ;;  %v7364_v60 = vld [vmem:[%s7863_s10 + $0x11c4] ss:$8 sps:$4 sm:$0xff]  }
 0x280   : > { %4715 = vmatpush1.bf16.msra.mxu1 %v7265_v61  ;;  %v7359_v61 = vld [vmem:[%s7863_s10 + $0x8c0] ss:$8 sps:$4 sm:$0xff]  }
 0x281   : > { %5192 = vmatpush1.bf16.msra.mxu0 %v7270_v62  ;;  %4716 = vmatprep.subr.bf16.mxu1 %v7277_v63  ;;  %v7362_v62 = vld [vmem:[%s7863_s10 + $0x11c0] ss:$8 sps:$4 sm:$0xff]   ;;  %v7367_v63 = vld [vmem:[%s7863_s10 + $0x8d4] ss:$8 sps:$4 sm:$0xff]  }
 0x282   : > { %5193 = vmatprep.subr.bf16.mxu0 %v7280_v0  ;;  %v7370_v0 = vld [vmem:[%s7863_s10 + $0x11d4] ss:$8 sps:$4 sm:$0xff]  }
 0x284   : > { %4717 = vmatpush1.bf16.msra.mxu1 %v7275_v1  ;;  %v7365_v1 = vld [vmem:[%s7863_s10 + $0x8d0] ss:$8 sps:$4 sm:$0xff]  }
 0x285   : > { %5194 = vmatpush1.bf16.msra.mxu0 %v7278_v2  ;;  %4739 = vmatprep.subr.bf16.mxu1 %v7286_v3  ;;  %v7368_v2 = vld [vmem:[%s7863_s10 + $0x11d0] ss:$8 sps:$4 sm:$0xff]   ;;  %v7378_v3 = vld [vmem:[%s7863_s10 + $0x8e4] ss:$8 sps:$4 sm:$0xff]  }
 0x286   : > { %5216 = vmatprep.subr.bf16.mxu0 %v7292_v4  ;;  %v7382_v4 = vld [vmem:[%s7863_s10 + $0x11e4] ss:$8 sps:$4 sm:$0xff]  }
 0x287   : > { %4719 = vmatmul.mubr.bf16.vlgmr.msra.gmra.mrb[0].mxu1 %v7281_v5  ;;  %v7376_v5 = vld [vmem:[%s7863_s10 + $0x8e0] ss:$8 sps:$4 sm:$0xff]  }
 0x288   : > { %5196 = vmatmul.mubr.bf16.vlgmr.msra.gmra.mrb[0].mxu0 %v7287_v6  ;;  %4740 = vmatpush1.bf16.msra.mxu1 %v7284_v7  ;;  %v7380_v6 = vld [vmem:[%s7863_s10 + $0x11e0] ss:$8 sps:$4 sm:$0xff]   ;;  %v7385_v7 = vld [vmem:[%s7863_s10 + $0x8f4] ss:$8 sps:$4 sm:$0xff]  }
 0x289   : > { %5217 = vmatpush1.bf16.msra.mxu0 %v7290_v8  ;;  %4741 = vmatprep.subr.bf16.mxu1 %v7295_v9  ;;  %v7388_v8 = vld [vmem:[%s7863_s10 + $0x11f4] ss:$8 sps:$4 sm:$0xff]   ;;  %v7383_v9 = vld [vmem:[%s7863_s10 + $0x8f0] ss:$8 sps:$4 sm:$0xff]  }
 0x28a   : > { %5218 = vmatprep.subr.bf16.mxu0 %v7298_v10  ;;  %4728 = vmatprep.mubr.bf16.mxu1 %v7371_v11  ;;  %v7386_v10 = vld [vmem:[%s7863_s10 + $0x11f0] ss:$8 sps:$4 sm:$0xff]  }
 0x28b   : > { %5205 = vmatprep.mubr.bf16.mxu0 %v7373_v12  ;;  %v7389_v11 = vld [vmem:[%s7861_s26 + $0x40] ss:$144 sps:$4 sm:$0xff]   ;;  %v7392_v12 = vld [vmem:[%s7861_s26 + $0x88] ss:$144 sps:$4 sm:$0xff]  }
 0x28c   : > { %4742 = vmatpush1.bf16.msra.mxu1 %v7293_v13  ;;  %v7395_v13 = vld [vmem:[%s7861_s26 + $0x164] ss:$144 sps:$4 sm:$0xff]  }
 0x28d   : > { %5219 = vmatpush1.bf16.msra.mxu0 %v7296_v14  ;;  %4743 = vmatprep.subr.bf16.mxu1 %v7301_v15  ;;  %v7397_v14 = vld [vmem:[%s7861_s26 + $0x1ac] ss:$144 sps:$4 sm:$0xff]   ;;  %v7399_v15 = vld [vmem:[%s7861_s26 + $0x160] ss:$144 sps:$4 sm:$0xff]  }
 0x28e   : > { %5220 = vmatprep.subr.bf16.mxu0 %v7304_v16  ;;  %v7400_v16 = vld [vmem:[%s7861_s26 + $0x1a8] ss:$144 sps:$4 sm:$0xff]  }
 0x28f   : > { %4729 = vmatmul.mubr.bf16.gmra.mrb[4].mxu1 %v7375_v17 }
 0x290   : > { %5206 = vmatmul.mubr.bf16.gmra.mrb[4].mxu0 %v7379_v18  ;;  %4744 = vmatpush1.bf16.msra.mxu1 %v7299_v19  ;;  %v419_v18 = vld [vmem:[#allocation2] sm:$0xff] }
 0x291   : > { %5221 = vmatpush1.bf16.msra.mxu0 %v7302_v20  ;;  %4745 = vmatprep.subr.bf16.mxu1 %v7307_v21 }
 0x292   : > { %5222 = vmatprep.subr.bf16.mxu0 %v7310_v22  ;;  %4771 = vmatprep.mubr.bf16.mxu1 %v7391_v23  ;;  %v420_v22 = vld [vmem:[#allocation2 + $0x8] sm:$0xff] }
 0x293   : > { %5248 = vmatprep.mubr.bf16.mxu0 %v7394_v24 }
 0x294   : > { %4746 = vmatpush1.bf16.msra.mxu1 %v7305_v25 }
 0x295   : > { %5223 = vmatpush1.bf16.msra.mxu0 %v7308_v26  ;;  %4747 = vmatprep.subr.bf16.mxu1 %v7313_v27  ;;  %v421_v26 = vld [vmem:[#allocation2 + $0x10] sm:$0xff] }
 0x296   : > { %5224 = vmatprep.subr.bf16.mxu0 %v7316_v28 }
 0x298   : > { %4748 = vmatpush1.bf16.msra.mxu1 %v7311_v29 }
 0x299   : > { %5225 = vmatpush1.bf16.msra.mxu0 %v7314_v30  ;;  %4749 = vmatprep.subr.bf16.mxu1 %v7319_v31  ;;  %v422_v31 = vld [vmem:[#allocation2 + $0x18] sm:$0xff] }
 0x29a   : > { %5226 = vmatprep.subr.bf16.mxu0 %v7322_v32 }
 0x29c   : > { %4750 = vmatpush1.bf16.msra.mxu1 %v7317_v33 }
 0x29d   : > { %5227 = vmatpush1.bf16.msra.mxu0 %v7320_v34  ;;  %4751 = vmatprep.subr.bf16.mxu1 %v7325_v35 }
 0x29e   : > { %5228 = vmatprep.subr.bf16.mxu0 %v7328_v36 }
 0x2a0   : > { %4752 = vmatpush1.bf16.msra.mxu1 %v7323_v37 }
 0x2a1   : > { %5229 = vmatpush1.bf16.msra.mxu0 %v7326_v38  ;;  %4753 = vmatprep.subr.bf16.mxu1 %v7331_v39  ;;  %v423_v38 = vld [vmem:[#allocation2 + $0x20] sm:$0xff] }
 0x2a2   : > { %5230 = vmatprep.subr.bf16.mxu0 %v7334_v40 }
 0x2a4   : > { %4754 = vmatpush1.bf16.msra.mxu1 %v7329_v41 }
 0x2a5   : > { %5231 = vmatpush1.bf16.msra.mxu0 %v7332_v42  ;;  %4755 = vmatprep.subr.bf16.mxu1 %v7337_v43  ;;  %v424_v42 = vld [vmem:[#allocation2 + $0x28] sm:$0xff] }
 0x2a6   : > { %5232 = vmatprep.subr.bf16.mxu0 %v7340_v44 }
 0x2a8   : > { %4756 = vmatpush1.bf16.msra.mxu1 %v7335_v45 }
 0x2a9   : > { %5233 = vmatpush1.bf16.msra.mxu0 %v7338_v46  ;;  %4757 = vmatprep.subr.bf16.mxu1 %v7343_v47  ;;  %v425_v46 = vld [vmem:[#allocation2 + $0x30] sm:$0xff] }
 0x2aa   : > { %5234 = vmatprep.subr.bf16.mxu0 %v7346_v48 }
 0x2ac   : > { %4758 = vmatpush1.bf16.msra.mxu1 %v7341_v49 }
 0x2ad   : > { %5235 = vmatpush1.bf16.msra.mxu0 %v7344_v50  ;;  %4759 = vmatprep.subr.bf16.mxu1 %v7349_v51  ;;  %v426_v51 = vld [vmem:[#allocation2 + $0x38] sm:$0xff] }
 0x2ae   : > { %5236 = vmatprep.subr.bf16.mxu0 %v7352_v52 }
 0x2b0   : > { %4760 = vmatpush1.bf16.msra.mxu1 %v7347_v53 }
 0x2b1   : > { %5237 = vmatpush1.bf16.msra.mxu0 %v7350_v54  ;;  %4761 = vmatprep.subr.bf16.mxu1 %v7355_v55 }
 0x2b2   : > { %5238 = vmatprep.subr.bf16.mxu0 %v7358_v56 }
 0x2b4   : > { %4762 = vmatpush1.bf16.msra.mxu1 %v7353_v57  ;;  %v5299_v57 = vlaneseq (!%p6170_p12) }
 0x2b5   : > { %5239 = vmatpush1.bf16.msra.mxu0 %v7356_v58  ;;  %4763 = vmatprep.subr.bf16.mxu1 %v7361_v59  ;;  %v5297_v59 = vld [vmem:[%s404_s22] sm:$0x3] (!%p6170_p12) }
 0x2b6   : > { %5240 = vmatprep.subr.bf16.mxu0 %v7364_v60  ;;  %v5300_v58 = vshrl.u32 (!%p6170_p12), %v5299_v57, 7 }
 0x2b8   : > { %4764 = vmatpush1.bf16.msra.mxu1 %v7359_v61 }
 0x2b9   : > { %5241 = vmatpush1.bf16.msra.mxu0 %v7362_v62  ;;  %4765 = vmatprep.subr.bf16.mxu1 %v7367_v63  ;;  %v5301_v62 = vsub.s32 (!%p6170_p12), 0, %v5300_v58  ;;  %v5305_v63 = vsub.s32 (!%p6170_p12), 1, %v5300_v58 }
 0x2ba   : > { %5242 = vmatprep.subr.bf16.mxu0 %v7370_v0 }
 0x2bc   : > { %4766 = vmatpush1.bf16.msra.mxu1 %v7365_v1 }
 0x2bd   : > { %5243 = vmatpush1.bf16.msra.mxu0 %v7368_v2  ;;  %4767 = vmatprep.subr.bf16.mxu1 %v7378_v3  ;;  %v5302_v3 = vrot.slane (!%p6170_p12), %v5297_v59, %v5301_v62 }
 0x2be   : > { %5244 = vmatprep.subr.bf16.mxu0 %v7382_v4  ;;  %v5306_v4 = vrot.slane (!%p6170_p12), %v5297_v59, %v5305_v63 }
 0x2c0   : > { %4768 = vmatpush1.bf16.msra.mxu1 %v7376_v5 }
 0x2c1   : > { %5245 = vmatpush1.bf16.msra.mxu0 %v7380_v6  ;;  %4769 = vmatprep.subr.bf16.mxu1 %v7385_v7 }
 0x2c2   : > { %5246 = vmatprep.subr.bf16.mxu0 %v7388_v8 }
 0x2c4   : > { %4770 = vmatpush1.bf16.msra.mxu1 %v7383_v9 }
 0x2c5   : > { %5247 = vmatpush1.bf16.msra.mxu0 %v7386_v10 }
 0x2c7   : > { %4772 = vmatmul.mubr.bf16.vlgmr.msra.gmra.mrb[0].mxu1 %v7389_v11 }
 0x2c8   : > { %5249 = vmatmul.mubr.bf16.vlgmr.msra.gmra.mrb[0].mxu0 %v7392_v12  ;;  %4781 = vmatprep.mubr.bf16.mxu1 %v7395_v13 }
 0x2c9   : > { %5258 = vmatprep.mubr.bf16.mxu0 %v7397_v14 }
 0x2cf   : > { %4782 = vmatmul.mubr.bf16.gmra.mrb[4].mxu1 %v7399_v15 }
 0x2d0   : > { %5259 = vmatmul.mubr.bf16.gmra.mrb[4].mxu0 %v7400_v16 }
 0x39a   : > { %v4773_v17 = vpop.f32.mrb[0].mxu1 }
 0x39b   : > { %v5250_v19 = vpop.f32.mrb[0].mxu0  ;;  %v4775_v21 = vpop.f32.mrb[1].mxu1 }
 0x39c   : > { %v6187_v20 = vadd.f32 %v5250_v19, %v4773_v17  ;;  %v5252_v23 = vpop.f32.mrb[1].mxu0  ;;  %v4777_v25 = vpop.f32.mrb[2].mxu1 }
 0x39d   : > { %v6188_v24 = vadd.f32 %v5252_v23, %v4775_v21  ;;  %v5254_v27 = vpop.f32.mrb[2].mxu0  ;;  %v4779_v30 = vpop.f32.mrb[3].mxu1 }
 0x39e   : > { %v5269_v28 = vadd.f32 %v6187_v20, %v419_v18  ;;  %v6189_v29 = vadd.f32 %v5254_v27, %v4777_v25  ;;  %v5256_v32 = vpop.f32.mrb[3].mxu0 }
 0x39f   : > { %v5270_v33 = vadd.f32 %v6188_v24, %v420_v22  ;;  %v6190_v34 = vadd.f32 %v5256_v32, %v4779_v30 }
 0x3a0   : > { %5277 = vst [vmem:[#allocation2] sm:$0xff] %v5269_v28  ;;  %v5271_v35 = vadd.f32 %v6189_v29, %v421_v26 }
 0x3a1   : > { %5278 = vst [vmem:[#allocation2 + $0x8] sm:$0xff] %v5270_v33  ;;  %v5272_v36 = vadd.f32 %v6190_v34, %v422_v31 }
 0x3a2   : > { %5279 = vst [vmem:[#allocation2 + $0x10] sm:$0xff] %v5271_v35  ;;  %v4783_v37 = vpop.f32.mrb[4].mxu1 }
 0x3a3   : > { %5280 = vst [vmem:[#allocation2 + $0x18] sm:$0xff] %v5272_v36  ;;  %v5260_v39 = vpop.f32.mrb[4].mxu0  ;;  %v4785_v41 = vpop.f32.mrb[5].mxu1 }
 0x3a4   : > { %v6191_v40 = vadd.f32 %v5260_v39, %v4783_v37  ;;  %v5262_v43 = vpop.f32.mrb[5].mxu0  ;;  %v4787_v45 = vpop.f32.mrb[6].mxu1 }
 0x3a5   : > { %v6192_v44 = vadd.f32 %v5262_v43, %v4785_v41  ;;  %v5264_v47 = vpop.f32.mrb[6].mxu0  ;;  %v4789_v50 = vpop.f32.mrb[7].mxu1  ;;  %5288 = sbr.rel (%p6170_p12) target bundleno = 954 (0x3ba), region = 67 }
 0x3a6   : > { %v5273_v48 = vadd.f32 %v6191_v40, %v423_v38  ;;  %v6193_v49 = vadd.f32 %v5264_v47, %v4787_v45  ;;  %v5266_v52 = vpop.f32.mrb[7].mxu0 }
 0x3a7   : > { %v5274_v53 = vadd.f32 %v6192_v44, %v424_v42  ;;  %v6194_v54 = vadd.f32 %v5266_v52, %v4789_v50  ;;  %v5289_v60 = vld [vmem:[#allocation2] sm:$0xff] (!%p6170_p12) }
 0x3a8   : > { %5281 = vst [vmem:[#allocation2 + $0x20] sm:$0xff] %v5273_v48  ;;  %v5275_v55 = vadd.f32 %v6193_v49, %v425_v46  ;;  %v5290_v61 = vld [vmem:[#allocation2 + $0x8] sm:$0xff] (!%p6170_p12)  ;;  %v5309_v8 = vadd.f32 (!%p6170_p12), %v5302_v3, %v5289_v60 }
 0x3a9   : > { %5282 = vst [vmem:[#allocation2 + $0x28] sm:$0xff] %v5274_v53  ;;  %v5276_v56 = vadd.f32 %v6194_v54, %v426_v51  ;;  %v5291_v0 = vld [vmem:[#allocation2 + $0x10] sm:$0xff] (!%p6170_p12)  ;;  %v5310_v9 = vadd.f32 (!%p6170_p12), %v5306_v4, %v5290_v61 }
 0x3aa   : > { %5283 = vst [vmem:[#allocation2 + $0x30] sm:$0xff] %v5275_v55  ;;  %v5292_v1 = vld [vmem:[#allocation2 + $0x18] sm:$0xff] (!%p6170_p12)  ;;  %v5311_v10 = vadd.f32 (!%p6170_p12), %v5302_v3, %v5291_v0  ;;  %v5317_v16 = vmax.f32 (!%p6170_p12), %v5309_v8, 0.0 }
 0x3ab   : > { %5284 = vst [vmem:[#allocation2 + $0x38] sm:$0xff] %v5276_v56  ;;  %v5312_v11 = vadd.f32 (!%p6170_p12), %v5306_v4, %v5292_v1  ;;  %v5318_v17 = vmax.f32 (!%p6170_p12), %v5310_v9, 0.0 }
 0x3ac   : > { %v5319_v18 = vmax.f32 %v5311_v10, 0.0 }
 0x3ad   : > { %v5320_v19 = vmax.f32 %v5312_v11, 0.0  ;;  %v6182_v24 = vpack.c.bf16 %v5318_v17, %v5317_v16 }
 0x3af   : > { %v5293_v2 = vld [vmem:[#allocation2 + $0x20] sm:$0xff]  ;;  %v6183_v25 = vpack.c.bf16 %v5320_v19, %v5319_v18  ;;  %5349 = vst [vmem:[%s7877_s27] sm:$0xff] %v6182_v24 }
 0x3b0   : > { %v5294_v5 = vld [vmem:[#allocation2 + $0x28] sm:$0xff]  ;;  %v5313_v12 = vadd.f32 %v5302_v3, %v5293_v2 }
 0x3b1   : > { %v5295_v6 = vld [vmem:[#allocation2 + $0x30] sm:$0xff]  ;;  %v5314_v13 = vadd.f32 %v5306_v4, %v5294_v5  ;;  %5350 = vst [vmem:[%s7877_s27 + $0x8] sm:$0xff] %v6183_v25 }
 0x3b2   : > { %v5296_v7 = vld [vmem:[#allocation2 + $0x38] sm:$0xff]  ;;  %v5315_v14 = vadd.f32 %v5302_v3, %v5295_v6  ;;  %v5321_v20 = vmax.f32 %v5313_v12, 0.0 }
 0x3b3   : > { %v5316_v15 = vadd.f32 %v5306_v4, %v5296_v7  ;;  %v5322_v21 = vmax.f32 %v5314_v13, 0.0 }
 0x3b4   : > { %v5323_v22 = vmax.f32 %v5315_v14, 0.0 }
 0x3b5   : > { %v5324_v23 = vmax.f32 %v5316_v15, 0.0  ;;  %v6184_v26 = vpack.c.bf16 %v5322_v21, %v5321_v20 }
 0x3b7   : > { %v6185_v27 = vpack.c.bf16 %v5324_v23, %v5323_v22  ;;  %5351 = vst [vmem:[%s7877_s27 + $0x10] sm:$0xff] %v6184_v26 }
 0x3b9   : > { %5352 = vst [vmem:[%s7877_s27 + $0x18] sm:$0xff] %v6185_v27 }
 0x3ba PF: > { %p8601_p11 = scmp.ne.s32.totalorder %s8599_s14, 0 }
 0x3bb   : > { %s6186_s19 = sshll.u32 (%p8601_p11), %s7515_s20, 3  ;;  %v5396_v28 = vld [vmem:[%s7877_s27] sm:$0xff] (%p8601_p11)  ;;  %v5398_v29 = vld [vmem:[%s7877_s27 + $0x8] sm:$0xff] (%p8601_p11) }
 0x3bc   : > { %5359 = sbr.rel (!%p8601_p11) target bundleno = 963 (0x3c3), region = 71  ;;  %s5362_s5 = scalar_lea.vmem (%p8601_p11), %s8587_s3, %s6186_s19 }
 0x3bd   : > { %5397 = vst [vmem:[%s5362_s5] sm:$0xff] (%p8601_p11), %v5396_v28  ;;  %5399 = vst [vmem:[%s5362_s5 + $0x10] sm:$0xff] (%p8601_p11), %v5398_v29 }
 0x3be   : > { %v5400_v30 = vld [vmem:[%s7877_s27 + $0x10] sm:$0xff] (%p8601_p11) }
 0x3bf   : > { %5401 = vst [vmem:[%s5362_s5 + $0x20] sm:$0xff] (%p8601_p11), %v5400_v30 }
 0x3c0   : > { %v5402_v31 = vld [vmem:[%s7877_s27 + $0x18] sm:$0xff] (%p8601_p11) }
 0x3c1   : > { %5403 = vst [vmem:[%s5362_s5 + $0x30] sm:$0xff] (%p8601_p11), %v5402_v31 }
 0x3c3 PF: > { %s16_s23 = sadd.s32 1, %s7527_s23   ;;  %s8602_s20 = sld [smem:[#allocation11_spill]] }
 0x3c4   : > { %p13_p13 = scmp.ge.s32.totalorder %s16_s23, 10   ;;  %s8603_s6 = sld [smem:[#allocation8_spill]] }
 0x3c5   : > { %s8604_s25 = sld [smem:[#allocation9_spill]]  ;;  %s8605_s22 = sld [smem:[#allocation10_spill]] }
 0x3c6   : > { %s8606_s12 = smov %s7487_s13  ;;  %s8607_s13 = smov %s7657_s11 }
 0x3c7   : > { %s8608_s14 = smov %s7495_s15  ;;  %s8609_s15 = smov %s7499_s16 }
 0x3c8   : > { %s8610_s16 = smov %s7649_s8  ;;  %s8611_s17 = smov %s7507_s18 }
 0x3c9   : > { %s8612_s18 = smov %s8602_s20  ;;  %s8613_s19 = smov %s7519_s21 }
 0x3ca   : > { %s8614_s20 = smov %s8603_s6  ;;  %15 = sbr.rel (!%p13_p13) target bundleno = 9 (0x9), region = 152 }
 0x3cb   : > { %s8615_s21 = smov %s8604_s25 }
 0x3d1   :  { %5419 = vsyncpa [#allocation5], 1 }
 0x3d2   :  { %5421 = vsyncpa [#allocation5 + $0x1], 1 }

</bundles_post_ra>
